<compile_context>
chip_gen: v7x
topology: tpu7x:2x2x1
jax: 0.10.0
libtpu: 0.0.40
codegen_flags: <defaults>
</compile_context>

<pallas_src>
import functools
from typing import NamedTuple

import jax
import jax.numpy as jnp
from jax.experimental import pallas as pl
from jax.experimental.pallas import tpu as pltpu

LANE = 128


def _round_up(x, m):
    return ((x + m - 1) // m) * m


def _device_kind():
    try:
        return jax.devices()[0].device_kind.lower()
    except Exception:
        return ""


def _num_tensorcores():
    # v7x has 2 TensorCores per chip; "parallel" grid axes are sharded across them.
    return 2 if "v7" in _device_kind() else 1


def _default_bf16_epilogue():
    # v6e / v7x VALUs are bf16-capable; v5e (and older) are not -> keep f32 there.
    kind = _device_kind()
    return ("v6" in kind) or ("v7" in kind)


# ----------------------------------------------------------------------------
# Kernel: whole 4-layer MLP fused; grid tiles only the batch axis, all weights
# stay VMEM-resident (constant index_map). bf16 MXU operands, f32 accumulation.
# ----------------------------------------------------------------------------
def _generator_kernel(z_ref,
                      w1_ref, b1_ref,
                      w2_ref, b2_ref,
                      w3_ref, b3_ref,
                      w4_ref, b4_ref,
                      out_ref, *, bf16_epilogue):
    def hidden(x, w_ref, b_ref):
        acc = jnp.dot(x, w_ref[...], preferred_element_type=jnp.float32)
        if bf16_epilogue:
            # v6e/v7x: bias add + ReLU in bf16 (half the VALU vreg-ops); the
            # bf16 result feeds the next MXU matmul directly.
            return jnp.maximum(acc.astype(jnp.bfloat16) + b_ref[...], 0.0)
        # v5e: no bf16 VALU -> keep the epilogue in f32, cast only for the MXU.
        return jnp.maximum(acc + b_ref[...], 0.0).astype(jnp.bfloat16)

    h = hidden(z_ref[...], w1_ref, b1_ref)     # z is pre-cast to bf16, lane-dense
    h = hidden(h, w2_ref, b2_ref)
    h = hidden(h, w3_ref, b3_ref)
    acc = jnp.dot(h, w4_ref[...], preferred_element_type=jnp.float32) + b4_ref[...]
    out_ref[...] = jnp.tanh(acc)               # f32 tanh (EUP), lane-dense f32 store


# ----------------------------------------------------------------------------
# One-time parameter prep (hoisted out of the per-call path).
# ----------------------------------------------------------------------------
class PreparedGeneratorParams(NamedTuple):
    w1: jax.Array
    b1: jax.Array
    w2: jax.Array
    b2: jax.Array
    w3: jax.Array
    b3: jax.Array
    w4: jax.Array
    b4: jax.Array
    input_dim: int
    in_pad: int
    output_dim: int
    out_pad: int
    bf16_epilogue: bool


def prepare_generator_params(params, *, bf16_epilogue=None):
    """Cast weights to bf16 and zero-pad the latent dim (w1 rows) and the final
    layer (w4 cols / b4) to lane-dense multiples of 128. Call once at init."""
    if bf16_epilogue is None:
        bf16_epilogue = _default_bf16_epilogue()

    input_dim = params["w1"].shape[0]
    output_dim = params["w4"].shape[1]
    in_pad = _round_up(input_dim, LANE)
    out_pad = _round_up(output_dim, LANE)

    w1 = params["w1"]
    if in_pad != input_dim:
        w1 = jnp.pad(w1, ((0, in_pad - input_dim), (0, 0)))
    w4, b4 = params["w4"], params["b4"]
    if out_pad != output_dim:
        w4 = jnp.pad(w4, ((0, 0), (0, out_pad - output_dim)))
        b4 = jnp.pad(b4, ((0, 0), (0, out_pad - output_dim)))

    bias_dtype = jnp.bfloat16 if bf16_epilogue else jnp.float32
    return PreparedGeneratorParams(
        w1=w1.astype(jnp.bfloat16), b1=params["b1"].astype(bias_dtype),
        w2=params["w2"].astype(jnp.bfloat16), b2=params["b2"].astype(bias_dtype),
        w3=params["w3"].astype(jnp.bfloat16), b3=params["b3"].astype(bias_dtype),
        w4=w4.astype(jnp.bfloat16), b4=b4.astype(jnp.float32),
        input_dim=input_dim, in_pad=in_pad,
        output_dim=output_dim, out_pad=out_pad,
        bf16_epilogue=bool(bf16_epilogue),
    )


def _choose_batch_tile(batch, num_cores):
    b8 = _round_up(batch, 8)
    if b8 >= 1024:
        tile = 512          # ~4:1 MXU accumulate:weight-push, few grid steps
    elif b8 >= 512:
        tile = 256
    elif b8 >= 256:
        tile = 128
    else:
        tile = b8           # tiny batch: pay the per-step overhead once
    if num_cores > 1:
        # Guarantee at least `num_cores` grid steps so every TensorCore works.
        tile = min(tile, _round_up(pl.cdiv(b8, num_cores), 8))
    return max(8, tile)


# ----------------------------------------------------------------------------
# Forward wrapper.
# ----------------------------------------------------------------------------
def generator_forward(z, prepared, *, batch_tile=None):
    """Fused WGAN-generator MLP as one Pallas TPU kernel.

    z:        [B, input_dim] float array
    prepared: PreparedGeneratorParams (preferred; prep once outside the loop)
              or a raw dict {w1..w4: [in,out], b1..b4: [1,out]} matching
              PyTorch's y = x @ W.T + b with W stored transposed as [in,out].
    """
    if not isinstance(prepared, PreparedGeneratorParams):
        prepared = prepare_generator_params(prepared)
    p = prepared

    B, input_dim = z.shape
    assert input_dim == p.input_dim

    num_cores = _num_tensorcores()
    if batch_tile is None:
        batch_tile = _choose_batch_tile(B, num_cores)
    batch_tile = max(8, _round_up(batch_tile, 8))

    steps = pl.cdiv(B, batch_tile)
    if num_cores > 1:
        steps = _round_up(steps, num_cores)    # even split across TensorCores
    B_pad = steps * batch_tile

    # Lane-dense bf16 LHS: pad latent dim to 128 lanes, batch to the tile multiple.
    z_p = jnp.pad(z.astype(jnp.bfloat16),
                  ((0, B_pad - B), (0, p.in_pad - input_dim)))

    weight_args = (p.w1, p.b1, p.w2, p.b2, p.w3, p.b3, p.w4, p.b4)

    flops = 2 * B_pad * (p.in_pad * 256 + 256 * 512 + 512 * 1024 + 1024 * p.out_pad)
    bytes_accessed = (z_p.size * z_p.dtype.itemsize
                      + sum(a.size * a.dtype.itemsize for a in weight_args)
                      + B_pad * p.out_pad * 4)
    cost = pl.CostEstimate(flops=flops,
                           transcendentals=B_pad * p.out_pad,
                           bytes_accessed=bytes_accessed)

    kernel = functools.partial(_generator_kernel, bf16_epilogue=p.bf16_epilogue)

    def build_and_call(single_buffer_consts):
        def const_spec(arr):
            # Same full block at every grid step -> weights stay VMEM-resident.
            if single_buffer_consts:
                # Constant index: no double buffer needed, saves VMEM headroom.
                return pl.BlockSpec(arr.shape, lambda i: (0, 0),
                                    pipeline_mode=pl.Buffered(1))
            return pl.BlockSpec(arr.shape, lambda i: (0, 0))

        grid_spec = pltpu.PrefetchScalarGridSpec(
            num_scalar_prefetch=0,
            grid=(steps,),
            in_specs=[pl.BlockSpec((batch_tile, p.in_pad), lambda i: (i, 0))]
                     + [const_spec(a) for a in weight_args],
            out_specs=pl.BlockSpec((batch_tile, p.out_pad), lambda i: (i, 0)),
        )
        return pl.pallas_call(
            kernel,
            out_shape=jax.ShapeDtypeStruct((B_pad, p.out_pad), jnp.float32),
            grid_spec=grid_spec,
            compiler_params=pltpu.CompilerParams(
                dimension_semantics=("parallel",),
                vmem_limit_bytes=32 * 1024 * 1024,  # fits v7x's 64 MiB physical VMEM
            ),
            cost_estimate=cost,
        )(z_p, *weight_args)

    try:
        out = build_and_call(True)
    except Exception:
        # pl.Buffered(1) on a top-level BlockSpec not supported by this jax
        # version -> fall back to default double buffering (correctness same).
        out = build_and_call(False)

    # Slice away the batch padding and the lane padding of the last layer.
    return out[:B, :p.output_dim]


# ----------------------------------------------------------------------------
# Init + reference + self-test
# ----------------------------------------------------------------------------
def init_params(key, input_dim, output_dim):
    """PyTorch-like uniform(-1/sqrt(fan_in), 1/sqrt(fan_in)) init, f32."""
    dims = [(input_dim, 256), (256, 512), (512, 1024), (1024, output_dim)]
    params = {}
    for idx, (fan_in, fan_out) in enumerate(dims, start=1):
        key, kw, kb = jax.random.split(key, 3)
        bound = 1.0 / float(fan_in) ** 0.5
        params[f"w{idx}"] = jax.random.uniform(
            kw, (fan_in, fan_out), jnp.float32, -bound, bound)
        params[f"b{idx}"] = jax.random.uniform(
            kb, (1, fan_out), jnp.float32, -bound, bound)
    return params


def generator_reference(z, p: PreparedGeneratorParams):
    """Pure-JAX reference following the exact kernel numeric recipe."""
    x = jnp.pad(z.astype(jnp.bfloat16), ((0, 0), (0, p.in_pad - p.input_dim)))

    def hidden(x, w, b):
        acc = jnp.dot(x, w, preferred_element_type=jnp.float32)
        if p.bf16_epilogue:
            return jnp.maximum(acc.astype(jnp.bfloat16) + b, 0.0)
        return jnp.maximum(acc + b, 0.0).astype(jnp.bfloat16)

    h = hidden(x, p.w1, p.b1)
    h = hidden(h, p.w2, p.b2)
    h = hidden(h, p.w3, p.b3)
    out = jnp.tanh(jnp.dot(h, p.w4, preferred_element_type=jnp.float32) + p.b4)
    return out[:, :p.output_dim]


if __name__ == "__main__":
    key = jax.random.PRNGKey(0)
    k_param, k_z1, k_z2 = jax.random.split(key, 3)

    input_dim = 32     # latent dim z
    output_dim = 64    # generated sample dim
    raw_params = init_params(k_param, input_dim, output_dim)
    # One-time prep, hoisted out of the per-call hot path (perf-review item 1).
    params = prepare_generator_params(raw_params)

    # Case 1: tiny batch -> one grid step (or one per TensorCore on v7x).
    z_small = jax.random.normal(k_z1, (16, input_dim), jnp.float32)
    out_small = jax.block_until_ready(generator_forward(z_small, params))
    assert out_small.shape == (16, output_dim)
    ref_small = generator_reference(z_small, params)
    assert jnp.allclose(out_small, ref_small, atol=2e-3, rtol=2e-3), \
        "small-batch mismatch vs reference"

    # Case 2: non-aligned larger batch -> 128-row tiles, zero-padded batch,
    # multi-step 'parallel' grid (exercises padding + tiling + megacore paths).
    z_big = jax.random.normal(k_z2, (300, input_dim), jnp.float32)
    out_big = jax.block_until_ready(generator_forward(z_big, params))
    assert out_big.shape == (300, output_dim)
    ref_big = generator_reference(z_big, params)
    assert jnp.allclose(out_big, ref_big, atol=2e-3, rtol=2e-3), \
        "large-batch mismatch vs reference"

    print("KERNEL_OK")
</pallas_src>

<mosaic_0001>
module attributes {stable_mosaic.version = 11 : i64} {
  func.func @_generator_kernel(%arg0: i32, %arg1: memref<16x128xbf16, #tpu.memory_space<vmem>>, %arg2: memref<128x256xbf16, #tpu.memory_space<vmem>>, %arg3: memref<1x256xf32, #tpu.memory_space<vmem>>, %arg4: memref<256x512xbf16, #tpu.memory_space<vmem>>, %arg5: memref<1x512xf32, #tpu.memory_space<vmem>>, %arg6: memref<512x1024xbf16, #tpu.memory_space<vmem>>, %arg7: memref<1x1024xf32, #tpu.memory_space<vmem>>, %arg8: memref<1024x128xbf16, #tpu.memory_space<vmem>>, %arg9: memref<1x128xf32, #tpu.memory_space<vmem>>, %arg10: memref<16x128xf32, #tpu.memory_space<vmem>>) attributes {dimension_semantics = [#tpu.dimension_semantics<parallel>], iteration_bounds = array<i64: 1>, scalar_prefetch = 0 : i64, scratch_operands = 0 : i64, tpu.core_type = #tpu.core_type<tc>, window_params = [{transform_indices = @transform_0, window_bounds = array<i64: 16, 128>}, {pipeline_mode = #tpu.pipeline_mode<synchronous>, transform_indices = @transform_1, window_bounds = array<i64: 128, 256>}, {pipeline_mode = #tpu.pipeline_mode<synchronous>, transform_indices = @transform_2, window_bounds = array<i64: 1, 256>}, {pipeline_mode = #tpu.pipeline_mode<synchronous>, transform_indices = @transform_3, window_bounds = array<i64: 256, 512>}, {pipeline_mode = #tpu.pipeline_mode<synchronous>, transform_indices = @transform_4, window_bounds = array<i64: 1, 512>}, {pipeline_mode = #tpu.pipeline_mode<synchronous>, transform_indices = @transform_5, window_bounds = array<i64: 512, 1024>}, {pipeline_mode = #tpu.pipeline_mode<synchronous>, transform_indices = @transform_6, window_bounds = array<i64: 1, 1024>}, {pipeline_mode = #tpu.pipeline_mode<synchronous>, transform_indices = @transform_7, window_bounds = array<i64: 1024, 128>}, {pipeline_mode = #tpu.pipeline_mode<synchronous>, transform_indices = @transform_8, window_bounds = array<i64: 1, 128>}, {transform_indices = @transform_9, window_bounds = array<i64: 16, 128>}]} {
    %c0 = arith.constant 0 : index
    %c0_0 = arith.constant 0 : index
    %0 = vector.load %arg1[%c0, %c0_0] : memref<16x128xbf16, #tpu.memory_space<vmem>>, vector<16x128xbf16>
    %c0_1 = arith.constant 0 : index
    %c0_2 = arith.constant 0 : index
    %1 = vector.load %arg2[%c0_1, %c0_2] : memref<128x256xbf16, #tpu.memory_space<vmem>>, vector<128x256xbf16>
    %cst = arith.constant dense<0.000000e+00> : vector<16x256xf32>
    %2 = tpu.matmul %0, %1, %cst {dimension_numbers = #tpu.dot_dimension_numbers<[1], [0], [0], [1], [0, 0, 1, 1], [], []>} : vector<16x128xbf16>, vector<128x256xbf16>, vector<16x256xf32> -> vector<16x256xf32>
    %c0_3 = arith.constant 0 : index
    %c0_4 = arith.constant 0 : index
    %3 = vector.load %arg3[%c0_3, %c0_4] : memref<1x256xf32, #tpu.memory_space<vmem>>, vector<1x256xf32>
    %4 = vector.broadcast %3 : vector<1x256xf32> to vector<16x256xf32>
    %5 = arith.addf %2, %4 : vector<16x256xf32>
    %cst_5 = arith.constant 0.000000e+00 : f32
    %6 = vector.broadcast %cst_5 : f32 to vector<16x256xf32>
    %7 = arith.maximumf %5, %6 : vector<16x256xf32>
    %8 = arith.truncf %7 : vector<16x256xf32> to vector<16x256xbf16>
    %c0_6 = arith.constant 0 : index
    %c0_7 = arith.constant 0 : index
    %9 = vector.load %arg4[%c0_6, %c0_7] : memref<256x512xbf16, #tpu.memory_space<vmem>>, vector<256x512xbf16>
    %cst_8 = arith.constant dense<0.000000e+00> : vector<16x512xf32>
    %10 = tpu.matmul %8, %9, %cst_8 {dimension_numbers = #tpu.dot_dimension_numbers<[1], [0], [0], [1], [0, 0, 1, 1], [], []>} : vector<16x256xbf16>, vector<256x512xbf16>, vector<16x512xf32> -> vector<16x512xf32>
    %c0_9 = arith.constant 0 : index
    %c0_10 = arith.constant 0 : index
    %11 = vector.load %arg5[%c0_9, %c0_10] : memref<1x512xf32, #tpu.memory_space<vmem>>, vector<1x512xf32>
    %12 = vector.broadcast %11 : vector<1x512xf32> to vector<16x512xf32>
    %13 = arith.addf %10, %12 : vector<16x512xf32>
    %cst_11 = arith.constant 0.000000e+00 : f32
    %14 = vector.broadcast %cst_11 : f32 to vector<16x512xf32>
    %15 = arith.maximumf %13, %14 : vector<16x512xf32>
    %16 = arith.truncf %15 : vector<16x512xf32> to vector<16x512xbf16>
    %c0_12 = arith.constant 0 : index
    %c0_13 = arith.constant 0 : index
    %17 = vector.load %arg6[%c0_12, %c0_13] : memref<512x1024xbf16, #tpu.memory_space<vmem>>, vector<512x1024xbf16>
    %cst_14 = arith.constant dense<0.000000e+00> : vector<16x1024xf32>
    %18 = tpu.matmul %16, %17, %cst_14 {dimension_numbers = #tpu.dot_dimension_numbers<[1], [0], [0], [1], [0, 0, 1, 1], [], []>} : vector<16x512xbf16>, vector<512x1024xbf16>, vector<16x1024xf32> -> vector<16x1024xf32>
    %c0_15 = arith.constant 0 : index
    %c0_16 = arith.constant 0 : index
    %19 = vector.load %arg7[%c0_15, %c0_16] : memref<1x1024xf32, #tpu.memory_space<vmem>>, vector<1x1024xf32>
    %20 = vector.broadcast %19 : vector<1x1024xf32> to vector<16x1024xf32>
    %21 = arith.addf %18, %20 : vector<16x1024xf32>
    %cst_17 = arith.constant 0.000000e+00 : f32
    %22 = vector.broadcast %cst_17 : f32 to vector<16x1024xf32>
    %23 = arith.maximumf %21, %22 : vector<16x1024xf32>
    %24 = arith.truncf %23 : vector<16x1024xf32> to vector<16x1024xbf16>
    %c0_18 = arith.constant 0 : index
    %c0_19 = arith.constant 0 : index
    %25 = vector.load %arg8[%c0_18, %c0_19] : memref<1024x128xbf16, #tpu.memory_space<vmem>>, vector<1024x128xbf16>
    %cst_20 = arith.constant dense<0.000000e+00> : vector<16x128xf32>
    %26 = tpu.matmul %24, %25, %cst_20 {dimension_numbers = #tpu.dot_dimension_numbers<[1], [0], [0], [1], [0, 0, 1, 1], [], []>} : vector<16x1024xbf16>, vector<1024x128xbf16>, vector<16x128xf32> -> vector<16x128xf32>
    %c0_21 = arith.constant 0 : index
    %c0_22 = arith.constant 0 : index
    %27 = vector.load %arg9[%c0_21, %c0_22] : memref<1x128xf32, #tpu.memory_space<vmem>>, vector<1x128xf32>
    %28 = vector.broadcast %27 : vector<1x128xf32> to vector<16x128xf32>
    %29 = arith.addf %26, %28 : vector<16x128xf32>
    %30 = math.tanh %29 : vector<16x128xf32>
    %c0_23 = arith.constant 0 : index
    %c0_24 = arith.constant 0 : index
    %31 = vector.load %arg10[%c0_23, %c0_24] : memref<16x128xf32, #tpu.memory_space<vmem>>, vector<16x128xf32>
    tpu.vector_store %arg10[%c0_23, %c0_24], %30 {strides = array<i32>} : memref<16x128xf32, #tpu.memory_space<vmem>>, vector<16x128xf32>,
    return
  }
  func.func @transform_0(%arg0: i32) -> (i32, i32) {
    %c0_i32 = arith.constant 0 : i32
    %c0_i32_0 = arith.constant 0 : i32
    return %arg0, %c0_i32 : i32, i32
  }
  func.func @transform_1(%arg0: i32) -> (i32, i32) {
    %c0_i32 = arith.constant 0 : i32
    %c0_i32_0 = arith.constant 0 : i32
    %c0_i32_1 = arith.constant 0 : i32
    return %c0_i32, %c0_i32_0 : i32, i32
  }
  func.func @transform_2(%arg0: i32) -> (i32, i32) {
    %c0_i32 = arith.constant 0 : i32
    %c0_i32_0 = arith.constant 0 : i32
    %c0_i32_1 = arith.constant 0 : i32
    return %c0_i32, %c0_i32_0 : i32, i32
  }
  func.func @transform_3(%arg0: i32) -> (i32, i32) {
    %c0_i32 = arith.constant 0 : i32
    %c0_i32_0 = arith.constant 0 : i32
    %c0_i32_1 = arith.constant 0 : i32
    return %c0_i32, %c0_i32_0 : i32, i32
  }
  func.func @transform_4(%arg0: i32) -> (i32, i32) {
    %c0_i32 = arith.constant 0 : i32
    %c0_i32_0 = arith.constant 0 : i32
    %c0_i32_1 = arith.constant 0 : i32
    return %c0_i32, %c0_i32_0 : i32, i32
  }
  func.func @transform_5(%arg0: i32) -> (i32, i32) {
    %c0_i32 = arith.constant 0 : i32
    %c0_i32_0 = arith.constant 0 : i32
    %c0_i32_1 = arith.constant 0 : i32
    return %c0_i32, %c0_i32_0 : i32, i32
  }
  func.func @transform_6(%arg0: i32) -> (i32, i32) {
    %c0_i32 = arith.constant 0 : i32
    %c0_i32_0 = arith.constant 0 : i32
    %c0_i32_1 = arith.constant 0 : i32
    return %c0_i32, %c0_i32_0 : i32, i32
  }
  func.func @transform_7(%arg0: i32) -> (i32, i32) {
    %c0_i32 = arith.constant 0 : i32
    %c0_i32_0 = arith.constant 0 : i32
    %c0_i32_1 = arith.constant 0 : i32
    return %c0_i32, %c0_i32_0 : i32, i32
  }
  func.func @transform_8(%arg0: i32) -> (i32, i32) {
    %c0_i32 = arith.constant 0 : i32
    %c0_i32_0 = arith.constant 0 : i32
    %c0_i32_1 = arith.constant 0 : i32
    return %c0_i32, %c0_i32_0 : i32, i32
  }
  func.func @transform_9(%arg0: i32) -> (i32, i32) {
    %c0_i32 = arith.constant 0 : i32
    %c0_i32_0 = arith.constant 0 : i32
    return %arg0, %c0_i32 : i32, i32
  }
}

module attributes {stable_mosaic.version = 11 : i64} {
  func.func @_generator_kernel(%arg0: i32, %arg1: memref<16x128xbf16, #tpu.memory_space<vmem>>, %arg2: memref<128x256xbf16, #tpu.memory_space<vmem>>, %arg3: memref<1x256xf32, #tpu.memory_space<vmem>>, %arg4: memref<256x512xbf16, #tpu.memory_space<vmem>>, %arg5: memref<1x512xf32, #tpu.memory_space<vmem>>, %arg6: memref<512x1024xbf16, #tpu.memory_space<vmem>>, %arg7: memref<1x1024xf32, #tpu.memory_space<vmem>>, %arg8: memref<1024x128xbf16, #tpu.memory_space<vmem>>, %arg9: memref<1x128xf32, #tpu.memory_space<vmem>>, %arg10: memref<16x128xf32, #tpu.memory_space<vmem>>) attributes {dimension_semantics = [#tpu.dimension_semantics<parallel>], iteration_bounds = array<i64: 1>, scalar_prefetch = 0 : i64, scratch_operands = 0 : i64, tpu.core_type = #tpu.core_type<tc>, window_params = [{transform_indices = @transform_0, window_bounds = array<i64: 16, 128>}, {pipeline_mode = #tpu.pipeline_mode<synchronous>, transform_indices = @transform_1, window_bounds = array<i64: 128, 256>}, {pipeline_mode = #tpu.pipeline_mode<synchronous>, transform_indices = @transform_2, window_bounds = array<i64: 1, 256>}, {pipeline_mode = #tpu.pipeline_mode<synchronous>, transform_indices = @transform_3, window_bounds = array<i64: 256, 512>}, {pipeline_mode = #tpu.pipeline_mode<synchronous>, transform_indices = @transform_4, window_bounds = array<i64: 1, 512>}, {pipeline_mode = #tpu.pipeline_mode<synchronous>, transform_indices = @transform_5, window_bounds = array<i64: 512, 1024>}, {pipeline_mode = #tpu.pipeline_mode<synchronous>, transform_indices = @transform_6, window_bounds = array<i64: 1, 1024>}, {pipeline_mode = #tpu.pipeline_mode<synchronous>, transform_indices = @transform_7, window_bounds = array<i64: 1024, 128>}, {pipeline_mode = #tpu.pipeline_mode<synchronous>, transform_indices = @transform_8, window_bounds = array<i64: 1, 128>}, {transform_indices = @transform_9, window_bounds = array<i64: 16, 128>}]} {
    %c0 = arith.constant 0 : index
    %c0_0 = arith.constant 0 : index
    %0 = vector.load %arg1[%c0, %c0_0] : memref<16x128xbf16, #tpu.memory_space<vmem>>, vector<16x128xbf16>
    %c0_1 = arith.constant 0 : index
    %c0_2 = arith.constant 0 : index
    %1 = vector.load %arg2[%c0_1, %c0_2] : memref<128x256xbf16, #tpu.memory_space<vmem>>, vector<128x256xbf16>
    %cst = arith.constant dense<0.000000e+00> : vector<16x256xf32>
    %2 = tpu.matmul %0, %1, %cst {dimension_numbers = #tpu.dot_dimension_numbers<[1], [0], [0], [1], [0, 0, 1, 1], [], []>} : vector<16x128xbf16>, vector<128x256xbf16>, vector<16x256xf32> -> vector<16x256xf32>
    %c0_3 = arith.constant 0 : index
    %c0_4 = arith.constant 0 : index
    %3 = vector.load %arg3[%c0_3, %c0_4] : memref<1x256xf32, #tpu.memory_space<vmem>>, vector<1x256xf32>
    %4 = vector.broadcast %3 : vector<1x256xf32> to vector<16x256xf32>
    %5 = arith.addf %2, %4 : vector<16x256xf32>
    %cst_5 = arith.constant 0.000000e+00 : f32
    %6 = vector.broadcast %cst_5 : f32 to vector<16x256xf32>
    %7 = arith.maximumf %5, %6 : vector<16x256xf32>
    %8 = arith.truncf %7 : vector<16x256xf32> to vector<16x256xbf16>
    %c0_6 = arith.constant 0 : index
    %c0_7 = arith.constant 0 : index
    %9 = vector.load %arg4[%c0_6, %c0_7] : memref<256x512xbf16, #tpu.memory_space<vmem>>, vector<256x512xbf16>
    %cst_8 = arith.constant dense<0.000000e+00> : vector<16x512xf32>
    %10 = tpu.matmul %8, %9, %cst_8 {dimension_numbers = #tpu.dot_dimension_numbers<[1], [0], [0], [1], [0, 0, 1, 1], [], []>} : vector<16x256xbf16>, vector<256x512xbf16>, vector<16x512xf32> -> vector<16x512xf32>
    %c0_9 = arith.constant 0 : index
    %c0_10 = arith.constant 0 : index
    %11 = vector.load %arg5[%c0_9, %c0_10] : memref<1x512xf32, #tpu.memory_space<vmem>>, vector<1x512xf32>
    %12 = vector.broadcast %11 : vector<1x512xf32> to vector<16x512xf32>
    %13 = arith.addf %10, %12 : vector<16x512xf32>
    %cst_11 = arith.constant 0.000000e+00 : f32
    %14 = vector.broadcast %cst_11 : f32 to vector<16x512xf32>
    %15 = arith.maximumf %13, %14 : vector<16x512xf32>
    %16 = arith.truncf %15 : vector<16x512xf32> to vector<16x512xbf16>
    %c0_12 = arith.constant 0 : index
    %c0_13 = arith.constant 0 : index
    %17 = vector.load %arg6[%c0_12, %c0_13] : memref<512x1024xbf16, #tpu.memory_space<vmem>>, vector<512x1024xbf16>
    %cst_14 = arith.constant dense<0.000000e+00> : vector<16x1024xf32>
    %18 = tpu.matmul %16, %17, %cst_14 {dimension_numbers = #tpu.dot_dimension_numbers<[1], [0], [0], [1], [0, 0, 1, 1], [], []>} : vector<16x512xbf16>, vector<512x1024xbf16>, vector<16x1024xf32> -> vector<16x1024xf32>
    %c0_15 = arith.constant 0 : index
    %c0_16 = arith.constant 0 : index
    %19 = vector.load %arg7[%c0_15, %c0_16] : memref<1x1024xf32, #tpu.memory_space<vmem>>, vector<1x1024xf32>
    %20 = vector.broadcast %19 : vector<1x1024xf32> to vector<16x1024xf32>
    %21 = arith.addf %18, %20 : vector<16x1024xf32>
    %cst_17 = arith.constant 0.000000e+00 : f32
    %22 = vector.broadcast %cst_17 : f32 to vector<16x1024xf32>
    %23 = arith.maximumf %21, %22 : vector<16x1024xf32>
    %24 = arith.truncf %23 : vector<16x1024xf32> to vector<16x1024xbf16>
    %c0_18 = arith.constant 0 : index
    %c0_19 = arith.constant 0 : index
    %25 = vector.load %arg8[%c0_18, %c0_19] : memref<1024x128xbf16, #tpu.memory_space<vmem>>, vector<1024x128xbf16>
    %cst_20 = arith.constant dense<0.000000e+00> : vector<16x128xf32>
    %26 = tpu.matmul %24, %25, %cst_20 {dimension_numbers = #tpu.dot_dimension_numbers<[1], [0], [0], [1], [0, 0, 1, 1], [], []>} : vector<16x1024xbf16>, vector<1024x128xbf16>, vector<16x128xf32> -> vector<16x128xf32>
    %c0_21 = arith.constant 0 : index
    %c0_22 = arith.constant 0 : index
    %27 = vector.load %arg9[%c0_21, %c0_22] : memref<1x128xf32, #tpu.memory_space<vmem>>, vector<1x128xf32>
    %28 = vector.broadcast %27 : vector<1x128xf32> to vector<16x128xf32>
    %29 = arith.addf %26, %28 : vector<16x128xf32>
    %30 = math.tanh %29 : vector<16x128xf32>
    %c0_23 = arith.constant 0 : index
    %c0_24 = arith.constant 0 : index
    %31 = vector.load %arg10[%c0_23, %c0_24] : memref<16x128xf32, #tpu.memory_space<vmem>>, vector<16x128xf32>
    tpu.vector_store %arg10[%c0_23, %c0_24], %30 {strides = array<i32>} : memref<16x128xf32, #tpu.memory_space<vmem>>, vector<16x128xf32>,
    return
  }
  func.func @transform_0(%arg0: i32) -> (i32, i32) {
    %c0_i32 = arith.constant 0 : i32
    %c0_i32_0 = arith.constant 0 : i32
    return %arg0, %c0_i32 : i32, i32
  }
  func.func @transform_1(%arg0: i32) -> (i32, i32) {
    %c0_i32 = arith.constant 0 : i32
    %c0_i32_0 = arith.constant 0 : i32
    %c0_i32_1 = arith.constant 0 : i32
    return %c0_i32, %c0_i32_0 : i32, i32
  }
  func.func @transform_2(%arg0: i32) -> (i32, i32) {
    %c0_i32 = arith.constant 0 : i32
    %c0_i32_0 = arith.constant 0 : i32
    %c0_i32_1 = arith.constant 0 : i32
    return %c0_i32, %c0_i32_0 : i32, i32
  }
  func.func @transform_3(%arg0: i32) -> (i32, i32) {
    %c0_i32 = arith.constant 0 : i32
    %c0_i32_0 = arith.constant 0 : i32
    %c0_i32_1 = arith.constant 0 : i32
    return %c0_i32, %c0_i32_0 : i32, i32
  }
  func.func @transform_4(%arg0: i32) -> (i32, i32) {
    %c0_i32 = arith.constant 0 : i32
    %c0_i32_0 = arith.constant 0 : i32
    %c0_i32_1 = arith.constant 0 : i32
    return %c0_i32, %c0_i32_0 : i32, i32
  }
  func.func @transform_5(%arg0: i32) -> (i32, i32) {
    %c0_i32 = arith.constant 0 : i32
    %c0_i32_0 = arith.constant 0 : i32
    %c0_i32_1 = arith.constant 0 : i32
    return %c0_i32, %c0_i32_0 : i32, i32
  }
  func.func @transform_6(%arg0: i32) -> (i32, i32) {
    %c0_i32 = arith.constant 0 : i32
    %c0_i32_0 = arith.constant 0 : i32
    %c0_i32_1 = arith.constant 0 : i32
    return %c0_i32, %c0_i32_0 : i32, i32
  }
  func.func @transform_7(%arg0: i32) -> (i32, i32) {
    %c0_i32 = arith.constant 0 : i32
    %c0_i32_0 = arith.constant 0 : i32
    %c0_i32_1 = arith.constant 0 : i32
    return %c0_i32, %c0_i32_0 : i32, i32
  }
  func.func @transform_8(%arg0: i32) -> (i32, i32) {
    %c0_i32 = arith.constant 0 : i32
    %c0_i32_0 = arith.constant 0 : i32
    %c0_i32_1 = arith.constant 0 : i32
    return %c0_i32, %c0_i32_0 : i32, i32
  }
  func.func @transform_9(%arg0: i32) -> (i32, i32) {
    %c0_i32 = arith.constant 0 : i32
    %c0_i32_0 = arith.constant 0 : i32
    return %arg0, %c0_i32 : i32, i32
  }
}

</mosaic_0001>

<bundles_post_ra>
// kernel: tpu_custom_call.1
= control target key start
LH: loop header
LB: loop body
LE: loop exit
PB: predicated region body
PF: predicated region fallthrough
CT: control target
= control target key end

     0   :  { %14 = vsyncpa [#allocation3], 0  ;;  %s4512_s0 = inlined_call_operand.hbm [shape: bf16[16,128], index: 0, kind: input, shape index: {}]   ;;  %s4513_s1 = inlined_call_operand.hbm [shape: bf16[128,256], index: 1, kind: input, shape index: {}]   ;;  %s4514_s2 = inlined_call_operand.vmem [shape: f32[1,256], index: 2, kind: input, shape index: {}]   ;;  %s4515_s3 = inlined_call_operand.hbm [shape: bf16[256,512], index: 3, kind: input, shape index: {}]   ;;  %s4516_s4 = inlined_call_operand.vmem [shape: f32[1,512], index: 4, kind: input, shape index: {}]   ;;  %s4517_s5 = inlined_call_operand.hbm [shape: bf16[512,1024], index: 5, kind: input, shape index: {}]   ;;  %s4518_s6 = inlined_call_operand.vmem [shape: f32[1,1024], index: 6, kind: input, shape index: {}]   ;;  %s4519_s7 = inlined_call_operand.hbm [shape: bf16[1024,128], index: 7, kind: input, shape index: {}]   ;;  %s4520_s8 = inlined_call_operand.vmem [shape: f32[1,128], index: 8, kind: input, shape index: {}]   ;;  %s4521_s9 = inlined_call_operand.hbm [shape: f32[16,128], index: 9, kind: output, shape index: {}]  }
   0x1   :  { %15 = vsyncpa [#allocation6], 0 }
   0x2   :  { %16 = vsyncpa [#allocation9], 0 }
   0x3   :  { %17 = vsyncpa [#allocation4], 0  ;;  %s4289_s30 = smov [#allocation5]   ;;  %s4149_s13 = scalar_lea.hbm %s4513_s1, 2048 }
   0x4   :  { %s35_s10 = sshll.u32 %s4289_s30, 4  ;;  %p4150_p0 = scmp.ne.s32.totalorder %s4513_s1, %s4149_s13  ;;  %s36_s10 = int_to_ptr.vmem [resolvable:$true] %s35_s10 }
   0x5   :  { %p4153_p1 = scmp.lt.u32.totalorder %s4149_s13, %s4513_s1 }
   0x7   :  { %p4155_p2 = pnand %p4153_p1, %p4150_p0 }
   0x9   :  { %4158 = shalt.err (!%p4155_p2)
}
   0xa   :  { %s4159_s18 = scalar_lea.vmem %s36_s10, 2048  ;;  %p4164_p4 = scmp.lt.s32.totalorder %s36_s10, %s36_s10 }
   0xb   :  { %p4160_p3 = scmp.ne.s32.totalorder %s36_s10, %s4159_s18  ;;  %p4165_p5 = scmp.lt.s32.totalorder %s4159_s18, %s4159_s18 }
   0xd   :  { %p4166_p6 = por %p4165_p5, %p4164_p4 }
   0xf   :  { %p4167_p7 = pnand %p4166_p6, %p4160_p3 }
  0x11   :  { %4170 = shalt.err (!%p4167_p7)
}
  0x12   :  { %s4290_s19 = smov 128   ;;  %s4291_s20 = smov 8  }
  0x13   :  { %41 = dma.hbm_to_vmem [thread:$0]  %s4513_s1, 2048, %s36_s10, [#allocation6], %s4290_s19, %s4290_s19, %s4291_s20  }
  0x14   :  { %s4292_s23 = smov [#allocation8]   ;;  %s4171_s27 = scalar_lea.hbm %s4517_s5, 32768 }
  0x15   :  { %s63_s24 = sshll.u32 %s4292_s23, 4  ;;  %p4172_p8 = scmp.ne.s32.totalorder %s4517_s5, %s4171_s27  ;;  %s64_s24 = int_to_ptr.vmem [resolvable:$true] %s63_s24 }
  0x16   :  { %p4175_p9 = scmp.lt.u32.totalorder %s4171_s27, %s4517_s5 }
  0x18   :  { %p4177_p10 = pnand %p4175_p9, %p4172_p8 }
  0x1a   :  { %4180 = shalt.err (!%p4177_p10)
}
  0x1b   :  { %s4181_s12 = scalar_lea.vmem %s64_s24, 32768  ;;  %p4186_p12 = scmp.lt.s32.totalorder %s64_s24, %s64_s24 }
  0x1c   :  { %p4182_p11 = scmp.ne.s32.totalorder %s64_s24, %s4181_s12  ;;  %p4187_p13 = scmp.lt.s32.totalorder %s4181_s12, %s4181_s12 }
  0x1e   :  { %p4188_p0 = por %p4187_p13, %p4186_p12 }
  0x20   :  { %p4189_p1 = pnand %p4188_p0, %p4182_p11 }
  0x22   :  { %4192 = shalt.err (!%p4189_p1)
}
  0x23   :  { %s4293_s1 = smov 512   ;;  %s4294_s10 = smov 32  }
  0x24   :  { %69 = dma.hbm_to_vmem [thread:$0]  %s4517_s5, 32768, %s64_s24, [#allocation9], %s4293_s1, %s4293_s1, %s4294_s10  }
  0x25   :  { %s4295_s15 = smov [#allocation2]   ;;  %s4193_s21 = scalar_lea.hbm %s4512_s0, 128 }
  0x26   :  { %s23_s16 = sshll.u32 %s4295_s15, 4  ;;  %p4194_p2 = scmp.ne.s32.totalorder %s4512_s0, %s4193_s21  ;;  %s24_s16 = int_to_ptr.vmem [resolvable:$true] %s23_s16 }
  0x27   :  { %p4197_p3 = scmp.lt.u32.totalorder %s4193_s21, %s4512_s0 }
  0x29   :  { %p4199_p4 = pnand %p4197_p3, %p4194_p2 }
  0x2b   :  { %4202 = shalt.err (!%p4199_p4)
}
  0x2c   :  { %s4203_s27 = scalar_lea.vmem %s24_s16, 128  ;;  %p4208_p6 = scmp.lt.s32.totalorder %s24_s16, %s24_s16 }
  0x2d   :  { %p4204_p5 = scmp.ne.s32.totalorder %s24_s16, %s4203_s27  ;;  %p4209_p7 = scmp.lt.s32.totalorder %s4203_s27, %s4203_s27 }
  0x2f   :  { %p4210_p8 = por %p4209_p7, %p4208_p6 }
  0x31   :  { %p4211_p9 = pnand %p4210_p8, %p4204_p5 }
  0x33   :  { %4214 = shalt.err (!%p4211_p9)
}
  0x34   :  { %s4296_s5 = smov 64   ;;  %s4297_s24 = smov 4  }
  0x35   :  { %29 = dma.hbm_to_vmem [thread:$0]  %s4512_s0, 128, %s24_s16, [#allocation3], %s4296_s5, %s4296_s5, %s4297_s24  }
  0x36   :  { %s4298_s30 = smov [#allocation7]   ;;  %s4215_s10 = scalar_lea.hbm %s4515_s3, 8192 }
  0x37   :  { %s49_s11 = sshll.u32 %s4298_s30, 4  ;;  %p4216_p10 = scmp.ne.s32.totalorder %s4515_s3, %s4215_s10  ;;  %s50_s11 = int_to_ptr.vmem [resolvable:$true] %s49_s11 }
  0x38   :  { %p4219_p11 = scmp.lt.u32.totalorder %s4215_s10, %s4515_s3 }
  0x3a   :  { %p4221_p12 = pnand %p4219_p11, %p4216_p10 }
  0x3c   :  { %4224 = shalt.err (!%p4221_p12)
}
  0x3d   :  { %s4225_s18 = scalar_lea.vmem %s50_s11, 8192  ;;  %p4230_p0 = scmp.lt.s32.totalorder %s50_s11, %s50_s11 }
  0x3e   :  { %p4226_p13 = scmp.ne.s32.totalorder %s50_s11, %s4225_s18  ;;  %p4231_p1 = scmp.lt.s32.totalorder %s4225_s18, %s4225_s18 }
  0x40   :  { %p4232_p2 = por %p4231_p1, %p4230_p0 }
  0x42   :  { %p4233_p3 = pnand %p4232_p2, %p4226_p13 }
  0x44   :  { %4236 = shalt.err (!%p4233_p3)
}
  0x45   :  { %s4299_s0 = smov 256   ;;  %s4300_s16 = smov 16  }
  0x46   :  { %55 = dma.hbm_to_vmem [thread:$0]  %s4515_s3, 8192, %s50_s11, [#allocation6], %s4299_s0, %s4299_s0, %s4300_s16  }
  0x47   :  { %s4301_s23 = smov [#allocation10]   ;;  %s4237_s28 = scalar_lea.hbm %s4519_s7, 8192 }
  0x48   :  { %s77_s25 = sshll.u32 %s4301_s23, 4  ;;  %p4238_p4 = scmp.ne.s32.totalorder %s4519_s7, %s4237_s28  ;;  %s78_s25 = int_to_ptr.vmem [resolvable:$true] %s77_s25 }
  0x49   :  { %p4241_p5 = scmp.lt.u32.totalorder %s4237_s28, %s4519_s7 }
  0x4b   :  { %p4243_p6 = pnand %p4241_p5, %p4238_p4 }
  0x4d   :  { %4246 = shalt.err (!%p4243_p6)
}
  0x4e   :  { %s4247_s10 = scalar_lea.vmem %s78_s25, 8192  ;;  %p4252_p8 = scmp.lt.s32.totalorder %s78_s25, %s78_s25 }
  0x4f   :  { %p4248_p7 = scmp.ne.s32.totalorder %s78_s25, %s4247_s10  ;;  %p4253_p9 = scmp.lt.s32.totalorder %s4247_s10, %s4247_s10 }
  0x51   :  { %p4254_p10 = por %p4253_p9, %p4252_p8 }
  0x53   :  { %p4255_p11 = pnand %p4254_p10, %p4248_p7 }
  0x55   :  { %4258 = shalt.err (!%p4255_p11)
}
  0x56   :  { %83 = dma.hbm_to_vmem [thread:$0]  %s4519_s7, 8192, %s78_s25, [#allocation9], %s4296_s5, %s4296_s5, %s4297_s24  }
  0x57   :  { %4281 = dma.done.wait [#allocation3], 128  }
  0x58   :  { %4282 = vsyncadd [#allocation3], 4294967168 }
  0x59   :  { %4283 = dma.done.wait [#allocation6], 10240  }
  0x5a   :  { %4284 = vsyncadd [#allocation6], 4294957056 }
  0x5b   :  { %4285 = dma.done.wait [#allocation9], 40960  }
  0x5c   :  { %4286 = vsyncadd [#allocation9], 4294926336  ;;  %v4302_v0 = vmov 0   ;;  %v3960_v1 = vld [vmem:[#allocation5 + $0x4] ss:$8 sps:$4 sm:$0xff]   ;;  %v3984_v29 = vld [vmem:[#allocation2] sm:$0xff]  }
  0x5d   :  { %250 = vmatprep.mubr.bf16.mxu0 %v4302_v0  ;;  %v3962_v2 = vld [vmem:[#allocation5] ss:$8 sps:$4 sm:$0xff]   ;;  %218 = vmatprep.subr.bf16.mxu0 %v3960_v1  ;;  %v3963_v3 = vld [vmem:[#allocation5 + $0x14] ss:$8 sps:$4 sm:$0xff]   ;;  %v3965_v4 = vld [vmem:[#allocation5 + $0x10] ss:$8 sps:$4 sm:$0xff]  }
  0x5e   :  { %219 = vmatpush1.bf16.msra.mxu0 %v3962_v2  ;;  %v3966_v5 = vld [vmem:[#allocation5 + $0x24] ss:$8 sps:$4 sm:$0xff]   ;;  %v3968_v6 = vld [vmem:[#allocation5 + $0x20] ss:$8 sps:$4 sm:$0xff]   ;;  %v3969_v7 = vld [vmem:[#allocation5 + $0x34] ss:$8 sps:$4 sm:$0xff]  }
  0x5f   :  { %220 = vmatprep.subr.bf16.mxu0 %v3963_v3  ;;  %v3971_v8 = vld [vmem:[#allocation5 + $0x30] ss:$8 sps:$4 sm:$0xff]   ;;  %v3972_v9 = vld [vmem:[#allocation5 + $0x44] ss:$8 sps:$4 sm:$0xff]   ;;  %v3974_v11 = vld [vmem:[#allocation5 + $0x40] ss:$8 sps:$4 sm:$0xff]  }
  0x60   :  { %v3985_v10 = vld [vmem:[#allocation7 + $0x4] ss:$16 sps:$4 sm:$0xff]   ;;  %v3990_v12 = vld [vmem:[#allocation7] ss:$16 sps:$4 sm:$0xff]   ;;  %v3989_v26 = vld [vmem:[#allocation7 + $0xc] ss:$16 sps:$4 sm:$0xff]  }
  0x61   :  { %673 = vmatprep.subr.bf16.mxu1 %v3985_v10  ;;  %v3991_v13 = vld [vmem:[#allocation7 + $0x24] ss:$16 sps:$4 sm:$0xff]   ;;  %v3996_v15 = vld [vmem:[#allocation7 + $0x20] ss:$16 sps:$4 sm:$0xff]   ;;  %v3987_v30 = vld [vmem:[#allocation7 + $0x8] ss:$16 sps:$4 sm:$0xff]  }
  0x62   :  { %221 = vmatpush1.bf16.msra.mxu0 %v3965_v4  ;;  %v3975_v14 = vld [vmem:[#allocation5 + $0x54] ss:$8 sps:$4 sm:$0xff]   ;;  %674 = vmatpush1.bf16.msra.mxu1 %v3990_v12  ;;  %v3977_v17 = vld [vmem:[#allocation5 + $0x50] ss:$8 sps:$4 sm:$0xff]   ;;  %v3978_v18 = vld [vmem:[#allocation5 + $0x64] ss:$8 sps:$4 sm:$0xff]  }
  0x63   :  { %222 = vmatprep.subr.bf16.mxu0 %v3966_v5  ;;  %675 = vmatprep.subr.bf16.mxu1 %v3991_v13  ;;  %v3997_v16 = vld [vmem:[#allocation7 + $0x44] ss:$16 sps:$4 sm:$0xff]   ;;  %v4002_v19 = vld [vmem:[#allocation7 + $0x40] ss:$16 sps:$4 sm:$0xff]   ;;  %v3995_v31 = vld [vmem:[#allocation7 + $0x2c] ss:$16 sps:$4 sm:$0xff]  }
  0x64   :  { %v4003_v20 = vld [vmem:[#allocation7 + $0x64] ss:$16 sps:$4 sm:$0xff]   ;;  %v3980_v21 = vld [vmem:[#allocation5 + $0x60] ss:$8 sps:$4 sm:$0xff]   ;;  %v3983_v25 = vld [vmem:[#allocation5 + $0x70] ss:$8 sps:$4 sm:$0xff]  }
  0x65   :  { %v3981_v22 = vld [vmem:[#allocation5 + $0x74] ss:$8 sps:$4 sm:$0xff]   ;;  %v4008_v23 = vld [vmem:[#allocation7 + $0x60] ss:$16 sps:$4 sm:$0xff]   ;;  %v3993_v34 = vld [vmem:[#allocation7 + $0x28] ss:$16 sps:$4 sm:$0xff]  }
  0x66   :  { %223 = vmatpush1.bf16.msra.mxu0 %v3968_v6  ;;  %676 = vmatpush1.bf16.msra.mxu1 %v3996_v15  ;;  %v4009_v24 = vld [vmem:[#allocation7 + $0x84] ss:$16 sps:$4 sm:$0xff]   ;;  %v4014_v27 = vld [vmem:[#allocation7 + $0x80] ss:$16 sps:$4 sm:$0xff]   ;;  %v4001_v35 = vld [vmem:[#allocation7 + $0x4c] ss:$16 sps:$4 sm:$0xff]  }
  0x67   :  { %224 = vmatprep.subr.bf16.mxu0 %v3969_v7  ;;  %677 = vmatprep.subr.bf16.mxu1 %v3997_v16  ;;  %v4015_v28 = vld [vmem:[#allocation7 + $0xa4] ss:$16 sps:$4 sm:$0xff]   ;;  %v4020_v32 = vld [vmem:[#allocation7 + $0xa0] ss:$16 sps:$4 sm:$0xff]   ;;  %v3999_v38 = vld [vmem:[#allocation7 + $0x48] ss:$16 sps:$4 sm:$0xff]  }
  0x68   :  { %v4021_v33 = vld [vmem:[#allocation7 + $0xc4] ss:$16 sps:$4 sm:$0xff]   ;;  %v4026_v36 = vld [vmem:[#allocation7 + $0xc0] ss:$16 sps:$4 sm:$0xff]   ;;  %v4007_v39 = vld [vmem:[#allocation7 + $0x6c] ss:$16 sps:$4 sm:$0xff]  }
  0x69   :  { %v4027_v37 = vld [vmem:[#allocation7 + $0xe4] ss:$16 sps:$4 sm:$0xff]   ;;  %v4032_v40 = vld [vmem:[#allocation7 + $0xe0] ss:$16 sps:$4 sm:$0xff]   ;;  %v4005_v42 = vld [vmem:[#allocation7 + $0x68] ss:$16 sps:$4 sm:$0xff]  }
  0x6a   :  { %225 = vmatpush1.bf16.msra.mxu0 %v3971_v8  ;;  %678 = vmatpush1.bf16.msra.mxu1 %v4002_v19  ;;  %v4033_v41 = vld [vmem:[#allocation7 + $0x104] ss:$16 sps:$4 sm:$0xff]   ;;  %v4013_v43 = vld [vmem:[#allocation7 + $0x8c] ss:$16 sps:$4 sm:$0xff]   ;;  %v4038_v44 = vld [vmem:[#allocation7 + $0x100] ss:$16 sps:$4 sm:$0xff]  }
  0x6b   :  { %226 = vmatprep.subr.bf16.mxu0 %v3972_v9  ;;  %679 = vmatprep.subr.bf16.mxu1 %v4003_v20  ;;  %v4039_v45 = vld [vmem:[#allocation7 + $0x124] ss:$16 sps:$4 sm:$0xff]   ;;  %v4011_v46 = vld [vmem:[#allocation7 + $0x88] ss:$16 sps:$4 sm:$0xff]   ;;  %v4019_v47 = vld [vmem:[#allocation7 + $0xac] ss:$16 sps:$4 sm:$0xff]  }
  0x6c   :  { %v4044_v48 = vld [vmem:[#allocation7 + $0x120] ss:$16 sps:$4 sm:$0xff]   ;;  %v4045_v49 = vld [vmem:[#allocation7 + $0x144] ss:$16 sps:$4 sm:$0xff]   ;;  %v4017_v50 = vld [vmem:[#allocation7 + $0xa8] ss:$16 sps:$4 sm:$0xff]  }
  0x6d   :  { %v4025_v51 = vld [vmem:[#allocation7 + $0xcc] ss:$16 sps:$4 sm:$0xff]   ;;  %v4050_v52 = vld [vmem:[#allocation7 + $0x140] ss:$16 sps:$4 sm:$0xff]   ;;  %v4051_v53 = vld [vmem:[#allocation7 + $0x164] ss:$16 sps:$4 sm:$0xff]  }
  0x6e   :  { %227 = vmatpush1.bf16.msra.mxu0 %v3974_v11  ;;  %680 = vmatpush1.bf16.msra.mxu1 %v4008_v23  ;;  %v4023_v54 = vld [vmem:[#allocation7 + $0xc8] ss:$16 sps:$4 sm:$0xff]   ;;  %v4031_v55 = vld [vmem:[#allocation7 + $0xec] ss:$16 sps:$4 sm:$0xff]   ;;  %v4056_v56 = vld [vmem:[#allocation7 + $0x160] ss:$16 sps:$4 sm:$0xff]  }
  0x6f   :  { %228 = vmatprep.subr.bf16.mxu0 %v3975_v14  ;;  %681 = vmatprep.subr.bf16.mxu1 %v4009_v24  ;;  %v4057_v57 = vld [vmem:[#allocation7 + $0x184] ss:$16 sps:$4 sm:$0xff]   ;;  %v4029_v58 = vld [vmem:[#allocation7 + $0xe8] ss:$16 sps:$4 sm:$0xff]   ;;  %v4037_v59 = vld [vmem:[#allocation7 + $0x10c] ss:$16 sps:$4 sm:$0xff]  }
  0x70   :  { %v4062_v60 = vld [vmem:[#allocation7 + $0x180] ss:$16 sps:$4 sm:$0xff]   ;;  %v4063_v61 = vld [vmem:[#allocation7 + $0x1a4] ss:$16 sps:$4 sm:$0xff]   ;;  %v4035_v62 = vld [vmem:[#allocation7 + $0x108] ss:$16 sps:$4 sm:$0xff]  }
  0x71   :  { %v4043_v63 = vld [vmem:[#allocation7 + $0x12c] ss:$16 sps:$4 sm:$0xff]   ;;  %v4041_v0 = vld [vmem:[#allocation7 + $0x128] ss:$16 sps:$4 sm:$0xff]   ;;  %v4068_v9 = vld [vmem:[#allocation7 + $0x1a0] ss:$16 sps:$4 sm:$0xff]  }
  0x72   :  { %229 = vmatpush1.bf16.msra.mxu0 %v3977_v17  ;;  %682 = vmatpush1.bf16.msra.mxu1 %v4014_v27  ;;  %v4049_v1 = vld [vmem:[#allocation7 + $0x14c] ss:$16 sps:$4 sm:$0xff]   ;;  %v4047_v2 = vld [vmem:[#allocation7 + $0x148] ss:$16 sps:$4 sm:$0xff]   ;;  %v4069_v10 = vld [vmem:[#allocation7 + $0x1c4] ss:$16 sps:$4 sm:$0xff]  }
  0x73   :  { %230 = vmatprep.subr.bf16.mxu0 %v3978_v18  ;;  %683 = vmatprep.subr.bf16.mxu1 %v4015_v28  ;;  %v4055_v3 = vld [vmem:[#allocation7 + $0x16c] ss:$16 sps:$4 sm:$0xff]   ;;  %v4053_v4 = vld [vmem:[#allocation7 + $0x168] ss:$16 sps:$4 sm:$0xff]   ;;  %v4074_v13 = vld [vmem:[#allocation7 + $0x1c0] ss:$16 sps:$4 sm:$0xff]  }
  0x74   :  { %v4061_v5 = vld [vmem:[#allocation7 + $0x18c] ss:$16 sps:$4 sm:$0xff]   ;;  %v4059_v6 = vld [vmem:[#allocation7 + $0x188] ss:$16 sps:$4 sm:$0xff]   ;;  %v4075_v14 = vld [vmem:[#allocation7 + $0x1e4] ss:$16 sps:$4 sm:$0xff]  }
  0x75   :  { %v4067_v7 = vld [vmem:[#allocation7 + $0x1ac] ss:$16 sps:$4 sm:$0xff]   ;;  %v4065_v8 = vld [vmem:[#allocation7 + $0x1a8] ss:$16 sps:$4 sm:$0xff]   ;;  %v4080_v17 = vld [vmem:[#allocation7 + $0x1e0] ss:$16 sps:$4 sm:$0xff]  }
  0x76   :  { %231 = vmatpush1.bf16.msra.mxu0 %v3980_v21  ;;  %684 = vmatpush1.bf16.msra.mxu1 %v4020_v32  ;;  %v4073_v11 = vld [vmem:[#allocation7 + $0x1cc] ss:$16 sps:$4 sm:$0xff]   ;;  %v4071_v12 = vld [vmem:[#allocation7 + $0x1c8] ss:$16 sps:$4 sm:$0xff]   ;;  %v771_v18 = vld [vmem:[#allocation8] sm:$0xff] }
  0x77   :  { %232 = vmatprep.subr.bf16.mxu0 %v3981_v22  ;;  %685 = vmatprep.subr.bf16.mxu1 %v4021_v33  ;;  %v4079_v15 = vld [vmem:[#allocation7 + $0x1ec] ss:$16 sps:$4 sm:$0xff]   ;;  %v4077_v16 = vld [vmem:[#allocation7 + $0x1e8] ss:$16 sps:$4 sm:$0xff]   ;;  %v775_v19 = vld [vmem:[#allocation8 + $0x20] sm:$0xff] }
  0x78   :  { %v772_v20 = vld [vmem:[#allocation8 + $0x8] sm:$0xff]  ;;  %v3504_v21 = vcombine.low %v771_v18, %v775_v19  ;;  %v3505_v22 = vcombine.high %v771_v18, %v775_v19 }
  0x79   :  { %v776_v23 = vld [vmem:[#allocation8 + $0x28] sm:$0xff] }
  0x7a   :  { %233 = vmatpush1.bf16.msra.mxu0 %v3983_v25  ;;  %686 = vmatpush1.bf16.msra.mxu1 %v4026_v36  ;;  %v3506_v24 = vcombine.low %v772_v20, %v776_v23  ;;  %v3507_v25 = vcombine.high %v772_v20, %v776_v23  ;;  %v820_v23 = vld [vmem:[#allocation8 + $0x188] sm:$0xff] }
  0x7b   :  { %716 = vmatprep.subr.bf16.mxu0 %v3989_v26  ;;  %687 = vmatprep.subr.bf16.mxu1 %v4027_v37  ;;  %v122_v26 = vlaneseq }
  0x7d   :  { %251 = vmatmul.mubr.bf16.vlgmr.msra.gmra.mrb[0].mxu0 %v3984_v29  ;;  %v4423_v27 = vshrl.u32 %v122_v26, 7  ;;  %v120_v29 = vld [vmem:[%s4514_s2] sm:$0x3] }
  0x7e   :  { %717 = vmatpush1.bf16.msra.mxu0 %v3987_v30  ;;  %688 = vmatpush1.bf16.msra.mxu1 %v4032_v40 }
  0x7f   :  { %718 = vmatprep.subr.bf16.mxu0 %v3995_v31  ;;  %689 = vmatprep.subr.bf16.mxu1 %v4033_v41  ;;  %v4426_v28 = vsub.s32 0, %v4423_v27  ;;  %v4432_v30 = vsub.s32 1, %v4423_v27 }
  0x81   :  { %v125_v31 = vrot.slane %v120_v29, %v4426_v28  ;;  %v129_v32 = vrot.slane %v120_v29, %v4432_v30 }
  0x82   :  { %719 = vmatpush1.bf16.msra.mxu0 %v3993_v34  ;;  %690 = vmatpush1.bf16.msra.mxu1 %v4038_v44 }
  0x83   :  { %720 = vmatprep.subr.bf16.mxu0 %v4001_v35  ;;  %691 = vmatprep.subr.bf16.mxu1 %v4039_v45 }
  0x86   :  { %721 = vmatpush1.bf16.msra.mxu0 %v3999_v38  ;;  %692 = vmatpush1.bf16.msra.mxu1 %v4044_v48  ;;  %v784_v48 = vld [vmem:[#allocation8 + $0x68] sm:$0xff] }
  0x87   :  { %722 = vmatprep.subr.bf16.mxu0 %v4007_v39  ;;  %693 = vmatprep.subr.bf16.mxu1 %v4045_v49 }
  0x8a   :  { %723 = vmatpush1.bf16.msra.mxu0 %v4005_v42  ;;  %694 = vmatpush1.bf16.msra.mxu1 %v4050_v52 }
  0x8b   :  { %724 = vmatprep.subr.bf16.mxu0 %v4013_v43  ;;  %695 = vmatprep.subr.bf16.mxu1 %v4051_v53  ;;  %v779_v43 = vld [vmem:[#allocation8 + $0x40] sm:$0xff] }
  0x8c   :  { %v787_v53 = vld [vmem:[#allocation8 + $0x80] sm:$0xff] }
  0x8e   :  { %725 = vmatpush1.bf16.msra.mxu0 %v4011_v46  ;;  %696 = vmatpush1.bf16.msra.mxu1 %v4056_v56  ;;  %v783_v46 = vld [vmem:[#allocation8 + $0x60] sm:$0xff]  ;;  %v792_v56 = vld [vmem:[#allocation8 + $0xa8] sm:$0xff] }
  0x8f   :  { %726 = vmatprep.subr.bf16.mxu0 %v4019_v47  ;;  %697 = vmatprep.subr.bf16.mxu1 %v4057_v57  ;;  %v780_v47 = vld [vmem:[#allocation8 + $0x48] sm:$0xff]  ;;  %v3512_v57 = vcombine.low %v779_v43, %v783_v46 }
  0x90   :  { %v3515_v52 = vcombine.high %v780_v47, %v784_v48 }
  0x92   :  { %727 = vmatpush1.bf16.msra.mxu0 %v4017_v50  ;;  %698 = vmatpush1.bf16.msra.mxu1 %v4062_v60 }
  0x93   :  { %728 = vmatprep.subr.bf16.mxu0 %v4025_v51  ;;  %699 = vmatprep.subr.bf16.mxu1 %v4063_v61  ;;  %v3513_v51 = vcombine.high %v779_v43, %v783_v46  ;;  %v795_v61 = vld [vmem:[#allocation8 + $0xc0] sm:$0xff]  ;;  %v840_v43 = vld [vmem:[#allocation8 + $0x228] sm:$0xff] }
  0x96   :  { %729 = vmatpush1.bf16.msra.mxu0 %v4023_v54  ;;  %700 = vmatpush1.bf16.msra.mxu1 %v4068_v9  ;;  %v791_v54 = vld [vmem:[#allocation8 + $0xa0] sm:$0xff] }
  0x97   :  { %730 = vmatprep.subr.bf16.mxu0 %v4031_v55  ;;  %701 = vmatprep.subr.bf16.mxu1 %v4069_v10  ;;  %v788_v55 = vld [vmem:[#allocation8 + $0x88] sm:$0xff] }
  0x98   :  { %v3523_v60 = vcombine.high %v788_v55, %v792_v56 }
  0x9a   :  { %731 = vmatpush1.bf16.msra.mxu0 %v4029_v58  ;;  %702 = vmatpush1.bf16.msra.mxu1 %v4074_v13  ;;  %v3514_v58 = vcombine.low %v780_v47, %v784_v48  ;;  %v811_v13 = vld [vmem:[#allocation8 + $0x140] sm:$0xff] }
  0x9b   :  { %732 = vmatprep.subr.bf16.mxu0 %v4037_v59  ;;  %703 = vmatprep.subr.bf16.mxu1 %v4075_v14  ;;  %v3521_v59 = vcombine.high %v787_v53, %v791_v54  ;;  %v815_v14 = vld [vmem:[#allocation8 + $0x160] sm:$0xff] }
  0x9c   :  { %v3545_v19 = vcombine.high %v811_v13, %v815_v14  ;;  %v843_v48 = vld [vmem:[#allocation8 + $0x240] sm:$0xff] }
  0x9e   :  { %733 = vmatpush1.bf16.msra.mxu0 %v4035_v62  ;;  %704 = vmatpush1.bf16.msra.mxu1 %v4080_v17  ;;  %v799_v62 = vld [vmem:[#allocation8 + $0xe0] sm:$0xff] }
  0x9f   :  { %734 = vmatprep.subr.bf16.mxu0 %v4043_v63  ;;  %2349 = vmatprep.subr.bf16.mxu1 %v3505_v22  ;;  %v796_v63 = vld [vmem:[#allocation8 + $0xc8] sm:$0xff]  ;;  %v3528_v9 = vcombine.low %v795_v61, %v799_v62  ;;  %v823_v22 = vld [vmem:[#allocation8 + $0x1a0] sm:$0xff] }
  0xa2   :  { %735 = vmatpush1.bf16.msra.mxu0 %v4041_v0  ;;  %v800_v0 = vld [vmem:[#allocation8 + $0xe8] sm:$0xff] }
  0xa3   :  { %736 = vmatprep.subr.bf16.mxu0 %v4049_v1  ;;  %v3520_v1 = vcombine.low %v787_v53, %v791_v54  ;;  %v3530_v10 = vcombine.low %v796_v63, %v800_v0 }
  0xa6   :  { %737 = vmatpush1.bf16.msra.mxu0 %v4047_v2  ;;  %v3522_v2 = vcombine.low %v788_v55, %v792_v56  ;;  %v851_v56 = vld [vmem:[#allocation8 + $0x280] sm:$0xff] }
  0xa7   :  { %738 = vmatprep.subr.bf16.mxu0 %v4055_v3  ;;  %v3529_v3 = vcombine.high %v795_v61, %v799_v62 }
  0xaa   :  { %739 = vmatpush1.bf16.msra.mxu0 %v4053_v4  ;;  %v3531_v4 = vcombine.high %v796_v63, %v800_v0  ;;  %v859_v0 = vld [vmem:[#allocation8 + $0x2c0] sm:$0xff] }
  0xab   :  { %740 = vmatprep.subr.bf16.mxu0 %v4061_v5  ;;  %v803_v5 = vld [vmem:[#allocation8 + $0x100] sm:$0xff] }
  0xae   :  { %741 = vmatpush1.bf16.msra.mxu0 %v4059_v6  ;;  %v807_v6 = vld [vmem:[#allocation8 + $0x120] sm:$0xff] }
  0xaf   :  { %742 = vmatprep.subr.bf16.mxu0 %v4067_v7  ;;  %v804_v7 = vld [vmem:[#allocation8 + $0x108] sm:$0xff]  ;;  %v3536_v17 = vcombine.low %v803_v5, %v807_v6 }
  0xb2   :  { %743 = vmatpush1.bf16.msra.mxu0 %v4065_v8  ;;  %v808_v8 = vld [vmem:[#allocation8 + $0x128] sm:$0xff] }
  0xb3   :  { %744 = vmatprep.subr.bf16.mxu0 %v4073_v11  ;;  %v3537_v11 = vcombine.high %v803_v5, %v807_v6  ;;  %v3538_v18 = vcombine.low %v804_v7, %v808_v8 }
  0xb6   :  { %745 = vmatpush1.bf16.msra.mxu0 %v4071_v12  ;;  %v3539_v12 = vcombine.high %v804_v7, %v808_v8  ;;  %v867_v8 = vld [vmem:[#allocation8 + $0x300] sm:$0xff] }
  0xb7   :  { %746 = vmatprep.subr.bf16.mxu0 %v4079_v15  ;;  %v812_v15 = vld [vmem:[#allocation8 + $0x148] sm:$0xff] }
  0xba   :  { %747 = vmatpush1.bf16.msra.mxu0 %v4077_v16  ;;  %v816_v16 = vld [vmem:[#allocation8 + $0x168] sm:$0xff] }
  0xbb   :  { %2435 = vmatprep.subr.bf16.mxu0 %v3507_v25  ;;  %v3547_v20 = vcombine.high %v812_v15, %v816_v16  ;;  %v3544_v25 = vcombine.low %v811_v13, %v815_v14  ;;  %v3546_v26 = vcombine.low %v812_v15, %v816_v16  ;;  %v875_v16 = vld [vmem:[#allocation8 + $0x340] sm:$0xff] }
 0x150   :  { %v252_v33 = vpop.f32.mrb[0].mxu0 }
 0x151   :  { %v253_v34 = vadd.f32 %v252_v33, %v125_v31  ;;  %v254_v35 = vpop.f32.mrb[1].mxu0  ;;  %v831_v33 = vld [vmem:[#allocation8 + $0x1e0] sm:$0xff] }
 0x152   :  { %v255_v36 = vadd.f32 %v254_v35, %v129_v32  ;;  %v256_v37 = vpop.f32.mrb[2].mxu0  ;;  %v832_v35 = vld [vmem:[#allocation8 + $0x1e8] sm:$0xff] }
 0x153   :  { %v257_v38 = vadd.f32 %v256_v37, %v125_v31  ;;  %v258_v39 = vpop.f32.mrb[3].mxu0  ;;  %v261_v41 = vmax.f32 %v253_v34, 0.0  ;;  %v828_v34 = vld [vmem:[#allocation8 + $0x1c8] sm:$0xff] }
 0x154   :  { %v259_v40 = vadd.f32 %v258_v39, %v129_v32  ;;  %v262_v44 = vmax.f32 %v255_v36, 0.0  ;;  %v827_v32 = vld [vmem:[#allocation8 + $0x1c0] sm:$0xff]  ;;  %v3563_v39 = vcombine.high %v828_v34, %v832_v35 }
 0x155   :  { %v263_v42 = vmax.f32 %v257_v38, 0.0  ;;  %v3561_v38 = vcombine.high %v827_v32, %v831_v33 }
 0x156   :  { %v264_v45 = vmax.f32 %v259_v40, 0.0  ;;  %v835_v40 = vld [vmem:[#allocation8 + $0x200] sm:$0xff] }
 0x157   :  { %v265_v49 = vpack.c.bf16 %v263_v42, %v261_v41  ;;  %v839_v41 = vld [vmem:[#allocation8 + $0x220] sm:$0xff]  ;;  %v836_v42 = vld [vmem:[#allocation8 + $0x208] sm:$0xff] }
 0x158   :  { %v266_v50 = vpack.c.bf16 %v264_v45, %v262_v44  ;;  %v3560_v44 = vcombine.low %v827_v32, %v831_v33  ;;  %v3562_v45 = vcombine.low %v828_v34, %v832_v35  ;;  %v3569_v46 = vcombine.high %v835_v40, %v839_v41  ;;  %v888_v33 = vld [vmem:[#allocation8 + $0x3a8] sm:$0xff] }
 0x159   :  { %v3571_v47 = vcombine.high %v836_v42, %v840_v43  ;;  %v3570_v53 = vcombine.low %v836_v42, %v840_v43 }
 0x15a   :  { %705 = vmatprep.mubr.bf16.mxu1 %v266_v50  ;;  %748 = vmatprep.mubr.bf16.mxu0 %v266_v50  ;;  %v844_v50 = vld [vmem:[#allocation8 + $0x248] sm:$0xff] }
 0x15b   :  { %706 = vmatmul.mubr.bf16.vlgmr.msra.gmra.mrb[0].mxu1 %v265_v49  ;;  %749 = vmatmul.mubr.bf16.vlgmr.msra.gmra.mrb[4].mxu0 %v265_v49  ;;  %v847_v49 = vld [vmem:[#allocation8 + $0x260] sm:$0xff] }
 0x15c   :  { %2350 = vmatpush1.bf16.msra.mxu1 %v3504_v21  ;;  %2436 = vmatpush1.bf16.msra.mxu0 %v3506_v24  ;;  %v819_v21 = vld [vmem:[#allocation8 + $0x180] sm:$0xff]  ;;  %v824_v24 = vld [vmem:[#allocation8 + $0x1a8] sm:$0xff]  ;;  %v3577_v54 = vcombine.high %v843_v48, %v847_v49 }
 0x15d   :  { %2351 = vmatprep.subr.bf16.mxu1 %v3513_v51  ;;  %2437 = vmatprep.subr.bf16.mxu0 %v3515_v52  ;;  %v3553_v29 = vcombine.high %v819_v21, %v823_v22  ;;  %v3555_v31 = vcombine.high %v820_v23, %v824_v24  ;;  %v3552_v36 = vcombine.low %v819_v21, %v823_v22  ;;  %v848_v51 = vld [vmem:[#allocation8 + $0x268] sm:$0xff] }
 0x15e   :  { %v3554_v37 = vcombine.low %v820_v23, %v824_v24  ;;  %v3568_v52 = vcombine.low %v835_v40, %v839_v41  ;;  %v3579_v55 = vcombine.high %v844_v50, %v848_v51  ;;  %v3578_v61 = vcombine.low %v844_v50, %v848_v51  ;;  %v896_v41 = vld [vmem:[#allocation8 + $0x3e8] sm:$0xff] }
 0x160   :  { %2352 = vmatpush1.bf16.msra.mxu1 %v3512_v57  ;;  %2438 = vmatpush1.bf16.msra.mxu0 %v3514_v58  ;;  %v855_v57 = vld [vmem:[#allocation8 + $0x2a0] sm:$0xff]  ;;  %v852_v58 = vld [vmem:[#allocation8 + $0x288] sm:$0xff] }
 0x161   :  { %2353 = vmatprep.subr.bf16.mxu1 %v3521_v59  ;;  %2439 = vmatprep.subr.bf16.mxu0 %v3523_v60  ;;  %v856_v59 = vld [vmem:[#allocation8 + $0x2a8] sm:$0xff]  ;;  %v3576_v60 = vcombine.low %v843_v48, %v847_v49  ;;  %v3585_v62 = vcombine.high %v851_v56, %v855_v57 }
 0x162   :  { %v3587_v63 = vcombine.high %v852_v58, %v856_v59  ;;  %v3586_v5 = vcombine.low %v852_v58, %v856_v59  ;;  %v904_v49 = vld [vmem:[#allocation8 + $0x428] sm:$0xff] }
 0x164   :  { %2354 = vmatpush1.bf16.msra.mxu1 %v3520_v1  ;;  %2440 = vmatpush1.bf16.msra.mxu0 %v3522_v2  ;;  %v863_v1 = vld [vmem:[#allocation8 + $0x2e0] sm:$0xff]  ;;  %v860_v2 = vld [vmem:[#allocation8 + $0x2c8] sm:$0xff] }
 0x165   :  { %2355 = vmatprep.subr.bf16.mxu1 %v3529_v3  ;;  %2441 = vmatprep.subr.bf16.mxu0 %v3531_v4  ;;  %v864_v3 = vld [vmem:[#allocation8 + $0x2e8] sm:$0xff]  ;;  %v3584_v4 = vcombine.low %v851_v56, %v855_v57  ;;  %v3593_v6 = vcombine.high %v859_v0, %v863_v1 }
 0x166   :  { %v3595_v7 = vcombine.high %v860_v2, %v864_v3  ;;  %v3594_v13 = vcombine.low %v860_v2, %v864_v3 }
 0x168   :  { %2356 = vmatpush1.bf16.msra.mxu1 %v3528_v9  ;;  %2442 = vmatpush1.bf16.msra.mxu0 %v3530_v10  ;;  %v871_v9 = vld [vmem:[#allocation8 + $0x320] sm:$0xff]  ;;  %v868_v10 = vld [vmem:[#allocation8 + $0x308] sm:$0xff] }
 0x169   :  { %2357 = vmatprep.subr.bf16.mxu1 %v3537_v11  ;;  %2443 = vmatprep.subr.bf16.mxu0 %v3539_v12  ;;  %v872_v11 = vld [vmem:[#allocation8 + $0x328] sm:$0xff]  ;;  %v3592_v12 = vcombine.low %v859_v0, %v863_v1  ;;  %v3601_v14 = vcombine.high %v867_v8, %v871_v9 }
 0x16a   :  { %v3603_v15 = vcombine.high %v868_v10, %v872_v11  ;;  %v3602_v21 = vcombine.low %v868_v10, %v872_v11 }
 0x16c   :  { %2358 = vmatpush1.bf16.msra.mxu1 %v3536_v17  ;;  %2444 = vmatpush1.bf16.msra.mxu0 %v3538_v18  ;;  %v879_v17 = vld [vmem:[#allocation8 + $0x360] sm:$0xff]  ;;  %v876_v18 = vld [vmem:[#allocation8 + $0x348] sm:$0xff] }
 0x16d   :  { %2359 = vmatprep.subr.bf16.mxu1 %v3545_v19  ;;  %2445 = vmatprep.subr.bf16.mxu0 %v3547_v20  ;;  %v880_v19 = vld [vmem:[#allocation8 + $0x368] sm:$0xff]  ;;  %v3600_v20 = vcombine.low %v867_v8, %v871_v9  ;;  %v3609_v22 = vcombine.high %v875_v16, %v879_v17  ;;  %v3608_v24 = vcombine.low %v875_v16, %v879_v17 }
 0x16e   :  { %v3611_v23 = vcombine.high %v876_v18, %v880_v19 }
 0x170   :  { %2360 = vmatpush1.bf16.msra.mxu1 %v3544_v25  ;;  %2446 = vmatpush1.bf16.msra.mxu0 %v3546_v26  ;;  %v3610_v25 = vcombine.low %v876_v18, %v880_v19  ;;  %v883_v26 = vld [vmem:[#allocation8 + $0x380] sm:$0xff] }
 0x171   :  { %2361 = vmatprep.subr.bf16.mxu1 %v3553_v29  ;;  %2447 = vmatprep.subr.bf16.mxu0 %v3555_v31  ;;  %v887_v29 = vld [vmem:[#allocation8 + $0x3a0] sm:$0xff]  ;;  %v884_v31 = vld [vmem:[#allocation8 + $0x388] sm:$0xff] }
 0x172   :  { %v3617_v32 = vcombine.high %v883_v26, %v887_v29  ;;  %v3616_v34 = vcombine.low %v883_v26, %v887_v29  ;;  %v3618_v35 = vcombine.low %v884_v31, %v888_v33 }
 0x174   :  { %2362 = vmatpush1.bf16.msra.mxu1 %v3552_v36  ;;  %2448 = vmatpush1.bf16.msra.mxu0 %v3554_v37  ;;  %v3619_v36 = vcombine.high %v884_v31, %v888_v33  ;;  %v891_v37 = vld [vmem:[#allocation8 + $0x3c0] sm:$0xff] }
 0x175   :  { %2363 = vmatprep.subr.bf16.mxu1 %v3561_v38  ;;  %2449 = vmatprep.subr.bf16.mxu0 %v3563_v39  ;;  %v895_v38 = vld [vmem:[#allocation8 + $0x3e0] sm:$0xff]  ;;  %v892_v39 = vld [vmem:[#allocation8 + $0x3c8] sm:$0xff] }
 0x176   :  { %v3625_v40 = vcombine.high %v891_v37, %v895_v38  ;;  %v3624_v42 = vcombine.low %v891_v37, %v895_v38  ;;  %v3626_v43 = vcombine.low %v892_v39, %v896_v41  ;;  %v915_v31 = vld [vmem:[#allocation8 + $0x480] sm:$0xff] }
 0x178   :  { %2364 = vmatpush1.bf16.msra.mxu1 %v3560_v44  ;;  %2450 = vmatpush1.bf16.msra.mxu0 %v3562_v45  ;;  %v3627_v44 = vcombine.high %v892_v39, %v896_v41  ;;  %v899_v45 = vld [vmem:[#allocation8 + $0x400] sm:$0xff] }
 0x179   :  { %2365 = vmatprep.subr.bf16.mxu1 %v3569_v46  ;;  %2451 = vmatprep.subr.bf16.mxu0 %v3571_v47  ;;  %v903_v46 = vld [vmem:[#allocation8 + $0x420] sm:$0xff]  ;;  %v900_v47 = vld [vmem:[#allocation8 + $0x408] sm:$0xff] }
 0x17a   :  { %v3633_v48 = vcombine.high %v899_v45, %v903_v46  ;;  %v3632_v50 = vcombine.low %v899_v45, %v903_v46  ;;  %v3634_v51 = vcombine.low %v900_v47, %v904_v49  ;;  %v923_v41 = vld [vmem:[#allocation8 + $0x4c0] sm:$0xff] }
 0x17c   :  { %2366 = vmatpush1.bf16.msra.mxu1 %v3568_v52  ;;  %2452 = vmatpush1.bf16.msra.mxu0 %v3570_v53  ;;  %v3635_v52 = vcombine.high %v900_v47, %v904_v49  ;;  %v343_v53 = vsub.s32 2, %v4423_v27  ;;  %v931_v49 = vld [vmem:[#allocation8 + $0x500] sm:$0xff] }
 0x17d   :  { %2367 = vmatprep.subr.bf16.mxu1 %v3577_v54  ;;  %2453 = vmatprep.subr.bf16.mxu0 %v3579_v55  ;;  %v331_v54 = vld [vmem:[%s4516_s4] sm:$0xf]  ;;  %v347_v55 = vsub.s32 3, %v4423_v27 }
 0x17e   :  { %v336_v56 = vrot.slane %v331_v54, %v4426_v28  ;;  %v344_v57 = vrot.slane %v331_v54, %v343_v53  ;;  %v340_v58 = vrot.slane %v331_v54, %v4432_v30 }
 0x17f   :  { %v348_v59 = vrot.slane %v331_v54, %v347_v55 }
 0x180   :  { %2368 = vmatpush1.bf16.msra.mxu1 %v3576_v60  ;;  %2454 = vmatpush1.bf16.msra.mxu0 %v3578_v61 }
 0x181   :  { %2369 = vmatprep.subr.bf16.mxu1 %v3585_v62  ;;  %2455 = vmatprep.subr.bf16.mxu0 %v3587_v63 }
 0x184   :  { %2370 = vmatpush1.bf16.msra.mxu1 %v3584_v4  ;;  %2456 = vmatpush1.bf16.msra.mxu0 %v3586_v5 }
 0x185   :  { %2371 = vmatprep.subr.bf16.mxu1 %v3593_v6  ;;  %2457 = vmatprep.subr.bf16.mxu0 %v3595_v7 }
 0x188   :  { %2372 = vmatpush1.bf16.msra.mxu1 %v3592_v12  ;;  %2458 = vmatpush1.bf16.msra.mxu0 %v3594_v13 }
 0x189   :  { %2373 = vmatprep.subr.bf16.mxu1 %v3601_v14  ;;  %2459 = vmatprep.subr.bf16.mxu0 %v3603_v15 }
 0x18c   :  { %2374 = vmatpush1.bf16.msra.mxu1 %v3600_v20  ;;  %2460 = vmatpush1.bf16.msra.mxu0 %v3602_v21  ;;  %v907_v20 = vld [vmem:[#allocation8 + $0x440] sm:$0xff] }
 0x18d   :  { %2375 = vmatprep.subr.bf16.mxu1 %v3609_v22  ;;  %2461 = vmatprep.subr.bf16.mxu0 %v3611_v23  ;;  %v911_v23 = vld [vmem:[#allocation8 + $0x460] sm:$0xff] }
 0x18e   :  { %v3640_v37 = vcombine.low %v907_v20, %v911_v23 }
 0x190   :  { %2376 = vmatpush1.bf16.msra.mxu1 %v3608_v24  ;;  %2462 = vmatpush1.bf16.msra.mxu0 %v3610_v25  ;;  %v908_v24 = vld [vmem:[#allocation8 + $0x448] sm:$0xff] }
 0x191   :  { %2377 = vmatprep.subr.bf16.mxu1 %v3617_v32  ;;  %2463 = vmatprep.subr.bf16.mxu0 %v3619_v36  ;;  %v912_v25 = vld [vmem:[#allocation8 + $0x468] sm:$0xff]  ;;  %v3641_v32 = vcombine.high %v907_v20, %v911_v23  ;;  %v967_v20 = vld [vmem:[#allocation8 + $0x620] sm:$0xff] }
 0x192   :  { %v3643_v33 = vcombine.high %v908_v24, %v912_v25  ;;  %v920_v36 = vld [vmem:[#allocation8 + $0x4a8] sm:$0xff]  ;;  %v3642_v38 = vcombine.low %v908_v24, %v912_v25 }
 0x193   :  { %v964_v23 = vld [vmem:[#allocation8 + $0x608] sm:$0xff] }
 0x194   :  { %2378 = vmatpush1.bf16.msra.mxu1 %v3616_v34  ;;  %2464 = vmatpush1.bf16.msra.mxu0 %v3618_v35  ;;  %v919_v34 = vld [vmem:[#allocation8 + $0x4a0] sm:$0xff]  ;;  %v916_v35 = vld [vmem:[#allocation8 + $0x488] sm:$0xff] }
 0x195   :  { %2379 = vmatprep.subr.bf16.mxu1 %v3625_v40  ;;  %2465 = vmatprep.subr.bf16.mxu0 %v3627_v44  ;;  %v3649_v39 = vcombine.high %v915_v31, %v919_v34  ;;  %v3651_v40 = vcombine.high %v916_v35, %v920_v36  ;;  %v928_v44 = vld [vmem:[#allocation8 + $0x4e8] sm:$0xff]  ;;  %v3648_v45 = vcombine.low %v915_v31, %v919_v34  ;;  %v971_v34 = vld [vmem:[#allocation8 + $0x640] sm:$0xff] }
 0x196   :  { %v3650_v46 = vcombine.low %v916_v35, %v920_v36  ;;  %v968_v24 = vld [vmem:[#allocation8 + $0x628] sm:$0xff]  ;;  %v975_v35 = vld [vmem:[#allocation8 + $0x660] sm:$0xff] }
 0x197   :  { %v972_v36 = vld [vmem:[#allocation8 + $0x648] sm:$0xff] }
 0x198   :  { %2380 = vmatpush1.bf16.msra.mxu1 %v3624_v42  ;;  %2466 = vmatpush1.bf16.msra.mxu0 %v3626_v43  ;;  %v927_v42 = vld [vmem:[#allocation8 + $0x4e0] sm:$0xff]  ;;  %v924_v43 = vld [vmem:[#allocation8 + $0x4c8] sm:$0xff] }
 0x199   :  { %2392 = vmatprep.subr.bf16.mxu1 %v3633_v48  ;;  %2478 = vmatprep.subr.bf16.mxu0 %v3635_v52  ;;  %v3657_v47 = vcombine.high %v923_v41, %v927_v42  ;;  %v3659_v48 = vcombine.high %v924_v43, %v928_v44  ;;  %v936_v52 = vld [vmem:[#allocation8 + $0x528] sm:$0xff]  ;;  %v3656_v54 = vcombine.low %v923_v41, %v927_v42  ;;  %v979_v42 = vld [vmem:[#allocation8 + $0x680] sm:$0xff] }
 0x22e   :  { %v707_v60 = vpop.f32.mrb[0].mxu1  ;;  %v750_v61 = vpop.f32.mrb[4].mxu0 }
 0x22f   :  { %v708_v62 = vadd.f32 %v707_v60, %v336_v56  ;;  %v751_v63 = vadd.f32 %v750_v61, %v344_v57  ;;  %v709_v0 = vpop.f32.mrb[1].mxu1  ;;  %v752_v1 = vpop.f32.mrb[5].mxu0  ;;  %v943_v60 = vld [vmem:[#allocation8 + $0x560] sm:$0xff]  ;;  %v940_v61 = vld [vmem:[#allocation8 + $0x548] sm:$0xff] }
 0x230   :  { %v710_v2 = vadd.f32 %v709_v0, %v340_v58  ;;  %v753_v3 = vadd.f32 %v752_v1, %v348_v59  ;;  %v711_v4 = vpop.f32.mrb[2].mxu1  ;;  %v754_v5 = vpop.f32.mrb[6].mxu0 }
 0x231   :  { %v712_v6 = vadd.f32 %v711_v4, %v336_v56  ;;  %v755_v7 = vadd.f32 %v754_v5, %v344_v57  ;;  %v713_v8 = vpop.f32.mrb[3].mxu1  ;;  %v756_v9 = vpop.f32.mrb[7].mxu0  ;;  %v759_v12 = vmax.f32 %v708_v62, 0.0  ;;  %v761_v13 = vmax.f32 %v751_v63, 0.0  ;;  %v944_v62 = vld [vmem:[#allocation8 + $0x568] sm:$0xff]  ;;  %v951_v4 = vld [vmem:[#allocation8 + $0x5a0] sm:$0xff] }
 0x232   :  { %v714_v10 = vadd.f32 %v713_v8, %v340_v58  ;;  %v757_v11 = vadd.f32 %v756_v9, %v348_v59  ;;  %v760_v16 = vmax.f32 %v710_v2, 0.0  ;;  %v762_v17 = vmax.f32 %v753_v3, 0.0  ;;  %v939_v59 = vld [vmem:[#allocation8 + $0x540] sm:$0xff]  ;;  %v948_v5 = vld [vmem:[#allocation8 + $0x588] sm:$0xff] }
 0x233   :  { %v763_v14 = vmax.f32 %v712_v6, 0.0  ;;  %v765_v15 = vmax.f32 %v755_v7, 0.0  ;;  %v3658_v56 = vcombine.low %v924_v43, %v928_v44  ;;  %v3673_v1 = vcombine.high %v939_v59, %v943_v60  ;;  %v947_v3 = vld [vmem:[#allocation8 + $0x580] sm:$0xff]  ;;  %v952_v6 = vld [vmem:[#allocation8 + $0x5a8] sm:$0xff] }
 0x234   :  { %v764_v18 = vmax.f32 %v714_v10, 0.0  ;;  %v766_v19 = vmax.f32 %v757_v11, 0.0  ;;  %v3675_v2 = vcombine.high %v940_v61, %v944_v62  ;;  %v3672_v7 = vcombine.low %v939_v59, %v943_v60  ;;  %v955_v11 = vld [vmem:[#allocation8 + $0x5c0] sm:$0xff]  ;;  %v980_v44 = vld [vmem:[#allocation8 + $0x688] sm:$0xff] }
 0x235   :  { %v4447_v21 = vpack.c.bf16 %v763_v14, %v759_v12  ;;  %v4449_v22 = vpack.c.bf16 %v765_v15, %v761_v13  ;;  %v3674_v8 = vcombine.low %v940_v61, %v944_v62  ;;  %v3681_v9 = vcombine.high %v947_v3, %v951_v4  ;;  %v959_v12 = vld [vmem:[#allocation8 + $0x5e0] sm:$0xff]  ;;  %v956_v13 = vld [vmem:[#allocation8 + $0x5c8] sm:$0xff] }
 0x236   :  { %v4451_v26 = vpack.c.bf16 %v764_v18, %v760_v16  ;;  %v4453_v29 = vpack.c.bf16 %v766_v19, %v762_v17  ;;  %v3683_v10 = vcombine.high %v948_v5, %v952_v6  ;;  %v960_v14 = vld [vmem:[#allocation8 + $0x5e8] sm:$0xff]  ;;  %v3680_v15 = vcombine.low %v947_v3, %v951_v4  ;;  %v963_v19 = vld [vmem:[#allocation8 + $0x600] sm:$0xff] }
 0x237   :  { %v3682_v16 = vcombine.low %v948_v5, %v952_v6  ;;  %v3689_v17 = vcombine.high %v955_v11, %v959_v12  ;;  %v3691_v18 = vcombine.high %v956_v13, %v960_v14  ;;  %v3688_v25 = vcombine.low %v955_v11, %v959_v12  ;;  %v983_v43 = vld [vmem:[#allocation8 + $0x6a0] sm:$0xff]  ;;  %v996_v62 = vld [vmem:[#allocation8 + $0x708] sm:$0xff] }
 0x238   :  { %2381 = vmatprep.mubr.bf16.mxu1 %v4451_v26  ;;  %2467 = vmatprep.mubr.bf16.mxu0 %v4451_v26  ;;  %v3690_v31 = vcombine.low %v956_v13, %v960_v14  ;;  %v995_v60 = vld [vmem:[#allocation8 + $0x700] sm:$0xff]  ;;  %v1004_v6 = vld [vmem:[#allocation8 + $0x748] sm:$0xff] }
 0x239   :  { %2382 = vmatmul.mubr.bf16.vlgmr.msra.gmra.mrb[4].mxu1 %v4447_v21  ;;  %2468 = vmatmul.mubr.bf16.vlgmr.msra.gmra.mrb[8].mxu0 %v4447_v21  ;;  %v999_v61 = vld [vmem:[#allocation8 + $0x720] sm:$0xff]  ;;  %v1012_v14 = vld [vmem:[#allocation8 + $0x788] sm:$0xff] }
 0x23a   :  { %2393 = vmatpush1.bf16.msra.mxu1 %v3632_v50  ;;  %2479 = vmatpush1.bf16.msra.mxu0 %v3634_v51  ;;  %v935_v50 = vld [vmem:[#allocation8 + $0x520] sm:$0xff]  ;;  %v932_v51 = vld [vmem:[#allocation8 + $0x508] sm:$0xff] }
 0x23b   :  { %2424 = vmatprep.mubr.bf16.mxu1 %v4453_v29  ;;  %2510 = vmatprep.mubr.bf16.mxu0 %v4453_v29  ;;  %v3665_v57 = vcombine.high %v931_v49, %v935_v50  ;;  %v3667_v58 = vcombine.high %v932_v51, %v936_v52  ;;  %v3664_v63 = vcombine.low %v931_v49, %v935_v50  ;;  %v987_v50 = vld [vmem:[#allocation8 + $0x6c0] sm:$0xff] }
 0x23c   :  { %2394 = vmatprep.subr.bf16.mxu1 %v3641_v32  ;;  %2480 = vmatprep.subr.bf16.mxu0 %v3643_v33  ;;  %v3666_v0 = vcombine.low %v932_v51, %v936_v52  ;;  %v3697_v32 = vcombine.high %v963_v19, %v967_v20  ;;  %v3699_v33 = vcombine.high %v964_v23, %v968_v24  ;;  %v991_v51 = vld [vmem:[#allocation8 + $0x6e0] sm:$0xff]  ;;  %v988_v52 = vld [vmem:[#allocation8 + $0x6c8] sm:$0xff] }
 0x23d   :  { %v1003_v4 = vld [vmem:[#allocation8 + $0x740] sm:$0xff] }
 0x23e   :  { %2395 = vmatpush1.bf16.msra.mxu1 %v3640_v37  ;;  %2481 = vmatpush1.bf16.msra.mxu0 %v3642_v38  ;;  %v976_v37 = vld [vmem:[#allocation8 + $0x668] sm:$0xff]  ;;  %v3696_v38 = vcombine.low %v963_v19, %v967_v20  ;;  %v1007_v5 = vld [vmem:[#allocation8 + $0x760] sm:$0xff] }
 0x23f   :  { %2396 = vmatprep.subr.bf16.mxu1 %v3649_v39  ;;  %2482 = vmatprep.subr.bf16.mxu0 %v3651_v40  ;;  %v3698_v39 = vcombine.low %v964_v23, %v968_v24  ;;  %v3705_v40 = vcombine.high %v971_v34, %v975_v35  ;;  %v3707_v41 = vcombine.high %v972_v36, %v976_v37  ;;  %v1011_v12 = vld [vmem:[#allocation8 + $0x780] sm:$0xff]  ;;  %v1020_v24 = vld [vmem:[#allocation8 + $0x7c8] sm:$0xff] }
 0x240   :  { %v1015_v13 = vld [vmem:[#allocation8 + $0x7a0] sm:$0xff] }
 0x241   :  { %v1019_v20 = vld [vmem:[#allocation8 + $0x7c0] sm:$0xff] }
 0x242   :  { %2397 = vmatpush1.bf16.msra.mxu1 %v3648_v45  ;;  %2483 = vmatpush1.bf16.msra.mxu0 %v3650_v46  ;;  %v984_v45 = vld [vmem:[#allocation8 + $0x6a8] sm:$0xff]  ;;  %v3704_v46 = vcombine.low %v971_v34, %v975_v35  ;;  %v1023_v23 = vld [vmem:[#allocation8 + $0x7e0] sm:$0xff]  ;;  %v773_v35 = vld [vmem:[#allocation8 + $0x10] sm:$0xff] }
 0x243   :  { %2398 = vmatprep.subr.bf16.mxu1 %v3657_v47  ;;  %2484 = vmatprep.subr.bf16.mxu0 %v3659_v48  ;;  %v3706_v47 = vcombine.low %v972_v36, %v976_v37  ;;  %v3713_v48 = vcombine.high %v979_v42, %v983_v43  ;;  %v3715_v49 = vcombine.high %v980_v44, %v984_v45  ;;  %v777_v36 = vld [vmem:[#allocation8 + $0x30] sm:$0xff]  ;;  %v774_v37 = vld [vmem:[#allocation8 + $0x18] sm:$0xff] }
 0x246   :  { %2399 = vmatpush1.bf16.msra.mxu1 %v3656_v54  ;;  %2485 = vmatpush1.bf16.msra.mxu0 %v3658_v56  ;;  %v992_v54 = vld [vmem:[#allocation8 + $0x6e8] sm:$0xff]  ;;  %v3712_v56 = vcombine.low %v979_v42, %v983_v43  ;;  %v781_v43 = vld [vmem:[#allocation8 + $0x50] sm:$0xff] }
 0x247   :  { %2400 = vmatprep.subr.bf16.mxu1 %v3665_v57  ;;  %2486 = vmatprep.subr.bf16.mxu0 %v3667_v58  ;;  %v3714_v57 = vcombine.low %v980_v44, %v984_v45  ;;  %v3721_v58 = vcombine.high %v987_v50, %v991_v51  ;;  %v3723_v59 = vcombine.high %v988_v52, %v992_v54  ;;  %v785_v44 = vld [vmem:[#allocation8 + $0x70] sm:$0xff]  ;;  %v782_v45 = vld [vmem:[#allocation8 + $0x58] sm:$0xff] }
 0x24a   :  { %2401 = vmatpush1.bf16.msra.mxu1 %v3664_v63  ;;  %2487 = vmatpush1.bf16.msra.mxu0 %v3666_v0  ;;  %v1000_v63 = vld [vmem:[#allocation8 + $0x728] sm:$0xff]  ;;  %v3720_v0 = vcombine.low %v987_v50, %v991_v51  ;;  %v789_v51 = vld [vmem:[#allocation8 + $0x90] sm:$0xff] }
 0x24b   :  { %2402 = vmatprep.subr.bf16.mxu1 %v3673_v1  ;;  %2488 = vmatprep.subr.bf16.mxu0 %v3675_v2  ;;  %v3722_v1 = vcombine.low %v988_v52, %v992_v54  ;;  %v3729_v2 = vcombine.high %v995_v60, %v999_v61  ;;  %v3731_v3 = vcombine.high %v996_v62, %v1000_v63  ;;  %v793_v52 = vld [vmem:[#allocation8 + $0xb0] sm:$0xff]  ;;  %v790_v54 = vld [vmem:[#allocation8 + $0x98] sm:$0xff] }
 0x24e   :  { %2403 = vmatpush1.bf16.msra.mxu1 %v3672_v7  ;;  %2489 = vmatpush1.bf16.msra.mxu0 %v3674_v8  ;;  %v1008_v7 = vld [vmem:[#allocation8 + $0x768] sm:$0xff]  ;;  %v3728_v8 = vcombine.low %v995_v60, %v999_v61  ;;  %v797_v61 = vld [vmem:[#allocation8 + $0xd0] sm:$0xff] }
 0x24f   :  { %2404 = vmatprep.subr.bf16.mxu1 %v3681_v9  ;;  %2490 = vmatprep.subr.bf16.mxu0 %v3683_v10  ;;  %v3730_v9 = vcombine.low %v996_v62, %v1000_v63  ;;  %v3737_v10 = vcombine.high %v1003_v4, %v1007_v5  ;;  %v3739_v11 = vcombine.high %v1004_v6, %v1008_v7  ;;  %v801_v62 = vld [vmem:[#allocation8 + $0xf0] sm:$0xff]  ;;  %v798_v63 = vld [vmem:[#allocation8 + $0xd8] sm:$0xff] }
 0x252   :  { %2405 = vmatpush1.bf16.msra.mxu1 %v3680_v15  ;;  %2491 = vmatpush1.bf16.msra.mxu0 %v3682_v16  ;;  %v1016_v15 = vld [vmem:[#allocation8 + $0x7a8] sm:$0xff]  ;;  %v3736_v16 = vcombine.low %v1003_v4, %v1007_v5  ;;  %v805_v5 = vld [vmem:[#allocation8 + $0x110] sm:$0xff] }
 0x253   :  { %2406 = vmatprep.subr.bf16.mxu1 %v3689_v17  ;;  %2492 = vmatprep.subr.bf16.mxu0 %v3691_v18  ;;  %v3738_v17 = vcombine.low %v1004_v6, %v1008_v7  ;;  %v3745_v18 = vcombine.high %v1011_v12, %v1015_v13  ;;  %v3747_v19 = vcombine.high %v1012_v14, %v1016_v15  ;;  %v809_v6 = vld [vmem:[#allocation8 + $0x130] sm:$0xff]  ;;  %v810_v7 = vld [vmem:[#allocation8 + $0x138] sm:$0xff] }
 0x256   :  { %2407 = vmatpush1.bf16.msra.mxu1 %v3688_v25  ;;  %2493 = vmatpush1.bf16.msra.mxu0 %v3690_v31  ;;  %v1024_v25 = vld [vmem:[#allocation8 + $0x7e8] sm:$0xff]  ;;  %v3744_v31 = vcombine.low %v1011_v12, %v1015_v13  ;;  %v813_v12 = vld [vmem:[#allocation8 + $0x150] sm:$0xff] }
 0x257   :  { %2408 = vmatprep.subr.bf16.mxu1 %v3697_v32  ;;  %2494 = vmatprep.subr.bf16.mxu0 %v3699_v33  ;;  %v3746_v32 = vcombine.low %v1012_v14, %v1016_v15  ;;  %v3753_v33 = vcombine.high %v1019_v20, %v1023_v23  ;;  %v3755_v34 = vcombine.high %v1020_v24, %v1024_v25  ;;  %v817_v13 = vld [vmem:[#allocation8 + $0x170] sm:$0xff]  ;;  %v814_v14 = vld [vmem:[#allocation8 + $0x158] sm:$0xff] }
 0x258   :  { %v818_v15 = vld [vmem:[#allocation8 + $0x178] sm:$0xff] }
 0x25a   :  { %2409 = vmatpush1.bf16.msra.mxu1 %v3696_v38  ;;  %2495 = vmatpush1.bf16.msra.mxu0 %v3698_v39  ;;  %v778_v38 = vld [vmem:[#allocation8 + $0x38] sm:$0xff]  ;;  %v3752_v39 = vcombine.low %v1019_v20, %v1023_v23  ;;  %v821_v20 = vld [vmem:[#allocation8 + $0x190] sm:$0xff] }
 0x25b   :  { %2410 = vmatprep.subr.bf16.mxu1 %v3705_v40  ;;  %2496 = vmatprep.subr.bf16.mxu0 %v3707_v41  ;;  %v3754_v40 = vcombine.low %v1020_v24, %v1024_v25  ;;  %v3509_v41 = vcombine.high %v773_v35, %v777_v36  ;;  %v3511_v42 = vcombine.high %v774_v37, %v778_v38  ;;  %v825_v23 = vld [vmem:[#allocation8 + $0x1b0] sm:$0xff]  ;;  %v822_v24 = vld [vmem:[#allocation8 + $0x198] sm:$0xff] }
 0x25c   :  { %v826_v25 = vld [vmem:[#allocation8 + $0x1b8] sm:$0xff] }
 0x25e   :  { %2411 = vmatpush1.bf16.msra.mxu1 %v3704_v46  ;;  %2497 = vmatpush1.bf16.msra.mxu0 %v3706_v47  ;;  %v786_v46 = vld [vmem:[#allocation8 + $0x78] sm:$0xff]  ;;  %v3508_v47 = vcombine.low %v773_v35, %v777_v36  ;;  %v829_v35 = vld [vmem:[#allocation8 + $0x1d0] sm:$0xff] }
 0x25f   :  { %2412 = vmatprep.subr.bf16.mxu1 %v3713_v48  ;;  %2498 = vmatprep.subr.bf16.mxu0 %v3715_v49  ;;  %v3510_v48 = vcombine.low %v774_v37, %v778_v38  ;;  %v3517_v49 = vcombine.high %v781_v43, %v785_v44  ;;  %v3519_v50 = vcombine.high %v782_v45, %v786_v46  ;;  %v833_v36 = vld [vmem:[#allocation8 + $0x1f0] sm:$0xff]  ;;  %v830_v37 = vld [vmem:[#allocation8 + $0x1d8] sm:$0xff] }
 0x260   :  { %v834_v38 = vld [vmem:[#allocation8 + $0x1f8] sm:$0xff] }
 0x262   :  { %2413 = vmatpush1.bf16.msra.mxu1 %v3712_v56  ;;  %2499 = vmatpush1.bf16.msra.mxu0 %v3714_v57  ;;  %v794_v56 = vld [vmem:[#allocation8 + $0xb8] sm:$0xff]  ;;  %v3516_v57 = vcombine.low %v781_v43, %v785_v44  ;;  %v837_v43 = vld [vmem:[#allocation8 + $0x210] sm:$0xff] }
 0x263   :  { %2414 = vmatprep.subr.bf16.mxu1 %v3721_v58  ;;  %2500 = vmatprep.subr.bf16.mxu0 %v3723_v59  ;;  %v3518_v58 = vcombine.low %v782_v45, %v786_v46  ;;  %v3525_v59 = vcombine.high %v789_v51, %v793_v52  ;;  %v3527_v60 = vcombine.high %v790_v54, %v794_v56  ;;  %v841_v44 = vld [vmem:[#allocation8 + $0x230] sm:$0xff]  ;;  %v838_v45 = vld [vmem:[#allocation8 + $0x218] sm:$0xff] }
 0x264   :  { %v842_v46 = vld [vmem:[#allocation8 + $0x238] sm:$0xff] }
 0x266   :  { %2415 = vmatpush1.bf16.msra.mxu1 %v3720_v0  ;;  %2501 = vmatpush1.bf16.msra.mxu0 %v3722_v1  ;;  %v802_v0 = vld [vmem:[#allocation8 + $0xf8] sm:$0xff]  ;;  %v3524_v1 = vcombine.low %v789_v51, %v793_v52  ;;  %v845_v51 = vld [vmem:[#allocation8 + $0x250] sm:$0xff] }
 0x267   :  { %2416 = vmatprep.subr.bf16.mxu1 %v3729_v2  ;;  %2502 = vmatprep.subr.bf16.mxu0 %v3731_v3  ;;  %v3526_v2 = vcombine.low %v790_v54, %v794_v56  ;;  %v3533_v3 = vcombine.high %v797_v61, %v801_v62  ;;  %v3535_v4 = vcombine.high %v798_v63, %v802_v0  ;;  %v849_v52 = vld [vmem:[#allocation8 + $0x270] sm:$0xff]  ;;  %v846_v54 = vld [vmem:[#allocation8 + $0x258] sm:$0xff] }
 0x268   :  { %v850_v56 = vld [vmem:[#allocation8 + $0x278] sm:$0xff] }
 0x26a   :  { %2417 = vmatpush1.bf16.msra.mxu1 %v3728_v8  ;;  %2503 = vmatpush1.bf16.msra.mxu0 %v3730_v9  ;;  %v3532_v8 = vcombine.low %v797_v61, %v801_v62  ;;  %v3534_v9 = vcombine.low %v798_v63, %v802_v0  ;;  %v853_v61 = vld [vmem:[#allocation8 + $0x290] sm:$0xff]  ;;  %v854_v63 = vld [vmem:[#allocation8 + $0x298] sm:$0xff] }
 0x26b   :  { %2418 = vmatprep.subr.bf16.mxu1 %v3737_v10  ;;  %2504 = vmatprep.subr.bf16.mxu0 %v3739_v11  ;;  %v3541_v10 = vcombine.high %v805_v5, %v809_v6  ;;  %v857_v62 = vld [vmem:[#allocation8 + $0x2b0] sm:$0xff]  ;;  %v858_v0 = vld [vmem:[#allocation8 + $0x2b8] sm:$0xff] }
 0x26e   :  { %2419 = vmatpush1.bf16.msra.mxu1 %v3736_v16  ;;  %2505 = vmatpush1.bf16.msra.mxu0 %v3738_v17  ;;  %v3540_v16 = vcombine.low %v805_v5, %v809_v6  ;;  %v861_v5 = vld [vmem:[#allocation8 + $0x2d0] sm:$0xff] }
 0x26f   :  { %2420 = vmatprep.subr.bf16.mxu1 %v3745_v18  ;;  %2506 = vmatprep.subr.bf16.mxu0 %v3747_v19  ;;  %v3549_v18 = vcombine.high %v813_v12, %v817_v13  ;;  %v3551_v19 = vcombine.high %v814_v14, %v818_v15  ;;  %v865_v6 = vld [vmem:[#allocation8 + $0x2f0] sm:$0xff] }
 0x272   :  { %2421 = vmatpush1.bf16.msra.mxu1 %v3744_v31  ;;  %2507 = vmatpush1.bf16.msra.mxu0 %v3746_v32  ;;  %v3548_v31 = vcombine.low %v813_v12, %v817_v13  ;;  %v3550_v32 = vcombine.low %v814_v14, %v818_v15  ;;  %v869_v12 = vld [vmem:[#allocation8 + $0x310] sm:$0xff]  ;;  %v870_v14 = vld [vmem:[#allocation8 + $0x318] sm:$0xff] }
 0x273   :  { %2422 = vmatprep.subr.bf16.mxu1 %v3753_v33  ;;  %2508 = vmatprep.subr.bf16.mxu0 %v3755_v34  ;;  %v3557_v33 = vcombine.high %v821_v20, %v825_v23  ;;  %v3559_v34 = vcombine.high %v822_v24, %v826_v25  ;;  %v873_v13 = vld [vmem:[#allocation8 + $0x330] sm:$0xff]  ;;  %v874_v15 = vld [vmem:[#allocation8 + $0x338] sm:$0xff] }
 0x276   :  { %2423 = vmatpush1.bf16.msra.mxu1 %v3752_v39  ;;  %2509 = vmatpush1.bf16.msra.mxu0 %v3754_v40  ;;  %v3556_v39 = vcombine.low %v821_v20, %v825_v23  ;;  %v3558_v40 = vcombine.low %v822_v24, %v826_v25  ;;  %v877_v20 = vld [vmem:[#allocation8 + $0x350] sm:$0xff]  ;;  %v878_v24 = vld [vmem:[#allocation8 + $0x358] sm:$0xff] }
 0x277   :  { %2521 = vmatprep.subr.bf16.mxu1 %v3509_v41  ;;  %2607 = vmatprep.subr.bf16.mxu0 %v3511_v42  ;;  %v3565_v41 = vcombine.high %v829_v35, %v833_v36  ;;  %v3567_v42 = vcombine.high %v830_v37, %v834_v38  ;;  %v881_v23 = vld [vmem:[#allocation8 + $0x370] sm:$0xff]  ;;  %v882_v25 = vld [vmem:[#allocation8 + $0x378] sm:$0xff] }
 0x279   :  { %2425 = vmatmul.mubr.bf16.vlgmr.msra.gmra.mrb[4].mxu1 %v4449_v22  ;;  %2511 = vmatmul.mubr.bf16.vlgmr.msra.gmra.mrb[8].mxu0 %v4449_v22 }
 0x27a   :  { %2522 = vmatpush1.bf16.msra.mxu1 %v3508_v47  ;;  %2553 = vmatprep.mubr.bf16.mxu1 %v4451_v26  ;;  %v3564_v47 = vcombine.low %v829_v35, %v833_v36  ;;  %v885_v35 = vld [vmem:[#allocation8 + $0x390] sm:$0xff] }
 0x27b   :  { %2608 = vmatpush1.bf16.msra.mxu0 %v3510_v48  ;;  %2639 = vmatprep.mubr.bf16.mxu0 %v4451_v26  ;;  %v806_v26 = vld [vmem:[#allocation8 + $0x118] sm:$0xff]  ;;  %v3566_v48 = vcombine.low %v830_v37, %v834_v38  ;;  %v889_v36 = vld [vmem:[#allocation8 + $0x3b0] sm:$0xff] }
 0x27c   :  { %2523 = vmatprep.subr.bf16.mxu1 %v3517_v49  ;;  %2609 = vmatprep.subr.bf16.mxu0 %v3519_v50  ;;  %v3543_v11 = vcombine.high %v806_v26, %v810_v7  ;;  %v3542_v17 = vcombine.low %v806_v26, %v810_v7  ;;  %v3573_v49 = vcombine.high %v837_v43, %v841_v44  ;;  %v862_v26 = vld [vmem:[#allocation8 + $0x2d8] sm:$0xff] }
 0x27d   :  { %v3575_v50 = vcombine.high %v838_v45, %v842_v46  ;;  %v866_v7 = vld [vmem:[#allocation8 + $0x2f8] sm:$0xff] }
 0x27e   :  { %2524 = vmatpush1.bf16.msra.mxu1 %v3516_v57  ;;  %v3572_v57 = vcombine.low %v837_v43, %v841_v44  ;;  %v886_v37 = vld [vmem:[#allocation8 + $0x398] sm:$0xff]  ;;  %v893_v43 = vld [vmem:[#allocation8 + $0x3d0] sm:$0xff] }
 0x27f   :  { %2610 = vmatpush1.bf16.msra.mxu0 %v3518_v58  ;;  %2525 = vmatprep.subr.bf16.mxu1 %v3525_v59  ;;  %v3574_v58 = vcombine.low %v838_v45, %v842_v46  ;;  %v3581_v59 = vcombine.high %v845_v51, %v849_v52  ;;  %v890_v38 = vld [vmem:[#allocation8 + $0x3b8] sm:$0xff]  ;;  %v897_v44 = vld [vmem:[#allocation8 + $0x3f0] sm:$0xff] }
 0x280   :  { %2611 = vmatprep.subr.bf16.mxu0 %v3527_v60  ;;  %v3583_v60 = vcombine.high %v846_v54, %v850_v56  ;;  %v894_v45 = vld [vmem:[#allocation8 + $0x3d8] sm:$0xff] }
 0x281   :  { %v898_v46 = vld [vmem:[#allocation8 + $0x3f8] sm:$0xff] }
 0x282   :  { %2526 = vmatpush1.bf16.msra.mxu1 %v3524_v1  ;;  %v3580_v1 = vcombine.low %v845_v51, %v849_v52  ;;  %v901_v51 = vld [vmem:[#allocation8 + $0x410] sm:$0xff] }
 0x283   :  { %2612 = vmatpush1.bf16.msra.mxu0 %v3526_v2  ;;  %2527 = vmatprep.subr.bf16.mxu1 %v3533_v3  ;;  %v3582_v2 = vcombine.low %v846_v54, %v850_v56  ;;  %v3589_v3 = vcombine.high %v853_v61, %v857_v62  ;;  %v905_v52 = vld [vmem:[#allocation8 + $0x430] sm:$0xff]  ;;  %v902_v54 = vld [vmem:[#allocation8 + $0x418] sm:$0xff] }
 0x284   :  { %2613 = vmatprep.subr.bf16.mxu0 %v3535_v4  ;;  %v3591_v4 = vcombine.high %v854_v63, %v858_v0  ;;  %v906_v56 = vld [vmem:[#allocation8 + $0x438] sm:$0xff] }
 0x286   :  { %2528 = vmatpush1.bf16.msra.mxu1 %v3532_v8  ;;  %v3588_v8 = vcombine.low %v853_v61, %v857_v62  ;;  %v909_v61 = vld [vmem:[#allocation8 + $0x450] sm:$0xff] }
 0x287   :  { %2614 = vmatpush1.bf16.msra.mxu0 %v3534_v9  ;;  %2529 = vmatprep.subr.bf16.mxu1 %v3541_v10  ;;  %v3590_v9 = vcombine.low %v854_v63, %v858_v0  ;;  %v3597_v10 = vcombine.high %v861_v5, %v865_v6  ;;  %v913_v62 = vld [vmem:[#allocation8 + $0x470] sm:$0xff]  ;;  %v3636_v63 = vcombine.low %v901_v51, %v905_v52  ;;  %v910_v0 = vld [vmem:[#allocation8 + $0x458] sm:$0xff] }
 0x288   :  { %2615 = vmatprep.subr.bf16.mxu0 %v3543_v11  ;;  %v3599_v11 = vcombine.high %v862_v26, %v866_v7 }
 0x28a   :  { %2530 = vmatpush1.bf16.msra.mxu1 %v3540_v16  ;;  %v3596_v16 = vcombine.low %v861_v5, %v865_v6  ;;  %v921_v5 = vld [vmem:[#allocation8 + $0x4b0] sm:$0xff] }
 0x28b   :  { %2616 = vmatpush1.bf16.msra.mxu0 %v3542_v17  ;;  %2531 = vmatprep.subr.bf16.mxu1 %v3549_v18  ;;  %v3598_v17 = vcombine.low %v862_v26, %v866_v7  ;;  %v3605_v18 = vcombine.high %v869_v12, %v873_v13  ;;  %v918_v26 = vld [vmem:[#allocation8 + $0x498] sm:$0xff] }
 0x28c   :  { %2617 = vmatprep.subr.bf16.mxu0 %v3551_v19  ;;  %v3607_v19 = vcombine.high %v870_v14, %v874_v15  ;;  %v922_v7 = vld [vmem:[#allocation8 + $0x4b8] sm:$0xff] }
 0x28e   :  { %2532 = vmatpush1.bf16.msra.mxu1 %v3548_v31  ;;  %v3604_v31 = vcombine.low %v869_v12, %v873_v13  ;;  %v925_v12 = vld [vmem:[#allocation8 + $0x4d0] sm:$0xff] }
 0x28f   :  { %2618 = vmatpush1.bf16.msra.mxu0 %v3550_v32  ;;  %2533 = vmatprep.subr.bf16.mxu1 %v3557_v33  ;;  %v3606_v32 = vcombine.low %v870_v14, %v874_v15  ;;  %v3613_v33 = vcombine.high %v877_v20, %v881_v23  ;;  %v929_v13 = vld [vmem:[#allocation8 + $0x4f0] sm:$0xff]  ;;  %v926_v14 = vld [vmem:[#allocation8 + $0x4d8] sm:$0xff] }
 0x290   :  { %2619 = vmatprep.subr.bf16.mxu0 %v3559_v34  ;;  %v3615_v34 = vcombine.high %v878_v24, %v882_v25  ;;  %v930_v15 = vld [vmem:[#allocation8 + $0x4f8] sm:$0xff] }
 0x292   :  { %2534 = vmatpush1.bf16.msra.mxu1 %v3556_v39  ;;  %v3612_v39 = vcombine.low %v877_v20, %v881_v23  ;;  %v937_v20 = vld [vmem:[#allocation8 + $0x530] sm:$0xff]  ;;  %v934_v23 = vld [vmem:[#allocation8 + $0x518] sm:$0xff] }
 0x293   :  { %2620 = vmatpush1.bf16.msra.mxu0 %v3558_v40  ;;  %2535 = vmatprep.subr.bf16.mxu1 %v3565_v41  ;;  %v3614_v40 = vcombine.low %v878_v24, %v882_v25  ;;  %v3621_v41 = vcombine.high %v885_v35, %v889_v36  ;;  %v938_v24 = vld [vmem:[#allocation8 + $0x538] sm:$0xff]  ;;  %v3662_v25 = vcombine.low %v926_v14, %v930_v15 }
 0x294   :  { %2621 = vmatprep.subr.bf16.mxu0 %v3567_v42  ;;  %v3623_v42 = vcombine.high %v886_v37, %v890_v38 }
 0x296   :  { %2536 = vmatpush1.bf16.msra.mxu1 %v3564_v47  ;;  %v3620_v47 = vcombine.low %v885_v35, %v889_v36  ;;  %v942_v35 = vld [vmem:[#allocation8 + $0x558] sm:$0xff] }
 0x297   :  { %2622 = vmatpush1.bf16.msra.mxu0 %v3566_v48  ;;  %2537 = vmatprep.subr.bf16.mxu1 %v3573_v49  ;;  %v3622_v48 = vcombine.low %v886_v37, %v890_v38  ;;  %v3629_v49 = vcombine.high %v893_v43, %v897_v44  ;;  %v946_v36 = vld [vmem:[#allocation8 + $0x578] sm:$0xff]  ;;  %v3670_v38 = vcombine.low %v934_v23, %v938_v24 }
 0x298   :  { %2623 = vmatprep.subr.bf16.mxu0 %v3575_v50  ;;  %v3631_v50 = vcombine.high %v894_v45, %v898_v46 }
 0x29a   :  { %2538 = vmatpush1.bf16.msra.mxu1 %v3572_v57  ;;  %v3628_v57 = vcombine.low %v893_v43, %v897_v44  ;;  %v950_v43 = vld [vmem:[#allocation8 + $0x598] sm:$0xff] }
 0x29b   :  { %2624 = vmatpush1.bf16.msra.mxu0 %v3574_v58  ;;  %2539 = vmatprep.subr.bf16.mxu1 %v3581_v59  ;;  %v3630_v58 = vcombine.low %v894_v45, %v898_v46  ;;  %v3637_v59 = vcombine.high %v901_v51, %v905_v52  ;;  %v954_v44 = vld [vmem:[#allocation8 + $0x5b8] sm:$0xff]  ;;  %v3678_v46 = vcombine.low %v942_v35, %v946_v36 }
 0x29c   :  { %2625 = vmatprep.subr.bf16.mxu0 %v3583_v60  ;;  %v3639_v60 = vcombine.high %v902_v54, %v906_v56  ;;  %v958_v51 = vld [vmem:[#allocation8 + $0x5d8] sm:$0xff] }
 0x29d   :  { %v962_v52 = vld [vmem:[#allocation8 + $0x5f8] sm:$0xff] }
 0x29e   :  { %2540 = vmatpush1.bf16.msra.mxu1 %v3580_v1  ;;  %v914_v1 = vld [vmem:[#allocation8 + $0x478] sm:$0xff] }
 0x29f   :  { %2626 = vmatpush1.bf16.msra.mxu0 %v3582_v2  ;;  %2541 = vmatprep.subr.bf16.mxu1 %v3589_v3  ;;  %v3638_v2 = vcombine.low %v902_v54, %v906_v56  ;;  %v3645_v3 = vcombine.high %v909_v61, %v913_v62  ;;  %v3647_v6 = vcombine.high %v910_v0, %v914_v1 }
 0x2a0   :  { %2627 = vmatprep.subr.bf16.mxu0 %v3591_v4  ;;  %v917_v4 = vld [vmem:[#allocation8 + $0x490] sm:$0xff]  ;;  %v3686_v56 = vcombine.low %v950_v43, %v954_v44 }
 0x2a2   :  { %2542 = vmatpush1.bf16.msra.mxu1 %v3588_v8  ;;  %v3644_v8 = vcombine.low %v909_v61, %v913_v62  ;;  %v966_v61 = vld [vmem:[#allocation8 + $0x618] sm:$0xff] }
 0x2a3   :  { %2628 = vmatpush1.bf16.msra.mxu0 %v3590_v9  ;;  %2543 = vmatprep.subr.bf16.mxu1 %v3597_v10  ;;  %v3646_v9 = vcombine.low %v910_v0, %v914_v1  ;;  %v3653_v10 = vcombine.high %v917_v4, %v921_v5  ;;  %v970_v62 = vld [vmem:[#allocation8 + $0x638] sm:$0xff]  ;;  %v3694_v0 = vcombine.low %v958_v51, %v962_v52 }
 0x2a4   :  { %2629 = vmatprep.subr.bf16.mxu0 %v3599_v11  ;;  %v3655_v11 = vcombine.high %v918_v26, %v922_v7 }
 0x2a6   :  { %2544 = vmatpush1.bf16.msra.mxu1 %v3596_v16  ;;  %v3652_v16 = vcombine.low %v917_v4, %v921_v5  ;;  %v977_v4 = vld [vmem:[#allocation8 + $0x670] sm:$0xff]  ;;  %v974_v5 = vld [vmem:[#allocation8 + $0x658] sm:$0xff] }
 0x2a7   :  { %2630 = vmatpush1.bf16.msra.mxu0 %v3598_v17  ;;  %2545 = vmatprep.subr.bf16.mxu1 %v3605_v18  ;;  %v3661_v17 = vcombine.high %v925_v12, %v929_v13  ;;  %v3663_v18 = vcombine.high %v926_v14, %v930_v15 }
 0x2a8   :  { %2631 = vmatprep.subr.bf16.mxu0 %v3607_v19  ;;  %v933_v19 = vld [vmem:[#allocation8 + $0x510] sm:$0xff] }
 0x2a9   :  { %v3668_v37 = vcombine.low %v933_v19, %v937_v20 }
 0x2aa   :  { %2546 = vmatpush1.bf16.msra.mxu1 %v3604_v31  ;;  %v3669_v31 = vcombine.high %v933_v19, %v937_v20  ;;  %v990_v19 = vld [vmem:[#allocation8 + $0x6d8] sm:$0xff] }
 0x2ab   :  { %2632 = vmatpush1.bf16.msra.mxu0 %v3606_v32  ;;  %2547 = vmatprep.subr.bf16.mxu1 %v3613_v33  ;;  %v3671_v32 = vcombine.high %v934_v23, %v938_v24  ;;  %v941_v33 = vld [vmem:[#allocation8 + $0x550] sm:$0xff]  ;;  %v994_v20 = vld [vmem:[#allocation8 + $0x6f8] sm:$0xff] }
 0x2ac   :  { %2633 = vmatprep.subr.bf16.mxu0 %v3615_v34  ;;  %v945_v34 = vld [vmem:[#allocation8 + $0x570] sm:$0xff] }
 0x2ad   :  { %v3676_v45 = vcombine.low %v941_v33, %v945_v34 }
 0x2ae   :  { %2548 = vmatpush1.bf16.msra.mxu1 %v3612_v39  ;;  %v3677_v39 = vcombine.high %v941_v33, %v945_v34  ;;  %v998_v33 = vld [vmem:[#allocation8 + $0x718] sm:$0xff] }
 0x2af   :  { %2634 = vmatpush1.bf16.msra.mxu0 %v3614_v40  ;;  %2549 = vmatprep.subr.bf16.mxu1 %v3621_v41  ;;  %v3679_v40 = vcombine.high %v942_v35, %v946_v36  ;;  %v949_v41 = vld [vmem:[#allocation8 + $0x590] sm:$0xff]  ;;  %v1002_v34 = vld [vmem:[#allocation8 + $0x738] sm:$0xff]  ;;  %v3726_v36 = vcombine.low %v990_v19, %v994_v20 }
 0x2b0   :  { %2635 = vmatprep.subr.bf16.mxu0 %v3623_v42  ;;  %v953_v42 = vld [vmem:[#allocation8 + $0x5b0] sm:$0xff] }
 0x2b1   :  { %v3684_v54 = vcombine.low %v949_v41, %v953_v42 }
 0x2b2   :  { %2550 = vmatpush1.bf16.msra.mxu1 %v3620_v47  ;;  %v3685_v47 = vcombine.high %v949_v41, %v953_v42  ;;  %v1006_v41 = vld [vmem:[#allocation8 + $0x758] sm:$0xff] }
 0x2b3   :  { %2636 = vmatpush1.bf16.msra.mxu0 %v3622_v48  ;;  %2551 = vmatprep.subr.bf16.mxu1 %v3629_v49  ;;  %v3687_v48 = vcombine.high %v950_v43, %v954_v44  ;;  %v957_v49 = vld [vmem:[#allocation8 + $0x5d0] sm:$0xff]  ;;  %v1010_v42 = vld [vmem:[#allocation8 + $0x778] sm:$0xff]  ;;  %v3734_v44 = vcombine.low %v998_v33, %v1002_v34 }
 0x2b4   :  { %2637 = vmatprep.subr.bf16.mxu0 %v3631_v50  ;;  %v961_v50 = vld [vmem:[#allocation8 + $0x5f0] sm:$0xff] }
 0x2b6   :  { %2552 = vmatpush1.bf16.msra.mxu1 %v3628_v57  ;;  %v3693_v57 = vcombine.high %v957_v49, %v961_v50 }
 0x2b7   :  { %2638 = vmatpush1.bf16.msra.mxu0 %v3630_v58  ;;  %2564 = vmatprep.subr.bf16.mxu1 %v3637_v59  ;;  %v3695_v58 = vcombine.high %v958_v51, %v962_v52  ;;  %v965_v59 = vld [vmem:[#allocation8 + $0x610] sm:$0xff]  ;;  %v3742_v52 = vcombine.low %v1006_v41, %v1010_v42 }
 0x2b8   :  { %2650 = vmatprep.subr.bf16.mxu0 %v3639_v60  ;;  %v969_v60 = vld [vmem:[#allocation8 + $0x630] sm:$0xff] }
 0x2b9   :  { %2554 = vmatmul.mubr.bf16.vlgmr.msra.gmra.mrb[8].mxu1 %v4447_v21  ;;  %v3701_v1 = vcombine.high %v965_v59, %v969_v60 }
 0x2ba   :  { %2640 = vmatmul.mubr.bf16.vlgmr.msra.gmra.mrb[12].mxu0 %v4447_v21  ;;  %2565 = vmatpush1.bf16.msra.mxu1 %v3636_v63  ;;  %v3654_v21 = vcombine.low %v918_v26, %v922_v7  ;;  %v3692_v63 = vcombine.low %v957_v49, %v961_v50  ;;  %v3700_v26 = vcombine.low %v965_v59, %v969_v60  ;;  %v1014_v49 = vld [vmem:[#allocation8 + $0x798] sm:$0xff] }
 0x2bb   :  { %2596 = vmatprep.mubr.bf16.mxu1 %v4453_v29  ;;  %2651 = vmatpush1.bf16.msra.mxu0 %v3638_v2  ;;  %v3703_v2 = vcombine.high %v966_v61, %v970_v62  ;;  %v3702_v7 = vcombine.low %v966_v61, %v970_v62  ;;  %v1018_v50 = vld [vmem:[#allocation8 + $0x7b8] sm:$0xff] }
 0x2bc   :  { %2682 = vmatprep.mubr.bf16.mxu0 %v4453_v29  ;;  %2566 = vmatprep.subr.bf16.mxu1 %v3645_v3  ;;  %v3660_v29 = vcombine.low %v925_v12, %v929_v13  ;;  %v973_v3 = vld [vmem:[#allocation8 + $0x650] sm:$0xff]  ;;  %v982_v12 = vld [vmem:[#allocation8 + $0x698] sm:$0xff]  ;;  %v3750_v62 = vcombine.low %v1014_v49, %v1018_v50 }
 0x2bd   :  { %2652 = vmatprep.subr.bf16.mxu0 %v3647_v6  ;;  %v978_v6 = vld [vmem:[#allocation8 + $0x678] sm:$0xff]  ;;  %v3708_v14 = vcombine.low %v973_v3, %v977_v4 }
 0x2be   :  { %2567 = vmatpush1.bf16.msra.mxu1 %v3644_v8  ;;  %v3709_v8 = vcombine.high %v973_v3, %v977_v4  ;;  %v986_v13 = vld [vmem:[#allocation8 + $0x6b8] sm:$0xff]  ;;  %v3710_v15 = vcombine.low %v974_v5, %v978_v6  ;;  %v4081_v3 = vld [vmem:[#allocation10 + $0x40] sm:$0xff]  }
 0x2bf   :  { %2653 = vmatpush1.bf16.msra.mxu0 %v3646_v9  ;;  %2568 = vmatprep.subr.bf16.mxu1 %v3653_v10  ;;  %v3711_v9 = vcombine.high %v974_v5, %v978_v6  ;;  %v981_v10 = vld [vmem:[#allocation8 + $0x690] sm:$0xff]  ;;  %v3718_v24 = vcombine.low %v982_v12, %v986_v13  ;;  %v1022_v59 = vld [vmem:[#allocation8 + $0x7d8] sm:$0xff]  ;;  %v4082_v4 = vld [vmem:[#allocation10 + $0xc0] sm:$0xff]  }
 0x2c0   :  { %2654 = vmatprep.subr.bf16.mxu0 %v3655_v11  ;;  %v985_v11 = vld [vmem:[#allocation8 + $0x6b0] sm:$0xff]  ;;  %v1026_v60 = vld [vmem:[#allocation8 + $0x7f8] sm:$0xff]  ;;  %v4083_v5 = vld [vmem:[#allocation10] sm:$0xff]  }
 0x2c1   :  { %v3716_v23 = vcombine.low %v981_v10, %v985_v11  ;;  %v4084_v6 = vld [vmem:[#allocation10 + $0x80] sm:$0xff]  }
 0x2c2   :  { %2569 = vmatpush1.bf16.msra.mxu1 %v3652_v16  ;;  %v3717_v16 = vcombine.high %v981_v10, %v985_v11  ;;  %v4089_v10 = vld [vmem:[#allocation10 + $0x50] sm:$0xff]  }
 0x2c3   :  { %2655 = vmatpush1.bf16.msra.mxu0 %v3654_v21  ;;  %2570 = vmatprep.subr.bf16.mxu1 %v3661_v17  ;;  %v3719_v21 = vcombine.high %v982_v12, %v986_v13  ;;  %v989_v17 = vld [vmem:[#allocation8 + $0x6d0] sm:$0xff] }
 0x2c4   :  { %2656 = vmatprep.subr.bf16.mxu0 %v3663_v18  ;;  %v993_v18 = vld [vmem:[#allocation8 + $0x6f0] sm:$0xff] }
 0x2c5   :  { %v3724_v35 = vcombine.low %v989_v17, %v993_v18  ;;  %v4090_v11 = vld [vmem:[#allocation10 + $0xd0] sm:$0xff]  }
 0x2c6   :  { %2571 = vmatpush1.bf16.msra.mxu1 %v3660_v29  ;;  %v3725_v29 = vcombine.high %v989_v17, %v993_v18  ;;  %v4091_v12 = vld [vmem:[#allocation10 + $0x10] sm:$0xff]   ;;  %v4098_v17 = vld [vmem:[#allocation10 + $0xe0] sm:$0xff]  }
 0x2c7   :  { %2657 = vmatpush1.bf16.msra.mxu0 %v3662_v25  ;;  %2572 = vmatprep.subr.bf16.mxu1 %v3669_v31  ;;  %v3727_v25 = vcombine.high %v990_v19, %v994_v20  ;;  %v997_v31 = vld [vmem:[#allocation8 + $0x710] sm:$0xff]  ;;  %v4099_v18 = vld [vmem:[#allocation10 + $0x20] sm:$0xff]   ;;  %v4101_v20 = vld [vmem:[#allocation10 + $0x68] sm:$0xff]  }
 0x2c8   :  { %2658 = vmatprep.subr.bf16.mxu0 %v3671_v32  ;;  %v1001_v32 = vld [vmem:[#allocation8 + $0x730] sm:$0xff]  ;;  %v4100_v19 = vld [vmem:[#allocation10 + $0xa0] sm:$0xff]  }
 0x2c9   :  { %v3732_v43 = vcombine.low %v997_v31, %v1001_v32  ;;  %v4092_v13 = vld [vmem:[#allocation10 + $0x90] sm:$0xff]  }
 0x2ca   :  { %2573 = vmatpush1.bf16.msra.mxu1 %v3668_v37  ;;  %v3733_v37 = vcombine.high %v997_v31, %v1001_v32  ;;  %v4106_v31 = vld [vmem:[#allocation10 + $0xf0] sm:$0xff]  }
 0x2cb   :  { %2659 = vmatpush1.bf16.msra.mxu0 %v3670_v38  ;;  %2574 = vmatprep.subr.bf16.mxu1 %v3677_v39  ;;  %v3735_v38 = vcombine.high %v998_v33, %v1002_v34  ;;  %v1005_v39 = vld [vmem:[#allocation8 + $0x750] sm:$0xff]  ;;  %v4109_v34 = vld [vmem:[#allocation10 + $0x78] sm:$0xff]  }
 0x2cc   :  { %2660 = vmatprep.subr.bf16.mxu0 %v3679_v40  ;;  %v1009_v40 = vld [vmem:[#allocation8 + $0x770] sm:$0xff] }
 0x2cd   :  { %v3740_v51 = vcombine.low %v1005_v39, %v1009_v40  ;;  %v4107_v32 = vld [vmem:[#allocation10 + $0x30] sm:$0xff]  }
 0x2ce   :  { %2575 = vmatpush1.bf16.msra.mxu1 %v3676_v45  ;;  %v3741_v45 = vcombine.high %v1005_v39, %v1009_v40  ;;  %v4108_v33 = vld [vmem:[#allocation10 + $0xb0] sm:$0xff]   ;;  %v4114_v39 = vld [vmem:[#allocation10 + $0x1c0] sm:$0xff]   ;;  %v4474_v40 = vld [vmem:[%s4518_s6] sm:$0xff] }
 0x2cf   :  { %2661 = vmatpush1.bf16.msra.mxu0 %v3678_v46  ;;  %2576 = vmatprep.subr.bf16.mxu1 %v3685_v47  ;;  %v3743_v46 = vcombine.high %v1006_v41, %v1010_v42  ;;  %v1013_v47 = vld [vmem:[#allocation8 + $0x790] sm:$0xff]  ;;  %v1032_v41 = vrot.slane %v4474_v40, %v4426_v28  ;;  %v1040_v42 = vrot.slane %v4474_v40, %v343_v53 }
 0x2d0   :  { %2662 = vmatprep.subr.bf16.mxu0 %v3687_v48  ;;  %v1017_v48 = vld [vmem:[#allocation8 + $0x7b0] sm:$0xff] }
 0x2d1   :  { %v3748_v61 = vcombine.low %v1013_v47, %v1017_v48 }
 0x2d2   :  { %2577 = vmatpush1.bf16.msra.mxu1 %v3684_v54  ;;  %v3749_v54 = vcombine.high %v1013_v47, %v1017_v48 }
 0x2d3   :  { %2663 = vmatpush1.bf16.msra.mxu0 %v3686_v56  ;;  %2578 = vmatprep.subr.bf16.mxu1 %v3693_v57  ;;  %v3751_v56 = vcombine.high %v1014_v49, %v1018_v50  ;;  %v1021_v57 = vld [vmem:[#allocation8 + $0x7d0] sm:$0xff] }
 0x2d4   :  { %2664 = vmatprep.subr.bf16.mxu0 %v3695_v58  ;;  %v1025_v58 = vld [vmem:[#allocation8 + $0x7f0] sm:$0xff] }
 0x2d6   :  { %2579 = vmatpush1.bf16.msra.mxu1 %v3692_v63  ;;  %v3757_v63 = vcombine.high %v1021_v57, %v1025_v58 }
 0x2d7   :  { %2665 = vmatpush1.bf16.msra.mxu0 %v3694_v0  ;;  %2580 = vmatprep.subr.bf16.mxu1 %v3701_v1  ;;  %v3759_v0 = vcombine.high %v1022_v59, %v1026_v60  ;;  %v3756_v1 = vcombine.low %v1021_v57, %v1025_v58 }
 0x2d8   :  { %2666 = vmatprep.subr.bf16.mxu0 %v3703_v2  ;;  %v3758_v2 = vcombine.low %v1022_v59, %v1026_v60 }
 0x2da   :  { %2581 = vmatpush1.bf16.msra.mxu1 %v3700_v26  ;;  %v4085_v26 = vld [vmem:[#allocation10 + $0x48] sm:$0xff]  }
 0x2db   :  { %2667 = vmatpush1.bf16.msra.mxu0 %v3702_v7  ;;  %2582 = vmatprep.subr.bf16.mxu1 %v3709_v8  ;;  %v4086_v7 = vld [vmem:[#allocation10 + $0xc8] sm:$0xff]  }
 0x2dc   :  { %2668 = vmatprep.subr.bf16.mxu0 %v3711_v9  ;;  %v4087_v8 = vld [vmem:[#allocation10 + $0x8] sm:$0xff]  }
 0x2dd   :  { %v4088_v9 = vld [vmem:[#allocation10 + $0x88] sm:$0xff]  }
 0x2de   :  { %2583 = vmatpush1.bf16.msra.mxu1 %v3708_v14  ;;  %v4093_v14 = vld [vmem:[#allocation10 + $0x58] sm:$0xff]  }
 0x2df   :  { %2669 = vmatpush1.bf16.msra.mxu0 %v3710_v15  ;;  %2584 = vmatprep.subr.bf16.mxu1 %v3717_v16  ;;  %v4094_v15 = vld [vmem:[#allocation10 + $0xd8] sm:$0xff]  }
 0x2e0   :  { %2670 = vmatprep.subr.bf16.mxu0 %v3719_v21  ;;  %v4095_v16 = vld [vmem:[#allocation10 + $0x18] sm:$0xff]   ;;  %v4097_v21 = vld [vmem:[#allocation10 + $0x60] sm:$0xff]  }
 0x2e2   :  { %2585 = vmatpush1.bf16.msra.mxu1 %v3716_v23  ;;  %v4102_v23 = vld [vmem:[#allocation10 + $0xe8] sm:$0xff]  }
 0x2e3   :  { %2671 = vmatpush1.bf16.msra.mxu0 %v3718_v24  ;;  %2586 = vmatprep.subr.bf16.mxu1 %v3725_v29  ;;  %v4103_v24 = vld [vmem:[#allocation10 + $0x28] sm:$0xff]  }
 0x2e4   :  { %2672 = vmatprep.subr.bf16.mxu0 %v3727_v25  ;;  %v4104_v29 = vld [vmem:[#allocation10 + $0xa8] sm:$0xff]   ;;  %v4105_v25 = vld [vmem:[#allocation10 + $0x70] sm:$0xff]  }
 0x2e6   :  { %2587 = vmatpush1.bf16.msra.mxu1 %v3724_v35  ;;  %v4110_v35 = vld [vmem:[#allocation10 + $0xf8] sm:$0xff]  }
 0x2e7   :  { %2673 = vmatpush1.bf16.msra.mxu0 %v3726_v36  ;;  %2588 = vmatprep.subr.bf16.mxu1 %v3733_v37  ;;  %v4111_v36 = vld [vmem:[#allocation10 + $0x38] sm:$0xff]  }
 0x2e8   :  { %2674 = vmatprep.subr.bf16.mxu0 %v3735_v38  ;;  %v4112_v37 = vld [vmem:[#allocation10 + $0xb8] sm:$0xff]   ;;  %v4113_v38 = vld [vmem:[#allocation10 + $0x140] sm:$0xff]  }
 0x2ea   :  { %2589 = vmatpush1.bf16.msra.mxu1 %v3732_v43  ;;  %v1036_v43 = vrot.slane %v4474_v40, %v4432_v30 }
 0x2eb   :  { %2675 = vmatpush1.bf16.msra.mxu0 %v3734_v44  ;;  %2590 = vmatprep.subr.bf16.mxu1 %v3741_v45  ;;  %v1044_v44 = vrot.slane %v4474_v40, %v347_v55 }
 0x2ec   :  { %2676 = vmatprep.subr.bf16.mxu0 %v3743_v46 }
 0x2ee   :  { %2591 = vmatpush1.bf16.msra.mxu1 %v3740_v51 }
 0x2ef   :  { %2677 = vmatpush1.bf16.msra.mxu0 %v3742_v52  ;;  %2592 = vmatprep.subr.bf16.mxu1 %v3749_v54 }
 0x2f0   :  { %2678 = vmatprep.subr.bf16.mxu0 %v3751_v56 }
 0x2f2   :  { %2593 = vmatpush1.bf16.msra.mxu1 %v3748_v61 }
 0x2f3   :  { %2679 = vmatpush1.bf16.msra.mxu0 %v3750_v62  ;;  %2594 = vmatprep.subr.bf16.mxu1 %v3757_v63 }
 0x2f4   :  { %2680 = vmatprep.subr.bf16.mxu0 %v3759_v0 }
 0x2f6   :  { %2595 = vmatpush1.bf16.msra.mxu1 %v3756_v1 }
 0x2f7   :  { %2681 = vmatpush1.bf16.msra.mxu0 %v3758_v2  ;;  %3825 = vmatprep.subr.bf16.mxu1 %v4081_v3 }
 0x2f8   :  { %3847 = vmatprep.subr.bf16.mxu0 %v4082_v4 }
 0x2f9   :  { %2597 = vmatmul.mubr.bf16.vlgmr.msra.gmra.mrb[8].mxu1 %v4449_v22 }
 0x2fa   :  { %2683 = vmatmul.mubr.bf16.vlgmr.msra.gmra.mrb[12].mxu0 %v4449_v22  ;;  %3826 = vmatpush3.bf16.msra.mxu1 %v4083_v5  ;;  %v4096_v22 = vld [vmem:[#allocation10 + $0x98] sm:$0xff]  }
 0x2fb   :  { %3848 = vmatpush3.bf16.msra.mxu0 %v4084_v6  ;;  %3827 = vmatprep.subr.bf16.mxu1 %v4085_v26  ;;  %v4115_v26 = vld [vmem:[#allocation10 + $0x100] sm:$0xff]  }
 0x2fc   :  { %3849 = vmatprep.subr.bf16.mxu0 %v4086_v7  ;;  %v4116_v7 = vld [vmem:[#allocation10 + $0x180] sm:$0xff]  }
 0x2fe   :  { %3828 = vmatpush3.bf16.msra.mxu1 %v4087_v8  ;;  %v4117_v8 = vld [vmem:[#allocation10 + $0x148] sm:$0xff]  }
 0x2ff   :  { %3850 = vmatpush3.bf16.msra.mxu0 %v4088_v9  ;;  %3829 = vmatprep.subr.bf16.mxu1 %v4089_v10  ;;  %v4118_v9 = vld [vmem:[#allocation10 + $0x1c8] sm:$0xff]  }
 0x300   :  { %3851 = vmatprep.subr.bf16.mxu0 %v4090_v11  ;;  %v4119_v10 = vld [vmem:[#allocation10 + $0x108] sm:$0xff]  }
 0x301   :  { %v4120_v11 = vld [vmem:[#allocation10 + $0x188] sm:$0xff]  }
 0x302   :  { %3830 = vmatpush3.bf16.msra.mxu1 %v4091_v12  ;;  %v4121_v12 = vld [vmem:[#allocation10 + $0x150] sm:$0xff]  }
 0x303   :  { %3852 = vmatpush3.bf16.msra.mxu0 %v4092_v13  ;;  %3831 = vmatprep.subr.bf16.mxu1 %v4093_v14  ;;  %v4122_v13 = vld [vmem:[#allocation10 + $0x1d0] sm:$0xff]  }
 0x304   :  { %3853 = vmatprep.subr.bf16.mxu0 %v4094_v15  ;;  %v4123_v14 = vld [vmem:[#allocation10 + $0x110] sm:$0xff]  }
 0x305   :  { %v4124_v15 = vld [vmem:[#allocation10 + $0x190] sm:$0xff]  }
 0x306   :  { %3832 = vmatpush3.bf16.msra.mxu1 %v4095_v16  ;;  %v4125_v16 = vld [vmem:[#allocation10 + $0x158] sm:$0xff]  }
 0x307   :  { %3854 = vmatpush3.bf16.msra.mxu0 %v4096_v22  ;;  %3833 = vmatprep.subr.bf16.mxu1 %v4097_v21  ;;  %v4126_v22 = vld [vmem:[#allocation10 + $0x1d8] sm:$0xff]  }
 0x308   :  { %3855 = vmatprep.subr.bf16.mxu0 %v4098_v17  ;;  %v4127_v21 = vld [vmem:[#allocation10 + $0x118] sm:$0xff]  }
 0x309   :  { %v4128_v17 = vld [vmem:[#allocation10 + $0x198] sm:$0xff]  }
 0x30a   :  { %3834 = vmatpush3.bf16.msra.mxu1 %v4099_v18  ;;  %v4129_v18 = vld [vmem:[#allocation10 + $0x160] sm:$0xff]  }
 0x30b   :  { %3856 = vmatpush3.bf16.msra.mxu0 %v4100_v19  ;;  %3835 = vmatprep.subr.bf16.mxu1 %v4101_v20  ;;  %v4130_v19 = vld [vmem:[#allocation10 + $0x1e0] sm:$0xff]  }
 0x30c   :  { %3857 = vmatprep.subr.bf16.mxu0 %v4102_v23  ;;  %v4131_v20 = vld [vmem:[#allocation10 + $0x120] sm:$0xff]  }
 0x30d   :  { %v4132_v23 = vld [vmem:[#allocation10 + $0x1a0] sm:$0xff]  }
 0x30e   :  { %3836 = vmatpush3.bf16.msra.mxu1 %v4103_v24  ;;  %v4133_v24 = vld [vmem:[#allocation10 + $0x168] sm:$0xff]  }
 0x30f   :  { %3858 = vmatpush3.bf16.msra.mxu0 %v4104_v29  ;;  %3837 = vmatprep.subr.bf16.mxu1 %v4105_v25  ;;  %v4134_v29 = vld [vmem:[#allocation10 + $0x1e8] sm:$0xff]  }
 0x310   :  { %3859 = vmatprep.subr.bf16.mxu0 %v4106_v31  ;;  %v4135_v25 = vld [vmem:[#allocation10 + $0x128] sm:$0xff]  }
 0x311   :  { %v4136_v31 = vld [vmem:[#allocation10 + $0x1a8] sm:$0xff]  }
 0x312   :  { %3838 = vmatpush3.bf16.msra.mxu1 %v4107_v32  ;;  %v4137_v32 = vld [vmem:[#allocation10 + $0x170] sm:$0xff]  }
 0x313   :  { %3860 = vmatpush3.bf16.msra.mxu0 %v4108_v33  ;;  %3839 = vmatprep.subr.bf16.mxu1 %v4109_v34  ;;  %v4138_v33 = vld [vmem:[#allocation10 + $0x1f0] sm:$0xff]  }
 0x314   :  { %3861 = vmatprep.subr.bf16.mxu0 %v4110_v35  ;;  %v4139_v34 = vld [vmem:[#allocation10 + $0x130] sm:$0xff]  }
 0x315   :  { %v4140_v35 = vld [vmem:[#allocation10 + $0x1b0] sm:$0xff]  }
 0x316   :  { %3840 = vmatpush3.bf16.msra.mxu1 %v4111_v36  ;;  %v4141_v36 = vld [vmem:[#allocation10 + $0x178] sm:$0xff]  }
 0x317   :  { %3862 = vmatpush3.bf16.msra.mxu0 %v4112_v37  ;;  %3869 = vmatprep.subr.bf16.mxu1 %v4113_v38  ;;  %v4142_v37 = vld [vmem:[#allocation10 + $0x1f8] sm:$0xff]  }
 0x318   :  { %3891 = vmatprep.subr.bf16.mxu0 %v4114_v39  ;;  %v4143_v38 = vld [vmem:[#allocation10 + $0x138] sm:$0xff]  }
 0x319   :  { %v4144_v39 = vld [vmem:[#allocation10 + $0x1b8] sm:$0xff]  }
 0x34c   :  { %v2426_v45 = vpop.f32.mrb[4].mxu1  ;;  %v2512_v46 = vpop.f32.mrb[8].mxu0 }
 0x34d   :  { %v3913_v47 = vadd.f32 %v2426_v45, %v1032_v41  ;;  %v3917_v48 = vadd.f32 %v2512_v46, %v1040_v42  ;;  %v2428_v49 = vpop.f32.mrb[5].mxu1  ;;  %v2514_v50 = vpop.f32.mrb[9].mxu0 }
 0x34e   :  { %v3914_v51 = vadd.f32 %v2428_v49, %v1036_v43  ;;  %v3918_v52 = vadd.f32 %v2514_v50, %v1044_v44  ;;  %v2430_v28 = vpop.f32.mrb[6].mxu1  ;;  %v2516_v54 = vpop.f32.mrb[10].mxu0 }
 0x34f   :  { %v3915_v56 = vadd.f32 %v2430_v28, %v1032_v41  ;;  %v3919_v57 = vadd.f32 %v2516_v54, %v1040_v42  ;;  %v2432_v53 = vpop.f32.mrb[7].mxu1  ;;  %v2518_v58 = vpop.f32.mrb[11].mxu0  ;;  %v2693_v60 = vmax.f32 %v3913_v47, 0.0  ;;  %v2695_v61 = vmax.f32 %v3917_v48, 0.0 }
 0x350   :  { %v3916_v59 = vadd.f32 %v2432_v53, %v1036_v43  ;;  %v3920_v30 = vadd.f32 %v2518_v58, %v1044_v44  ;;  %v2694_v63 = vmax.f32 %v3914_v51, 0.0  ;;  %v2696_v0 = vmax.f32 %v3918_v52, 0.0 }
 0x351   :  { %v2701_v62 = vmax.f32 %v3915_v56, 0.0  ;;  %v2703_v55 = vmax.f32 %v3919_v57, 0.0  ;;  %v1047_v41 = vsub.s32 4, %v4423_v27  ;;  %v1055_v42 = vsub.s32 6, %v4423_v27 }
 0x352   :  { %v2702_v1 = vmax.f32 %v3916_v59, 0.0  ;;  %v2704_v2 = vmax.f32 %v3920_v30, 0.0  ;;  %v1051_v43 = vsub.s32 5, %v4423_v27  ;;  %v1059_v44 = vsub.s32 7, %v4423_v27 }
 0x353   :  { %v2709_v3 = vpack.c.bf16 %v2701_v62, %v2693_v60  ;;  %v2711_v4 = vpack.c.bf16 %v2703_v55, %v2695_v61  ;;  %v1048_v45 = vrot.slane %v4474_v40, %v1047_v41  ;;  %v1056_v46 = vrot.slane %v4474_v40, %v1055_v42 }
 0x354   :  { %v2710_v5 = vpack.c.bf16 %v2702_v1, %v2694_v63  ;;  %v2712_v6 = vpack.c.bf16 %v2704_v2, %v2696_v0  ;;  %v1052_v47 = vrot.slane %v4474_v40, %v1051_v43  ;;  %v1060_v48 = vrot.slane %v4474_v40, %v1059_v44 }
 0x356   :  { %3268 = vmatprep.mubr.bf16.mxu1 %v2710_v5  ;;  %3309 = vmatprep.mubr.bf16.mxu0 %v2712_v6 }
 0x357   :  { %3269 = vmatmul.mubr.bf16.vlgmr.msra.gmra.mrb[12].mxu1 %v2709_v3  ;;  %3310 = vmatmul.mubr.bf16.vlgmr.msra.gmra.mrb[16].mxu0 %v2711_v4 }
 0x358   :  { %3870 = vmatpush3.bf16.msra.mxu1 %v4115_v26  ;;  %3892 = vmatpush3.bf16.msra.mxu0 %v4116_v7 }
 0x359   :  { %3871 = vmatprep.subr.bf16.mxu1 %v4117_v8  ;;  %3893 = vmatprep.subr.bf16.mxu0 %v4118_v9 }
 0x35c   :  { %3872 = vmatpush3.bf16.msra.mxu1 %v4119_v10  ;;  %3894 = vmatpush3.bf16.msra.mxu0 %v4120_v11  ;;  %v3760_v10 = vld [vmem:[%s4520_s8] ss:$0 sm:$0xff]  ;;  %s4303_s8 = smov [#allocation11]  }
 0x35d   :  { %3873 = vmatprep.subr.bf16.mxu1 %v4121_v12  ;;  %3895 = vmatprep.subr.bf16.mxu0 %v4122_v13  ;;  %s3409_s15 = sshll.u32 %s4303_s8, 4  ;;  %s3410_s15 = int_to_ptr.vmem [resolvable:$true] %s3409_s15 }
 0x35e   :  { %s4259_s17 = scalar_lea.vmem %s3410_s15, 256  ;;  %p4264_p13 = scmp.lt.s32.totalorder %s3410_s15, %s3410_s15 }
 0x35f   :  { %p4260_p12 = scmp.ne.s32.totalorder %s3410_s15, %s4259_s17  ;;  %p4265_p0 = scmp.lt.s32.totalorder %s4259_s17, %s4259_s17 }
 0x360   :  { %3874 = vmatpush3.bf16.msra.mxu1 %v4123_v14  ;;  %3896 = vmatpush3.bf16.msra.mxu0 %v4124_v15 }
 0x361   :  { %3875 = vmatprep.subr.bf16.mxu1 %v4125_v16  ;;  %3897 = vmatprep.subr.bf16.mxu0 %v4126_v22  ;;  %p4266_p1 = por %p4265_p0, %p4264_p13 }
 0x363   :  { %p4267_p2 = pnand %p4266_p1, %p4260_p12 }
 0x364   :  { %3876 = vmatpush3.bf16.msra.mxu1 %v4127_v21  ;;  %3898 = vmatpush3.bf16.msra.mxu0 %v4128_v17 }
 0x365   :  { %3877 = vmatprep.subr.bf16.mxu1 %v4129_v18  ;;  %3899 = vmatprep.subr.bf16.mxu0 %v4130_v19 }
 0x368   :  { %3878 = vmatpush3.bf16.msra.mxu1 %v4131_v20  ;;  %3900 = vmatpush3.bf16.msra.mxu0 %v4132_v23 }
 0x369   :  { %3879 = vmatprep.subr.bf16.mxu1 %v4133_v24  ;;  %3901 = vmatprep.subr.bf16.mxu0 %v4134_v29 }
 0x36c   :  { %3880 = vmatpush3.bf16.msra.mxu1 %v4135_v25  ;;  %3902 = vmatpush3.bf16.msra.mxu0 %v4136_v31 }
 0x36d   :  { %3881 = vmatprep.subr.bf16.mxu1 %v4137_v32  ;;  %3903 = vmatprep.subr.bf16.mxu0 %v4138_v33 }
 0x370   :  { %3882 = vmatpush3.bf16.msra.mxu1 %v4139_v34  ;;  %3904 = vmatpush3.bf16.msra.mxu0 %v4140_v35 }
 0x371   :  { %3883 = vmatprep.subr.bf16.mxu1 %v4141_v36  ;;  %3905 = vmatprep.subr.bf16.mxu0 %v4142_v37 }
 0x374   :  { %3884 = vmatpush3.bf16.msra.mxu1 %v4143_v38  ;;  %3906 = vmatpush3.bf16.msra.mxu0 %v4144_v39 }
 0x3cc   :  { %v2598_v49 = vpop.f32.mrb[8].mxu1 }
 0x3cd   :  { %v3921_v50 = vadd.f32 %v2598_v49, %v1048_v45  ;;  %v2684_v51 = vpop.f32.mrb[12].mxu0  ;;  %v2600_v52 = vpop.f32.mrb[9].mxu1 }
 0x3ce   :  { %v3925_v28 = vadd.f32 %v2684_v51, %v1056_v46  ;;  %v3922_v54 = vadd.f32 %v2600_v52, %v1052_v47  ;;  %v2686_v56 = vpop.f32.mrb[13].mxu0  ;;  %v2602_v57 = vpop.f32.mrb[10].mxu1 }
 0x3cf   :  { %v3926_v53 = vadd.f32 %v2686_v56, %v1060_v48  ;;  %v3923_v58 = vadd.f32 %v2602_v57, %v1048_v45  ;;  %v2688_v59 = vpop.f32.mrb[14].mxu0  ;;  %v2604_v27 = vpop.f32.mrb[11].mxu1  ;;  %v2697_v62 = vmax.f32 %v3921_v50, 0.0 }
 0x3d0   :  { %v3927_v30 = vadd.f32 %v2688_v59, %v1056_v46  ;;  %v3924_v60 = vadd.f32 %v2604_v27, %v1052_v47  ;;  %v2690_v61 = vpop.f32.mrb[15].mxu0  ;;  %v2699_v0 = vmax.f32 %v3925_v28, 0.0  ;;  %v2698_v40 = vmax.f32 %v3922_v54, 0.0 }
 0x3d1   :  { %v2705_v55 = vmax.f32 %v3923_v58, 0.0  ;;  %v3928_v63 = vadd.f32 %v2690_v61, %v1060_v48  ;;  %v2700_v3 = vmax.f32 %v3926_v53, 0.0 }
 0x3d2   :  { %v2707_v1 = vmax.f32 %v3927_v30, 0.0  ;;  %v2706_v2 = vmax.f32 %v3924_v60, 0.0 }
 0x3d3   :  { %v2713_v4 = vpack.c.bf16 %v2705_v55, %v2697_v62  ;;  %v2708_v5 = vmax.f32 %v3928_v63, 0.0 }
 0x3d4   :  { %v2715_v6 = vpack.c.bf16 %v2707_v1, %v2699_v0  ;;  %v2714_v26 = vpack.c.bf16 %v2706_v2, %v2698_v40 }
 0x3d5   :  { %v2716_v7 = vpack.c.bf16 %v2708_v5, %v2700_v3 }
 0x3d6   :  { %3350 = vmatprep.mubr.bf16.mxu1 %v2714_v26 }
 0x3d7   :  { %3391 = vmatprep.mubr.bf16.mxu0 %v2716_v7  ;;  %3351 = vmatmul.mubr.bf16.vlgmr.msra.gmra.mrb[16].mxu1 %v2713_v4 }
 0x3d8   :  { %3392 = vmatmul.mubr.bf16.vlgmr.msra.gmra.mrb[20].mxu0 %v2715_v6 }
 0x42a   :  { %v3841_v8 = vpop.f32.mrb[12].mxu1  ;;  %v3863_v9 = vpop.f32.mrb[16].mxu0 }
 0x42b   :  { %v3842_v11 = vpop.f32.mrb[13].mxu1  ;;  %v3864_v12 = vpop.f32.mrb[17].mxu0 }
 0x42c   :  { %v3843_v13 = vadd.f32 %v3842_v11, %v3841_v8  ;;  %v3865_v14 = vadd.f32 %v3864_v12, %v3863_v9  ;;  %v3844_v15 = vpop.f32.mrb[14].mxu1  ;;  %v3866_v16 = vpop.f32.mrb[18].mxu0 }
 0x42d   :  { %v3845_v22 = vpop.f32.mrb[15].mxu1  ;;  %v3867_v21 = vpop.f32.mrb[19].mxu0 }
 0x42e   :  { %v3271_v17 = vadd.f32 %v3843_v13, %v3760_v10  ;;  %v3846_v18 = vadd.f32 %v3845_v22, %v3844_v15  ;;  %v3868_v19 = vadd.f32 %v3867_v21, %v3866_v16 }
 0x430   :  { %v3312_v20 = vadd.f32 %v3865_v14, %v3271_v17  ;;  %v3274_v23 = vadd.f32 %v3846_v18, %v3760_v10 }
 0x432   :  { %v3315_v24 = vadd.f32 %v3868_v19, %v3274_v23 }
 0x4aa   :  { %v3885_v29 = vpop.f32.mrb[16].mxu1 }
 0x4ab   :  { %v3907_v25 = vpop.f32.mrb[20].mxu0  ;;  %v3886_v31 = vpop.f32.mrb[17].mxu1 }
 0x4ac   :  { %v3887_v32 = vadd.f32 %v3886_v31, %v3885_v29  ;;  %v3908_v33 = vpop.f32.mrb[21].mxu0  ;;  %v3888_v34 = vpop.f32.mrb[18].mxu1 }
 0x4ad   :  { %v3909_v35 = vadd.f32 %v3908_v33, %v3907_v25  ;;  %v3910_v36 = vpop.f32.mrb[22].mxu0  ;;  %v3889_v37 = vpop.f32.mrb[19].mxu1 }
 0x4ae   :  { %v3353_v38 = vadd.f32 %v3887_v32, %v3312_v20  ;;  %v3890_v39 = vadd.f32 %v3889_v37, %v3888_v34  ;;  %v3911_v41 = vpop.f32.mrb[23].mxu0 }
 0x4af   :  { %v3912_v42 = vadd.f32 %v3911_v41, %v3910_v36 }
 0x4b0   :  { %v3394_v43 = vadd.f32 %v3909_v35, %v3353_v38  ;;  %v3356_v44 = vadd.f32 %v3890_v39, %v3315_v24 }
 0x4b2   :  { %4145 = vtanh.f32 %v3394_v43  ;;  %v3397_v45 = vadd.f32 %v3912_v42, %v3356_v44 }
 0x4b4   :  { %4147 = vtanh.f32 %v3397_v45 }
 0x4bc   :  { %v4146_v46 = vpop.eup %4145 }
 0x4bd   :  { %3402 = vst [vmem:[#allocation11] sm:$0xff] %v4146_v46 }
 0x4be   :  { %v4148_v47 = vpop.eup %4147 }
 0x4bf   :  { %3403 = vst [vmem:[#allocation11 + $0x8] sm:$0xff] %v4148_v47 }
 0x4c0   :  { %4270 = shalt.err (!%p4267_p2)
}
 0x4c1   :  { %s4271_s16 = scalar_lea.hbm %s4521_s9, 256 }
 0x4c2   :  { %p4272_p3 = scmp.ne.s32.totalorder %s4521_s9, %s4271_s16  ;;  %p4275_p4 = scmp.lt.u32.totalorder %s4271_s16, %s4521_s9 }
 0x4c4   :  { %p4277_p5 = pnand %p4275_p4, %p4272_p3 }
 0x4c6   :  { %4280 = shalt.err (!%p4277_p5)
}
 0x4c7   :  { %3415 = dma.vmem_to_hbm [thread:$0]  %s3410_s15, 256, %s4521_s9, [#allocation4], %s4290_s19, %s4290_s19, %s4291_s20  }
 0x4c8   :  { %4287 = dma.done.wait [#allocation4], 256  }
 0x4c9   :  { %4288 = vsyncadd [#allocation4], 4294967040 }
 0x4ca   :  { %3419 = vsyncpa [#allocation3], 1 }
 0x4cb   :  { %3420 = vsyncpa [#allocation6], 1 }
 0x4cc   :  { %3421 = vsyncpa [#allocation9], 1 }
 0x4cd   :  { %3422 = vsyncpa [#allocation4], 1 }

// kernel: tpu_custom_call.1
= control target key start
LH: loop header
LB: loop body
LE: loop exit
PB: predicated region body
PF: predicated region fallthrough
CT: control target
= control target key end

     0   :  { %14 = vsyncpa [#allocation3], 0  ;;  %s4512_s0 = inlined_call_operand.hbm [shape: bf16[16,128], index: 0, kind: input, shape index: {}]   ;;  %s4513_s1 = inlined_call_operand.hbm [shape: bf16[128,256], index: 1, kind: input, shape index: {}]   ;;  %s4514_s2 = inlined_call_operand.vmem [shape: f32[1,256], index: 2, kind: input, shape index: {}]   ;;  %s4515_s3 = inlined_call_operand.hbm [shape: bf16[256,512], index: 3, kind: input, shape index: {}]   ;;  %s4516_s4 = inlined_call_operand.vmem [shape: f32[1,512], index: 4, kind: input, shape index: {}]   ;;  %s4517_s5 = inlined_call_operand.hbm [shape: bf16[512,1024], index: 5, kind: input, shape index: {}]   ;;  %s4518_s6 = inlined_call_operand.vmem [shape: f32[1,1024], index: 6, kind: input, shape index: {}]   ;;  %s4519_s7 = inlined_call_operand.hbm [shape: bf16[1024,128], index: 7, kind: input, shape index: {}]   ;;  %s4520_s8 = inlined_call_operand.vmem [shape: f32[1,128], index: 8, kind: input, shape index: {}]   ;;  %s4521_s9 = inlined_call_operand.hbm [shape: f32[16,128], index: 9, kind: output, shape index: {}]  }
   0x1   :  { %15 = vsyncpa [#allocation6], 0 }
   0x2   :  { %16 = vsyncpa [#allocation9], 0 }
   0x3   :  { %17 = vsyncpa [#allocation4], 0  ;;  %s4289_s30 = smov [#allocation5]   ;;  %s4149_s13 = scalar_lea.hbm %s4513_s1, 2048 }
   0x4   :  { %s35_s10 = sshll.u32 %s4289_s30, 4  ;;  %p4150_p0 = scmp.ne.s32.totalorder %s4513_s1, %s4149_s13  ;;  %s36_s10 = int_to_ptr.vmem [resolvable:$true] %s35_s10 }
   0x5   :  { %p4153_p1 = scmp.lt.u32.totalorder %s4149_s13, %s4513_s1 }
   0x7   :  { %p4155_p2 = pnand %p4153_p1, %p4150_p0 }
   0x9   :  { %4158 = shalt.err (!%p4155_p2)
}
   0xa   :  { %s4159_s18 = scalar_lea.vmem %s36_s10, 2048  ;;  %p4164_p4 = scmp.lt.s32.totalorder %s36_s10, %s36_s10 }
   0xb   :  { %p4160_p3 = scmp.ne.s32.totalorder %s36_s10, %s4159_s18  ;;  %p4165_p5 = scmp.lt.s32.totalorder %s4159_s18, %s4159_s18 }
   0xd   :  { %p4166_p6 = por %p4165_p5, %p4164_p4 }
   0xf   :  { %p4167_p7 = pnand %p4166_p6, %p4160_p3 }
  0x11   :  { %4170 = shalt.err (!%p4167_p7)
}
  0x12   :  { %s4290_s19 = smov 128   ;;  %s4291_s20 = smov 8  }
  0x13   :  { %41 = dma.hbm_to_vmem [thread:$0]  %s4513_s1, 2048, %s36_s10, [#allocation6], %s4290_s19, %s4290_s19, %s4291_s20  }
  0x14   :  { %s4292_s23 = smov [#allocation8]   ;;  %s4171_s27 = scalar_lea.hbm %s4517_s5, 32768 }
  0x15   :  { %s63_s24 = sshll.u32 %s4292_s23, 4  ;;  %p4172_p8 = scmp.ne.s32.totalorder %s4517_s5, %s4171_s27  ;;  %s64_s24 = int_to_ptr.vmem [resolvable:$true] %s63_s24 }
  0x16   :  { %p4175_p9 = scmp.lt.u32.totalorder %s4171_s27, %s4517_s5 }
  0x18   :  { %p4177_p10 = pnand %p4175_p9, %p4172_p8 }
  0x1a   :  { %4180 = shalt.err (!%p4177_p10)
}
  0x1b   :  { %s4181_s12 = scalar_lea.vmem %s64_s24, 32768  ;;  %p4186_p12 = scmp.lt.s32.totalorder %s64_s24, %s64_s24 }
  0x1c   :  { %p4182_p11 = scmp.ne.s32.totalorder %s64_s24, %s4181_s12  ;;  %p4187_p13 = scmp.lt.s32.totalorder %s4181_s12, %s4181_s12 }
  0x1e   :  { %p4188_p0 = por %p4187_p13, %p4186_p12 }
  0x20   :  { %p4189_p1 = pnand %p4188_p0, %p4182_p11 }
  0x22   :  { %4192 = shalt.err (!%p4189_p1)
}
  0x23   :  { %s4293_s1 = smov 512   ;;  %s4294_s10 = smov 32  }
  0x24   :  { %69 = dma.hbm_to_vmem [thread:$0]  %s4517_s5, 32768, %s64_s24, [#allocation9], %s4293_s1, %s4293_s1, %s4294_s10  }
  0x25   :  { %s4295_s15 = smov [#allocation2]   ;;  %s4193_s21 = scalar_lea.hbm %s4512_s0, 128 }
  0x26   :  { %s23_s16 = sshll.u32 %s4295_s15, 4  ;;  %p4194_p2 = scmp.ne.s32.totalorder %s4512_s0, %s4193_s21  ;;  %s24_s16 = int_to_ptr.vmem [resolvable:$true] %s23_s16 }
  0x27   :  { %p4197_p3 = scmp.lt.u32.totalorder %s4193_s21, %s4512_s0 }
  0x29   :  { %p4199_p4 = pnand %p4197_p3, %p4194_p2 }
  0x2b   :  { %4202 = shalt.err (!%p4199_p4)
}
  0x2c   :  { %s4203_s27 = scalar_lea.vmem %s24_s16, 128  ;;  %p4208_p6 = scmp.lt.s32.totalorder %s24_s16, %s24_s16 }
  0x2d   :  { %p4204_p5 = scmp.ne.s32.totalorder %s24_s16, %s4203_s27  ;;  %p4209_p7 = scmp.lt.s32.totalorder %s4203_s27, %s4203_s27 }
  0x2f   :  { %p4210_p8 = por %p4209_p7, %p4208_p6 }
  0x31   :  { %p4211_p9 = pnand %p4210_p8, %p4204_p5 }
  0x33   :  { %4214 = shalt.err (!%p4211_p9)
}
  0x34   :  { %s4296_s5 = smov 64   ;;  %s4297_s24 = smov 4  }
  0x35   :  { %29 = dma.hbm_to_vmem [thread:$0]  %s4512_s0, 128, %s24_s16, [#allocation3], %s4296_s5, %s4296_s5, %s4297_s24  }
  0x36   :  { %s4298_s30 = smov [#allocation7]   ;;  %s4215_s10 = scalar_lea.hbm %s4515_s3, 8192 }
  0x37   :  { %s49_s11 = sshll.u32 %s4298_s30, 4  ;;  %p4216_p10 = scmp.ne.s32.totalorder %s4515_s3, %s4215_s10  ;;  %s50_s11 = int_to_ptr.vmem [resolvable:$true] %s49_s11 }
  0x38   :  { %p4219_p11 = scmp.lt.u32.totalorder %s4215_s10, %s4515_s3 }
  0x3a   :  { %p4221_p12 = pnand %p4219_p11, %p4216_p10 }
  0x3c   :  { %4224 = shalt.err (!%p4221_p12)
}
  0x3d   :  { %s4225_s18 = scalar_lea.vmem %s50_s11, 8192  ;;  %p4230_p0 = scmp.lt.s32.totalorder %s50_s11, %s50_s11 }
  0x3e   :  { %p4226_p13 = scmp.ne.s32.totalorder %s50_s11, %s4225_s18  ;;  %p4231_p1 = scmp.lt.s32.totalorder %s4225_s18, %s4225_s18 }
  0x40   :  { %p4232_p2 = por %p4231_p1, %p4230_p0 }
  0x42   :  { %p4233_p3 = pnand %p4232_p2, %p4226_p13 }
  0x44   :  { %4236 = shalt.err (!%p4233_p3)
}
  0x45   :  { %s4299_s0 = smov 256   ;;  %s4300_s16 = smov 16  }
  0x46   :  { %55 = dma.hbm_to_vmem [thread:$0]  %s4515_s3, 8192, %s50_s11, [#allocation6], %s4299_s0, %s4299_s0, %s4300_s16  }
  0x47   :  { %s4301_s23 = smov [#allocation10]   ;;  %s4237_s28 = scalar_lea.hbm %s4519_s7, 8192 }
  0x48   :  { %s77_s25 = sshll.u32 %s4301_s23, 4  ;;  %p4238_p4 = scmp.ne.s32.totalorder %s4519_s7, %s4237_s28  ;;  %s78_s25 = int_to_ptr.vmem [resolvable:$true] %s77_s25 }
  0x49   :  { %p4241_p5 = scmp.lt.u32.totalorder %s4237_s28, %s4519_s7 }
  0x4b   :  { %p4243_p6 = pnand %p4241_p5, %p4238_p4 }
  0x4d   :  { %4246 = shalt.err (!%p4243_p6)
}
  0x4e   :  { %s4247_s10 = scalar_lea.vmem %s78_s25, 8192  ;;  %p4252_p8 = scmp.lt.s32.totalorder %s78_s25, %s78_s25 }
  0x4f   :  { %p4248_p7 = scmp.ne.s32.totalorder %s78_s25, %s4247_s10  ;;  %p4253_p9 = scmp.lt.s32.totalorder %s4247_s10, %s4247_s10 }
  0x51   :  { %p4254_p10 = por %p4253_p9, %p4252_p8 }
  0x53   :  { %p4255_p11 = pnand %p4254_p10, %p4248_p7 }
  0x55   :  { %4258 = shalt.err (!%p4255_p11)
}
  0x56   :  { %83 = dma.hbm_to_vmem [thread:$0]  %s4519_s7, 8192, %s78_s25, [#allocation9], %s4296_s5, %s4296_s5, %s4297_s24  }
  0x57   :  { %4281 = dma.done.wait [#allocation3], 128  }
  0x58   :  { %4282 = vsyncadd [#allocation3], 4294967168 }
  0x59   :  { %4283 = dma.done.wait [#allocation6], 10240  }
  0x5a   :  { %4284 = vsyncadd [#allocation6], 4294957056 }
  0x5b   :  { %4285 = dma.done.wait [#allocation9], 40960  }
  0x5c   :  { %4286 = vsyncadd [#allocation9], 4294926336  ;;  %v4302_v0 = vmov 0   ;;  %v3960_v1 = vld [vmem:[#allocation5 + $0x4] ss:$8 sps:$4 sm:$0xff]   ;;  %v3984_v29 = vld [vmem:[#allocation2] sm:$0xff]  }
  0x5d   :  { %250 = vmatprep.mubr.bf16.mxu0 %v4302_v0  ;;  %v3962_v2 = vld [vmem:[#allocation5] ss:$8 sps:$4 sm:$0xff]   ;;  %218 = vmatprep.subr.bf16.mxu0 %v3960_v1  ;;  %v3963_v3 = vld [vmem:[#allocation5 + $0x14] ss:$8 sps:$4 sm:$0xff]   ;;  %v3965_v4 = vld [vmem:[#allocation5 + $0x10] ss:$8 sps:$4 sm:$0xff]  }
  0x5e   :  { %219 = vmatpush1.bf16.msra.mxu0 %v3962_v2  ;;  %v3966_v5 = vld [vmem:[#allocation5 + $0x24] ss:$8 sps:$4 sm:$0xff]   ;;  %v3968_v6 = vld [vmem:[#allocation5 + $0x20] ss:$8 sps:$4 sm:$0xff]   ;;  %v3969_v7 = vld [vmem:[#allocation5 + $0x34] ss:$8 sps:$4 sm:$0xff]  }
  0x5f   :  { %220 = vmatprep.subr.bf16.mxu0 %v3963_v3  ;;  %v3971_v8 = vld [vmem:[#allocation5 + $0x30] ss:$8 sps:$4 sm:$0xff]   ;;  %v3972_v9 = vld [vmem:[#allocation5 + $0x44] ss:$8 sps:$4 sm:$0xff]   ;;  %v3974_v11 = vld [vmem:[#allocation5 + $0x40] ss:$8 sps:$4 sm:$0xff]  }
  0x60   :  { %v3985_v10 = vld [vmem:[#allocation7 + $0x4] ss:$16 sps:$4 sm:$0xff]   ;;  %v3990_v12 = vld [vmem:[#allocation7] ss:$16 sps:$4 sm:$0xff]   ;;  %v3989_v26 = vld [vmem:[#allocation7 + $0xc] ss:$16 sps:$4 sm:$0xff]  }
  0x61   :  { %673 = vmatprep.subr.bf16.mxu1 %v3985_v10  ;;  %v3991_v13 = vld [vmem:[#allocation7 + $0x24] ss:$16 sps:$4 sm:$0xff]   ;;  %v3996_v15 = vld [vmem:[#allocation7 + $0x20] ss:$16 sps:$4 sm:$0xff]   ;;  %v3987_v30 = vld [vmem:[#allocation7 + $0x8] ss:$16 sps:$4 sm:$0xff]  }
  0x62   :  { %221 = vmatpush1.bf16.msra.mxu0 %v3965_v4  ;;  %v3975_v14 = vld [vmem:[#allocation5 + $0x54] ss:$8 sps:$4 sm:$0xff]   ;;  %674 = vmatpush1.bf16.msra.mxu1 %v3990_v12  ;;  %v3977_v17 = vld [vmem:[#allocation5 + $0x50] ss:$8 sps:$4 sm:$0xff]   ;;  %v3978_v18 = vld [vmem:[#allocation5 + $0x64] ss:$8 sps:$4 sm:$0xff]  }
  0x63   :  { %222 = vmatprep.subr.bf16.mxu0 %v3966_v5  ;;  %675 = vmatprep.subr.bf16.mxu1 %v3991_v13  ;;  %v3997_v16 = vld [vmem:[#allocation7 + $0x44] ss:$16 sps:$4 sm:$0xff]   ;;  %v4002_v19 = vld [vmem:[#allocation7 + $0x40] ss:$16 sps:$4 sm:$0xff]   ;;  %v3995_v31 = vld [vmem:[#allocation7 + $0x2c] ss:$16 sps:$4 sm:$0xff]  }
  0x64   :  { %v4003_v20 = vld [vmem:[#allocation7 + $0x64] ss:$16 sps:$4 sm:$0xff]   ;;  %v3980_v21 = vld [vmem:[#allocation5 + $0x60] ss:$8 sps:$4 sm:$0xff]   ;;  %v3983_v25 = vld [vmem:[#allocation5 + $0x70] ss:$8 sps:$4 sm:$0xff]  }
  0x65   :  { %v3981_v22 = vld [vmem:[#allocation5 + $0x74] ss:$8 sps:$4 sm:$0xff]   ;;  %v4008_v23 = vld [vmem:[#allocation7 + $0x60] ss:$16 sps:$4 sm:$0xff]   ;;  %v3993_v34 = vld [vmem:[#allocation7 + $0x28] ss:$16 sps:$4 sm:$0xff]  }
  0x66   :  { %223 = vmatpush1.bf16.msra.mxu0 %v3968_v6  ;;  %676 = vmatpush1.bf16.msra.mxu1 %v3996_v15  ;;  %v4009_v24 = vld [vmem:[#allocation7 + $0x84] ss:$16 sps:$4 sm:$0xff]   ;;  %v4014_v27 = vld [vmem:[#allocation7 + $0x80] ss:$16 sps:$4 sm:$0xff]   ;;  %v4001_v35 = vld [vmem:[#allocation7 + $0x4c] ss:$16 sps:$4 sm:$0xff]  }
  0x67   :  { %224 = vmatprep.subr.bf16.mxu0 %v3969_v7  ;;  %677 = vmatprep.subr.bf16.mxu1 %v3997_v16  ;;  %v4015_v28 = vld [vmem:[#allocation7 + $0xa4] ss:$16 sps:$4 sm:$0xff]   ;;  %v4020_v32 = vld [vmem:[#allocation7 + $0xa0] ss:$16 sps:$4 sm:$0xff]   ;;  %v3999_v38 = vld [vmem:[#allocation7 + $0x48] ss:$16 sps:$4 sm:$0xff]  }
  0x68   :  { %v4021_v33 = vld [vmem:[#allocation7 + $0xc4] ss:$16 sps:$4 sm:$0xff]   ;;  %v4026_v36 = vld [vmem:[#allocation7 + $0xc0] ss:$16 sps:$4 sm:$0xff]   ;;  %v4007_v39 = vld [vmem:[#allocation7 + $0x6c] ss:$16 sps:$4 sm:$0xff]  }
  0x69   :  { %v4027_v37 = vld [vmem:[#allocation7 + $0xe4] ss:$16 sps:$4 sm:$0xff]   ;;  %v4032_v40 = vld [vmem:[#allocation7 + $0xe0] ss:$16 sps:$4 sm:$0xff]   ;;  %v4005_v42 = vld [vmem:[#allocation7 + $0x68] ss:$16 sps:$4 sm:$0xff]  }
  0x6a   :  { %225 = vmatpush1.bf16.msra.mxu0 %v3971_v8  ;;  %678 = vmatpush1.bf16.msra.mxu1 %v4002_v19  ;;  %v4033_v41 = vld [vmem:[#allocation7 + $0x104] ss:$16 sps:$4 sm:$0xff]   ;;  %v4013_v43 = vld [vmem:[#allocation7 + $0x8c] ss:$16 sps:$4 sm:$0xff]   ;;  %v4038_v44 = vld [vmem:[#allocation7 + $0x100] ss:$16 sps:$4 sm:$0xff]  }
  0x6b   :  { %226 = vmatprep.subr.bf16.mxu0 %v3972_v9  ;;  %679 = vmatprep.subr.bf16.mxu1 %v4003_v20  ;;  %v4039_v45 = vld [vmem:[#allocation7 + $0x124] ss:$16 sps:$4 sm:$0xff]   ;;  %v4011_v46 = vld [vmem:[#allocation7 + $0x88] ss:$16 sps:$4 sm:$0xff]   ;;  %v4019_v47 = vld [vmem:[#allocation7 + $0xac] ss:$16 sps:$4 sm:$0xff]  }
  0x6c   :  { %v4044_v48 = vld [vmem:[#allocation7 + $0x120] ss:$16 sps:$4 sm:$0xff]   ;;  %v4045_v49 = vld [vmem:[#allocation7 + $0x144] ss:$16 sps:$4 sm:$0xff]   ;;  %v4017_v50 = vld [vmem:[#allocation7 + $0xa8] ss:$16 sps:$4 sm:$0xff]  }
  0x6d   :  { %v4025_v51 = vld [vmem:[#allocation7 + $0xcc] ss:$16 sps:$4 sm:$0xff]   ;;  %v4050_v52 = vld [vmem:[#allocation7 + $0x140] ss:$16 sps:$4 sm:$0xff]   ;;  %v4051_v53 = vld [vmem:[#allocation7 + $0x164] ss:$16 sps:$4 sm:$0xff]  }
  0x6e   :  { %227 = vmatpush1.bf16.msra.mxu0 %v3974_v11  ;;  %680 = vmatpush1.bf16.msra.mxu1 %v4008_v23  ;;  %v4023_v54 = vld [vmem:[#allocation7 + $0xc8] ss:$16 sps:$4 sm:$0xff]   ;;  %v4031_v55 = vld [vmem:[#allocation7 + $0xec] ss:$16 sps:$4 sm:$0xff]   ;;  %v4056_v56 = vld [vmem:[#allocation7 + $0x160] ss:$16 sps:$4 sm:$0xff]  }
  0x6f   :  { %228 = vmatprep.subr.bf16.mxu0 %v3975_v14  ;;  %681 = vmatprep.subr.bf16.mxu1 %v4009_v24  ;;  %v4057_v57 = vld [vmem:[#allocation7 + $0x184] ss:$16 sps:$4 sm:$0xff]   ;;  %v4029_v58 = vld [vmem:[#allocation7 + $0xe8] ss:$16 sps:$4 sm:$0xff]   ;;  %v4037_v59 = vld [vmem:[#allocation7 + $0x10c] ss:$16 sps:$4 sm:$0xff]  }
  0x70   :  { %v4062_v60 = vld [vmem:[#allocation7 + $0x180] ss:$16 sps:$4 sm:$0xff]   ;;  %v4063_v61 = vld [vmem:[#allocation7 + $0x1a4] ss:$16 sps:$4 sm:$0xff]   ;;  %v4035_v62 = vld [vmem:[#allocation7 + $0x108] ss:$16 sps:$4 sm:$0xff]  }
  0x71   :  { %v4043_v63 = vld [vmem:[#allocation7 + $0x12c] ss:$16 sps:$4 sm:$0xff]   ;;  %v4041_v0 = vld [vmem:[#allocation7 + $0x128] ss:$16 sps:$4 sm:$0xff]   ;;  %v4068_v9 = vld [vmem:[#allocation7 + $0x1a0] ss:$16 sps:$4 sm:$0xff]  }
  0x72   :  { %229 = vmatpush1.bf16.msra.mxu0 %v3977_v17  ;;  %682 = vmatpush1.bf16.msra.mxu1 %v4014_v27  ;;  %v4049_v1 = vld [vmem:[#allocation7 + $0x14c] ss:$16 sps:$4 sm:$0xff]   ;;  %v4047_v2 = vld [vmem:[#allocation7 + $0x148] ss:$16 sps:$4 sm:$0xff]   ;;  %v4069_v10 = vld [vmem:[#allocation7 + $0x1c4] ss:$16 sps:$4 sm:$0xff]  }
  0x73   :  { %230 = vmatprep.subr.bf16.mxu0 %v3978_v18  ;;  %683 = vmatprep.subr.bf16.mxu1 %v4015_v28  ;;  %v4055_v3 = vld [vmem:[#allocation7 + $0x16c] ss:$16 sps:$4 sm:$0xff]   ;;  %v4053_v4 = vld [vmem:[#allocation7 + $0x168] ss:$16 sps:$4 sm:$0xff]   ;;  %v4074_v13 = vld [vmem:[#allocation7 + $0x1c0] ss:$16 sps:$4 sm:$0xff]  }
  0x74   :  { %v4061_v5 = vld [vmem:[#allocation7 + $0x18c] ss:$16 sps:$4 sm:$0xff]   ;;  %v4059_v6 = vld [vmem:[#allocation7 + $0x188] ss:$16 sps:$4 sm:$0xff]   ;;  %v4075_v14 = vld [vmem:[#allocation7 + $0x1e4] ss:$16 sps:$4 sm:$0xff]  }
  0x75   :  { %v4067_v7 = vld [vmem:[#allocation7 + $0x1ac] ss:$16 sps:$4 sm:$0xff]   ;;  %v4065_v8 = vld [vmem:[#allocation7 + $0x1a8] ss:$16 sps:$4 sm:$0xff]   ;;  %v4080_v17 = vld [vmem:[#allocation7 + $0x1e0] ss:$16 sps:$4 sm:$0xff]  }
  0x76   :  { %231 = vmatpush1.bf16.msra.mxu0 %v3980_v21  ;;  %684 = vmatpush1.bf16.msra.mxu1 %v4020_v32  ;;  %v4073_v11 = vld [vmem:[#allocation7 + $0x1cc] ss:$16 sps:$4 sm:$0xff]   ;;  %v4071_v12 = vld [vmem:[#allocation7 + $0x1c8] ss:$16 sps:$4 sm:$0xff]   ;;  %v771_v18 = vld [vmem:[#allocation8] sm:$0xff] }
  0x77   :  { %232 = vmatprep.subr.bf16.mxu0 %v3981_v22  ;;  %685 = vmatprep.subr.bf16.mxu1 %v4021_v33  ;;  %v4079_v15 = vld [vmem:[#allocation7 + $0x1ec] ss:$16 sps:$4 sm:$0xff]   ;;  %v4077_v16 = vld [vmem:[#allocation7 + $0x1e8] ss:$16 sps:$4 sm:$0xff]   ;;  %v775_v19 = vld [vmem:[#allocation8 + $0x20] sm:$0xff] }
  0x78   :  { %v772_v20 = vld [vmem:[#allocation8 + $0x8] sm:$0xff]  ;;  %v3504_v21 = vcombine.low %v771_v18, %v775_v19  ;;  %v3505_v22 = vcombine.high %v771_v18, %v775_v19 }
  0x79   :  { %v776_v23 = vld [vmem:[#allocation8 + $0x28] sm:$0xff] }
  0x7a   :  { %233 = vmatpush1.bf16.msra.mxu0 %v3983_v25  ;;  %686 = vmatpush1.bf16.msra.mxu1 %v4026_v36  ;;  %v3506_v24 = vcombine.low %v772_v20, %v776_v23  ;;  %v3507_v25 = vcombine.high %v772_v20, %v776_v23  ;;  %v820_v23 = vld [vmem:[#allocation8 + $0x188] sm:$0xff] }
  0x7b   :  { %716 = vmatprep.subr.bf16.mxu0 %v3989_v26  ;;  %687 = vmatprep.subr.bf16.mxu1 %v4027_v37  ;;  %v122_v26 = vlaneseq }
  0x7d   :  { %251 = vmatmul.mubr.bf16.vlgmr.msra.gmra.mrb[0].mxu0 %v3984_v29  ;;  %v4423_v27 = vshrl.u32 %v122_v26, 7  ;;  %v120_v29 = vld [vmem:[%s4514_s2] sm:$0x3] }
  0x7e   :  { %717 = vmatpush1.bf16.msra.mxu0 %v3987_v30  ;;  %688 = vmatpush1.bf16.msra.mxu1 %v4032_v40 }
  0x7f   :  { %718 = vmatprep.subr.bf16.mxu0 %v3995_v31  ;;  %689 = vmatprep.subr.bf16.mxu1 %v4033_v41  ;;  %v4426_v28 = vsub.s32 0, %v4423_v27  ;;  %v4432_v30 = vsub.s32 1, %v4423_v27 }
  0x81   :  { %v125_v31 = vrot.slane %v120_v29, %v4426_v28  ;;  %v129_v32 = vrot.slane %v120_v29, %v4432_v30 }
  0x82   :  { %719 = vmatpush1.bf16.msra.mxu0 %v3993_v34  ;;  %690 = vmatpush1.bf16.msra.mxu1 %v4038_v44 }
  0x83   :  { %720 = vmatprep.subr.bf16.mxu0 %v4001_v35  ;;  %691 = vmatprep.subr.bf16.mxu1 %v4039_v45 }
  0x86   :  { %721 = vmatpush1.bf16.msra.mxu0 %v3999_v38  ;;  %692 = vmatpush1.bf16.msra.mxu1 %v4044_v48  ;;  %v784_v48 = vld [vmem:[#allocation8 + $0x68] sm:$0xff] }
  0x87   :  { %722 = vmatprep.subr.bf16.mxu0 %v4007_v39  ;;  %693 = vmatprep.subr.bf16.mxu1 %v4045_v49 }
  0x8a   :  { %723 = vmatpush1.bf16.msra.mxu0 %v4005_v42  ;;  %694 = vmatpush1.bf16.msra.mxu1 %v4050_v52 }
  0x8b   :  { %724 = vmatprep.subr.bf16.mxu0 %v4013_v43  ;;  %695 = vmatprep.subr.bf16.mxu1 %v4051_v53  ;;  %v779_v43 = vld [vmem:[#allocation8 + $0x40] sm:$0xff] }
  0x8c   :  { %v787_v53 = vld [vmem:[#allocation8 + $0x80] sm:$0xff] }
  0x8e   :  { %725 = vmatpush1.bf16.msra.mxu0 %v4011_v46  ;;  %696 = vmatpush1.bf16.msra.mxu1 %v4056_v56  ;;  %v783_v46 = vld [vmem:[#allocation8 + $0x60] sm:$0xff]  ;;  %v792_v56 = vld [vmem:[#allocation8 + $0xa8] sm:$0xff] }
  0x8f   :  { %726 = vmatprep.subr.bf16.mxu0 %v4019_v47  ;;  %697 = vmatprep.subr.bf16.mxu1 %v4057_v57  ;;  %v780_v47 = vld [vmem:[#allocation8 + $0x48] sm:$0xff]  ;;  %v3512_v57 = vcombine.low %v779_v43, %v783_v46 }
  0x90   :  { %v3515_v52 = vcombine.high %v780_v47, %v784_v48 }
  0x92   :  { %727 = vmatpush1.bf16.msra.mxu0 %v4017_v50  ;;  %698 = vmatpush1.bf16.msra.mxu1 %v4062_v60 }
  0x93   :  { %728 = vmatprep.subr.bf16.mxu0 %v4025_v51  ;;  %699 = vmatprep.subr.bf16.mxu1 %v4063_v61  ;;  %v3513_v51 = vcombine.high %v779_v43, %v783_v46  ;;  %v795_v61 = vld [vmem:[#allocation8 + $0xc0] sm:$0xff]  ;;  %v840_v43 = vld [vmem:[#allocation8 + $0x228] sm:$0xff] }
  0x96   :  { %729 = vmatpush1.bf16.msra.mxu0 %v4023_v54  ;;  %700 = vmatpush1.bf16.msra.mxu1 %v4068_v9  ;;  %v791_v54 = vld [vmem:[#allocation8 + $0xa0] sm:$0xff] }
  0x97   :  { %730 = vmatprep.subr.bf16.mxu0 %v4031_v55  ;;  %701 = vmatprep.subr.bf16.mxu1 %v4069_v10  ;;  %v788_v55 = vld [vmem:[#allocation8 + $0x88] sm:$0xff] }
  0x98   :  { %v3523_v60 = vcombine.high %v788_v55, %v792_v56 }
  0x9a   :  { %731 = vmatpush1.bf16.msra.mxu0 %v4029_v58  ;;  %702 = vmatpush1.bf16.msra.mxu1 %v4074_v13  ;;  %v3514_v58 = vcombine.low %v780_v47, %v784_v48  ;;  %v811_v13 = vld [vmem:[#allocation8 + $0x140] sm:$0xff] }
  0x9b   :  { %732 = vmatprep.subr.bf16.mxu0 %v4037_v59  ;;  %703 = vmatprep.subr.bf16.mxu1 %v4075_v14  ;;  %v3521_v59 = vcombine.high %v787_v53, %v791_v54  ;;  %v815_v14 = vld [vmem:[#allocation8 + $0x160] sm:$0xff] }
  0x9c   :  { %v3545_v19 = vcombine.high %v811_v13, %v815_v14  ;;  %v843_v48 = vld [vmem:[#allocation8 + $0x240] sm:$0xff] }
  0x9e   :  { %733 = vmatpush1.bf16.msra.mxu0 %v4035_v62  ;;  %704 = vmatpush1.bf16.msra.mxu1 %v4080_v17  ;;  %v799_v62 = vld [vmem:[#allocation8 + $0xe0] sm:$0xff] }
  0x9f   :  { %734 = vmatprep.subr.bf16.mxu0 %v4043_v63  ;;  %2349 = vmatprep.subr.bf16.mxu1 %v3505_v22  ;;  %v796_v63 = vld [vmem:[#allocation8 + $0xc8] sm:$0xff]  ;;  %v3528_v9 = vcombine.low %v795_v61, %v799_v62  ;;  %v823_v22 = vld [vmem:[#allocation8 + $0x1a0] sm:$0xff] }
  0xa2   :  { %735 = vmatpush1.bf16.msra.mxu0 %v4041_v0  ;;  %v800_v0 = vld [vmem:[#allocation8 + $0xe8] sm:$0xff] }
  0xa3   :  { %736 = vmatprep.subr.bf16.mxu0 %v4049_v1  ;;  %v3520_v1 = vcombine.low %v787_v53, %v791_v54  ;;  %v3530_v10 = vcombine.low %v796_v63, %v800_v0 }
  0xa6   :  { %737 = vmatpush1.bf16.msra.mxu0 %v4047_v2  ;;  %v3522_v2 = vcombine.low %v788_v55, %v792_v56  ;;  %v851_v56 = vld [vmem:[#allocation8 + $0x280] sm:$0xff] }
  0xa7   :  { %738 = vmatprep.subr.bf16.mxu0 %v4055_v3  ;;  %v3529_v3 = vcombine.high %v795_v61, %v799_v62 }
  0xaa   :  { %739 = vmatpush1.bf16.msra.mxu0 %v4053_v4  ;;  %v3531_v4 = vcombine.high %v796_v63, %v800_v0  ;;  %v859_v0 = vld [vmem:[#allocation8 + $0x2c0] sm:$0xff] }
  0xab   :  { %740 = vmatprep.subr.bf16.mxu0 %v4061_v5  ;;  %v803_v5 = vld [vmem:[#allocation8 + $0x100] sm:$0xff] }
  0xae   :  { %741 = vmatpush1.bf16.msra.mxu0 %v4059_v6  ;;  %v807_v6 = vld [vmem:[#allocation8 + $0x120] sm:$0xff] }
  0xaf   :  { %742 = vmatprep.subr.bf16.mxu0 %v4067_v7  ;;  %v804_v7 = vld [vmem:[#allocation8 + $0x108] sm:$0xff]  ;;  %v3536_v17 = vcombine.low %v803_v5, %v807_v6 }
  0xb2   :  { %743 = vmatpush1.bf16.msra.mxu0 %v4065_v8  ;;  %v808_v8 = vld [vmem:[#allocation8 + $0x128] sm:$0xff] }
  0xb3   :  { %744 = vmatprep.subr.bf16.mxu0 %v4073_v11  ;;  %v3537_v11 = vcombine.high %v803_v5, %v807_v6  ;;  %v3538_v18 = vcombine.low %v804_v7, %v808_v8 }
  0xb6   :  { %745 = vmatpush1.bf16.msra.mxu0 %v4071_v12  ;;  %v3539_v12 = vcombine.high %v804_v7, %v808_v8  ;;  %v867_v8 = vld [vmem:[#allocation8 + $0x300] sm:$0xff] }
  0xb7   :  { %746 = vmatprep.subr.bf16.mxu0 %v4079_v15  ;;  %v812_v15 = vld [vmem:[#allocation8 + $0x148] sm:$0xff] }
  0xba   :  { %747 = vmatpush1.bf16.msra.mxu0 %v4077_v16  ;;  %v816_v16 = vld [vmem:[#allocation8 + $0x168] sm:$0xff] }
  0xbb   :  { %2435 = vmatprep.subr.bf16.mxu0 %v3507_v25  ;;  %v3547_v20 = vcombine.high %v812_v15, %v816_v16  ;;  %v3544_v25 = vcombine.low %v811_v13, %v815_v14  ;;  %v3546_v26 = vcombine.low %v812_v15, %v816_v16  ;;  %v875_v16 = vld [vmem:[#allocation8 + $0x340] sm:$0xff] }
 0x150   :  { %v252_v33 = vpop.f32.mrb[0].mxu0 }
 0x151   :  { %v253_v34 = vadd.f32 %v252_v33, %v125_v31  ;;  %v254_v35 = vpop.f32.mrb[1].mxu0  ;;  %v831_v33 = vld [vmem:[#allocation8 + $0x1e0] sm:$0xff] }
 0x152   :  { %v255_v36 = vadd.f32 %v254_v35, %v129_v32  ;;  %v256_v37 = vpop.f32.mrb[2].mxu0  ;;  %v832_v35 = vld [vmem:[#allocation8 + $0x1e8] sm:$0xff] }
 0x153   :  { %v257_v38 = vadd.f32 %v256_v37, %v125_v31  ;;  %v258_v39 = vpop.f32.mrb[3].mxu0  ;;  %v261_v41 = vmax.f32 %v253_v34, 0.0  ;;  %v828_v34 = vld [vmem:[#allocation8 + $0x1c8] sm:$0xff] }
 0x154   :  { %v259_v40 = vadd.f32 %v258_v39, %v129_v32  ;;  %v262_v44 = vmax.f32 %v255_v36, 0.0  ;;  %v827_v32 = vld [vmem:[#allocation8 + $0x1c0] sm:$0xff]  ;;  %v3563_v39 = vcombine.high %v828_v34, %v832_v35 }
 0x155   :  { %v263_v42 = vmax.f32 %v257_v38, 0.0  ;;  %v3561_v38 = vcombine.high %v827_v32, %v831_v33 }
 0x156   :  { %v264_v45 = vmax.f32 %v259_v40, 0.0  ;;  %v835_v40 = vld [vmem:[#allocation8 + $0x200] sm:$0xff] }
 0x157   :  { %v265_v49 = vpack.c.bf16 %v263_v42, %v261_v41  ;;  %v839_v41 = vld [vmem:[#allocation8 + $0x220] sm:$0xff]  ;;  %v836_v42 = vld [vmem:[#allocation8 + $0x208] sm:$0xff] }
 0x158   :  { %v266_v50 = vpack.c.bf16 %v264_v45, %v262_v44  ;;  %v3560_v44 = vcombine.low %v827_v32, %v831_v33  ;;  %v3562_v45 = vcombine.low %v828_v34, %v832_v35  ;;  %v3569_v46 = vcombine.high %v835_v40, %v839_v41  ;;  %v888_v33 = vld [vmem:[#allocation8 + $0x3a8] sm:$0xff] }
 0x159   :  { %v3571_v47 = vcombine.high %v836_v42, %v840_v43  ;;  %v3570_v53 = vcombine.low %v836_v42, %v840_v43 }
 0x15a   :  { %705 = vmatprep.mubr.bf16.mxu1 %v266_v50  ;;  %748 = vmatprep.mubr.bf16.mxu0 %v266_v50  ;;  %v844_v50 = vld [vmem:[#allocation8 + $0x248] sm:$0xff] }
 0x15b   :  { %706 = vmatmul.mubr.bf16.vlgmr.msra.gmra.mrb[0].mxu1 %v265_v49  ;;  %749 = vmatmul.mubr.bf16.vlgmr.msra.gmra.mrb[4].mxu0 %v265_v49  ;;  %v847_v49 = vld [vmem:[#allocation8 + $0x260] sm:$0xff] }
 0x15c   :  { %2350 = vmatpush1.bf16.msra.mxu1 %v3504_v21  ;;  %2436 = vmatpush1.bf16.msra.mxu0 %v3506_v24  ;;  %v819_v21 = vld [vmem:[#allocation8 + $0x180] sm:$0xff]  ;;  %v824_v24 = vld [vmem:[#allocation8 + $0x1a8] sm:$0xff]  ;;  %v3577_v54 = vcombine.high %v843_v48, %v847_v49 }
 0x15d   :  { %2351 = vmatprep.subr.bf16.mxu1 %v3513_v51  ;;  %2437 = vmatprep.subr.bf16.mxu0 %v3515_v52  ;;  %v3553_v29 = vcombine.high %v819_v21, %v823_v22  ;;  %v3555_v31 = vcombine.high %v820_v23, %v824_v24  ;;  %v3552_v36 = vcombine.low %v819_v21, %v823_v22  ;;  %v848_v51 = vld [vmem:[#allocation8 + $0x268] sm:$0xff] }
 0x15e   :  { %v3554_v37 = vcombine.low %v820_v23, %v824_v24  ;;  %v3568_v52 = vcombine.low %v835_v40, %v839_v41  ;;  %v3579_v55 = vcombine.high %v844_v50, %v848_v51  ;;  %v3578_v61 = vcombine.low %v844_v50, %v848_v51  ;;  %v896_v41 = vld [vmem:[#allocation8 + $0x3e8] sm:$0xff] }
 0x160   :  { %2352 = vmatpush1.bf16.msra.mxu1 %v3512_v57  ;;  %2438 = vmatpush1.bf16.msra.mxu0 %v3514_v58  ;;  %v855_v57 = vld [vmem:[#allocation8 + $0x2a0] sm:$0xff]  ;;  %v852_v58 = vld [vmem:[#allocation8 + $0x288] sm:$0xff] }
 0x161   :  { %2353 = vmatprep.subr.bf16.mxu1 %v3521_v59  ;;  %2439 = vmatprep.subr.bf16.mxu0 %v3523_v60  ;;  %v856_v59 = vld [vmem:[#allocation8 + $0x2a8] sm:$0xff]  ;;  %v3576_v60 = vcombine.low %v843_v48, %v847_v49  ;;  %v3585_v62 = vcombine.high %v851_v56, %v855_v57 }
 0x162   :  { %v3587_v63 = vcombine.high %v852_v58, %v856_v59  ;;  %v3586_v5 = vcombine.low %v852_v58, %v856_v59  ;;  %v904_v49 = vld [vmem:[#allocation8 + $0x428] sm:$0xff] }
 0x164   :  { %2354 = vmatpush1.bf16.msra.mxu1 %v3520_v1  ;;  %2440 = vmatpush1.bf16.msra.mxu0 %v3522_v2  ;;  %v863_v1 = vld [vmem:[#allocation8 + $0x2e0] sm:$0xff]  ;;  %v860_v2 = vld [vmem:[#allocation8 + $0x2c8] sm:$0xff] }
 0x165   :  { %2355 = vmatprep.subr.bf16.mxu1 %v3529_v3  ;;  %2441 = vmatprep.subr.bf16.mxu0 %v3531_v4  ;;  %v864_v3 = vld [vmem:[#allocation8 + $0x2e8] sm:$0xff]  ;;  %v3584_v4 = vcombine.low %v851_v56, %v855_v57  ;;  %v3593_v6 = vcombine.high %v859_v0, %v863_v1 }
 0x166   :  { %v3595_v7 = vcombine.high %v860_v2, %v864_v3  ;;  %v3594_v13 = vcombine.low %v860_v2, %v864_v3 }
 0x168   :  { %2356 = vmatpush1.bf16.msra.mxu1 %v3528_v9  ;;  %2442 = vmatpush1.bf16.msra.mxu0 %v3530_v10  ;;  %v871_v9 = vld [vmem:[#allocation8 + $0x320] sm:$0xff]  ;;  %v868_v10 = vld [vmem:[#allocation8 + $0x308] sm:$0xff] }
 0x169   :  { %2357 = vmatprep.subr.bf16.mxu1 %v3537_v11  ;;  %2443 = vmatprep.subr.bf16.mxu0 %v3539_v12  ;;  %v872_v11 = vld [vmem:[#allocation8 + $0x328] sm:$0xff]  ;;  %v3592_v12 = vcombine.low %v859_v0, %v863_v1  ;;  %v3601_v14 = vcombine.high %v867_v8, %v871_v9 }
 0x16a   :  { %v3603_v15 = vcombine.high %v868_v10, %v872_v11  ;;  %v3602_v21 = vcombine.low %v868_v10, %v872_v11 }
 0x16c   :  { %2358 = vmatpush1.bf16.msra.mxu1 %v3536_v17  ;;  %2444 = vmatpush1.bf16.msra.mxu0 %v3538_v18  ;;  %v879_v17 = vld [vmem:[#allocation8 + $0x360] sm:$0xff]  ;;  %v876_v18 = vld [vmem:[#allocation8 + $0x348] sm:$0xff] }
 0x16d   :  { %2359 = vmatprep.subr.bf16.mxu1 %v3545_v19  ;;  %2445 = vmatprep.subr.bf16.mxu0 %v3547_v20  ;;  %v880_v19 = vld [vmem:[#allocation8 + $0x368] sm:$0xff]  ;;  %v3600_v20 = vcombine.low %v867_v8, %v871_v9  ;;  %v3609_v22 = vcombine.high %v875_v16, %v879_v17  ;;  %v3608_v24 = vcombine.low %v875_v16, %v879_v17 }
 0x16e   :  { %v3611_v23 = vcombine.high %v876_v18, %v880_v19 }
 0x170   :  { %2360 = vmatpush1.bf16.msra.mxu1 %v3544_v25  ;;  %2446 = vmatpush1.bf16.msra.mxu0 %v3546_v26  ;;  %v3610_v25 = vcombine.low %v876_v18, %v880_v19  ;;  %v883_v26 = vld [vmem:[#allocation8 + $0x380] sm:$0xff] }
 0x171   :  { %2361 = vmatprep.subr.bf16.mxu1 %v3553_v29  ;;  %2447 = vmatprep.subr.bf16.mxu0 %v3555_v31  ;;  %v887_v29 = vld [vmem:[#allocation8 + $0x3a0] sm:$0xff]  ;;  %v884_v31 = vld [vmem:[#allocation8 + $0x388] sm:$0xff] }
 0x172   :  { %v3617_v32 = vcombine.high %v883_v26, %v887_v29  ;;  %v3616_v34 = vcombine.low %v883_v26, %v887_v29  ;;  %v3618_v35 = vcombine.low %v884_v31, %v888_v33 }
 0x174   :  { %2362 = vmatpush1.bf16.msra.mxu1 %v3552_v36  ;;  %2448 = vmatpush1.bf16.msra.mxu0 %v3554_v37  ;;  %v3619_v36 = vcombine.high %v884_v31, %v888_v33  ;;  %v891_v37 = vld [vmem:[#allocation8 + $0x3c0] sm:$0xff] }
 0x175   :  { %2363 = vmatprep.subr.bf16.mxu1 %v3561_v38  ;;  %2449 = vmatprep.subr.bf16.mxu0 %v3563_v39  ;;  %v895_v38 = vld [vmem:[#allocation8 + $0x3e0] sm:$0xff]  ;;  %v892_v39 = vld [vmem:[#allocation8 + $0x3c8] sm:$0xff] }
 0x176   :  { %v3625_v40 = vcombine.high %v891_v37, %v895_v38  ;;  %v3624_v42 = vcombine.low %v891_v37, %v895_v38  ;;  %v3626_v43 = vcombine.low %v892_v39, %v896_v41  ;;  %v915_v31 = vld [vmem:[#allocation8 + $0x480] sm:$0xff] }
 0x178   :  { %2364 = vmatpush1.bf16.msra.mxu1 %v3560_v44  ;;  %2450 = vmatpush1.bf16.msra.mxu0 %v3562_v45  ;;  %v3627_v44 = vcombine.high %v892_v39, %v896_v41  ;;  %v899_v45 = vld [vmem:[#allocation8 + $0x400] sm:$0xff] }
 0x179   :  { %2365 = vmatprep.subr.bf16.mxu1 %v3569_v46  ;;  %2451 = vmatprep.subr.bf16.mxu0 %v3571_v47  ;;  %v903_v46 = vld [vmem:[#allocation8 + $0x420] sm:$0xff]  ;;  %v900_v47 = vld [vmem:[#allocation8 + $0x408] sm:$0xff] }
 0x17a   :  { %v3633_v48 = vcombine.high %v899_v45, %v903_v46  ;;  %v3632_v50 = vcombine.low %v899_v45, %v903_v46  ;;  %v3634_v51 = vcombine.low %v900_v47, %v904_v49  ;;  %v923_v41 = vld [vmem:[#allocation8 + $0x4c0] sm:$0xff] }
 0x17c   :  { %2366 = vmatpush1.bf16.msra.mxu1 %v3568_v52  ;;  %2452 = vmatpush1.bf16.msra.mxu0 %v3570_v53  ;;  %v3635_v52 = vcombine.high %v900_v47, %v904_v49  ;;  %v343_v53 = vsub.s32 2, %v4423_v27  ;;  %v931_v49 = vld [vmem:[#allocation8 + $0x500] sm:$0xff] }
 0x17d   :  { %2367 = vmatprep.subr.bf16.mxu1 %v3577_v54  ;;  %2453 = vmatprep.subr.bf16.mxu0 %v3579_v55  ;;  %v331_v54 = vld [vmem:[%s4516_s4] sm:$0xf]  ;;  %v347_v55 = vsub.s32 3, %v4423_v27 }
 0x17e   :  { %v336_v56 = vrot.slane %v331_v54, %v4426_v28  ;;  %v344_v57 = vrot.slane %v331_v54, %v343_v53  ;;  %v340_v58 = vrot.slane %v331_v54, %v4432_v30 }
 0x17f   :  { %v348_v59 = vrot.slane %v331_v54, %v347_v55 }
 0x180   :  { %2368 = vmatpush1.bf16.msra.mxu1 %v3576_v60  ;;  %2454 = vmatpush1.bf16.msra.mxu0 %v3578_v61 }
 0x181   :  { %2369 = vmatprep.subr.bf16.mxu1 %v3585_v62  ;;  %2455 = vmatprep.subr.bf16.mxu0 %v3587_v63 }
 0x184   :  { %2370 = vmatpush1.bf16.msra.mxu1 %v3584_v4  ;;  %2456 = vmatpush1.bf16.msra.mxu0 %v3586_v5 }
 0x185   :  { %2371 = vmatprep.subr.bf16.mxu1 %v3593_v6  ;;  %2457 = vmatprep.subr.bf16.mxu0 %v3595_v7 }
 0x188   :  { %2372 = vmatpush1.bf16.msra.mxu1 %v3592_v12  ;;  %2458 = vmatpush1.bf16.msra.mxu0 %v3594_v13 }
 0x189   :  { %2373 = vmatprep.subr.bf16.mxu1 %v3601_v14  ;;  %2459 = vmatprep.subr.bf16.mxu0 %v3603_v15 }
 0x18c   :  { %2374 = vmatpush1.bf16.msra.mxu1 %v3600_v20  ;;  %2460 = vmatpush1.bf16.msra.mxu0 %v3602_v21  ;;  %v907_v20 = vld [vmem:[#allocation8 + $0x440] sm:$0xff] }
 0x18d   :  { %2375 = vmatprep.subr.bf16.mxu1 %v3609_v22  ;;  %2461 = vmatprep.subr.bf16.mxu0 %v3611_v23  ;;  %v911_v23 = vld [vmem:[#allocation8 + $0x460] sm:$0xff] }
 0x18e   :  { %v3640_v37 = vcombine.low %v907_v20, %v911_v23 }
 0x190   :  { %2376 = vmatpush1.bf16.msra.mxu1 %v3608_v24  ;;  %2462 = vmatpush1.bf16.msra.mxu0 %v3610_v25  ;;  %v908_v24 = vld [vmem:[#allocation8 + $0x448] sm:$0xff] }
 0x191   :  { %2377 = vmatprep.subr.bf16.mxu1 %v3617_v32  ;;  %2463 = vmatprep.subr.bf16.mxu0 %v3619_v36  ;;  %v912_v25 = vld [vmem:[#allocation8 + $0x468] sm:$0xff]  ;;  %v3641_v32 = vcombine.high %v907_v20, %v911_v23  ;;  %v967_v20 = vld [vmem:[#allocation8 + $0x620] sm:$0xff] }
 0x192   :  { %v3643_v33 = vcombine.high %v908_v24, %v912_v25  ;;  %v920_v36 = vld [vmem:[#allocation8 + $0x4a8] sm:$0xff]  ;;  %v3642_v38 = vcombine.low %v908_v24, %v912_v25 }
 0x193   :  { %v964_v23 = vld [vmem:[#allocation8 + $0x608] sm:$0xff] }
 0x194   :  { %2378 = vmatpush1.bf16.msra.mxu1 %v3616_v34  ;;  %2464 = vmatpush1.bf16.msra.mxu0 %v3618_v35  ;;  %v919_v34 = vld [vmem:[#allocation8 + $0x4a0] sm:$0xff]  ;;  %v916_v35 = vld [vmem:[#allocation8 + $0x488] sm:$0xff] }
 0x195   :  { %2379 = vmatprep.subr.bf16.mxu1 %v3625_v40  ;;  %2465 = vmatprep.subr.bf16.mxu0 %v3627_v44  ;;  %v3649_v39 = vcombine.high %v915_v31, %v919_v34  ;;  %v3651_v40 = vcombine.high %v916_v35, %v920_v36  ;;  %v928_v44 = vld [vmem:[#allocation8 + $0x4e8] sm:$0xff]  ;;  %v3648_v45 = vcombine.low %v915_v31, %v919_v34  ;;  %v971_v34 = vld [vmem:[#allocation8 + $0x640] sm:$0xff] }
 0x196   :  { %v3650_v46 = vcombine.low %v916_v35, %v920_v36  ;;  %v968_v24 = vld [vmem:[#allocation8 + $0x628] sm:$0xff]  ;;  %v975_v35 = vld [vmem:[#allocation8 + $0x660] sm:$0xff] }
 0x197   :  { %v972_v36 = vld [vmem:[#allocation8 + $0x648] sm:$0xff] }
 0x198   :  { %2380 = vmatpush1.bf16.msra.mxu1 %v3624_v42  ;;  %2466 = vmatpush1.bf16.msra.mxu0 %v3626_v43  ;;  %v927_v42 = vld [vmem:[#allocation8 + $0x4e0] sm:$0xff]  ;;  %v924_v43 = vld [vmem:[#allocation8 + $0x4c8] sm:$0xff] }
 0x199   :  { %2392 = vmatprep.subr.bf16.mxu1 %v3633_v48  ;;  %2478 = vmatprep.subr.bf16.mxu0 %v3635_v52  ;;  %v3657_v47 = vcombine.high %v923_v41, %v927_v42  ;;  %v3659_v48 = vcombine.high %v924_v43, %v928_v44  ;;  %v936_v52 = vld [vmem:[#allocation8 + $0x528] sm:$0xff]  ;;  %v3656_v54 = vcombine.low %v923_v41, %v927_v42  ;;  %v979_v42 = vld [vmem:[#allocation8 + $0x680] sm:$0xff] }
 0x22e   :  { %v707_v60 = vpop.f32.mrb[0].mxu1  ;;  %v750_v61 = vpop.f32.mrb[4].mxu0 }
 0x22f   :  { %v708_v62 = vadd.f32 %v707_v60, %v336_v56  ;;  %v751_v63 = vadd.f32 %v750_v61, %v344_v57  ;;  %v709_v0 = vpop.f32.mrb[1].mxu1  ;;  %v752_v1 = vpop.f32.mrb[5].mxu0  ;;  %v943_v60 = vld [vmem:[#allocation8 + $0x560] sm:$0xff]  ;;  %v940_v61 = vld [vmem:[#allocation8 + $0x548] sm:$0xff] }
 0x230   :  { %v710_v2 = vadd.f32 %v709_v0, %v340_v58  ;;  %v753_v3 = vadd.f32 %v752_v1, %v348_v59  ;;  %v711_v4 = vpop.f32.mrb[2].mxu1  ;;  %v754_v5 = vpop.f32.mrb[6].mxu0 }
 0x231   :  { %v712_v6 = vadd.f32 %v711_v4, %v336_v56  ;;  %v755_v7 = vadd.f32 %v754_v5, %v344_v57  ;;  %v713_v8 = vpop.f32.mrb[3].mxu1  ;;  %v756_v9 = vpop.f32.mrb[7].mxu0  ;;  %v759_v12 = vmax.f32 %v708_v62, 0.0  ;;  %v761_v13 = vmax.f32 %v751_v63, 0.0  ;;  %v944_v62 = vld [vmem:[#allocation8 + $0x568] sm:$0xff]  ;;  %v951_v4 = vld [vmem:[#allocation8 + $0x5a0] sm:$0xff] }
 0x232   :  { %v714_v10 = vadd.f32 %v713_v8, %v340_v58  ;;  %v757_v11 = vadd.f32 %v756_v9, %v348_v59  ;;  %v760_v16 = vmax.f32 %v710_v2, 0.0  ;;  %v762_v17 = vmax.f32 %v753_v3, 0.0  ;;  %v939_v59 = vld [vmem:[#allocation8 + $0x540] sm:$0xff]  ;;  %v948_v5 = vld [vmem:[#allocation8 + $0x588] sm:$0xff] }
 0x233   :  { %v763_v14 = vmax.f32 %v712_v6, 0.0  ;;  %v765_v15 = vmax.f32 %v755_v7, 0.0  ;;  %v3658_v56 = vcombine.low %v924_v43, %v928_v44  ;;  %v3673_v1 = vcombine.high %v939_v59, %v943_v60  ;;  %v947_v3 = vld [vmem:[#allocation8 + $0x580] sm:$0xff]  ;;  %v952_v6 = vld [vmem:[#allocation8 + $0x5a8] sm:$0xff] }
 0x234   :  { %v764_v18 = vmax.f32 %v714_v10, 0.0  ;;  %v766_v19 = vmax.f32 %v757_v11, 0.0  ;;  %v3675_v2 = vcombine.high %v940_v61, %v944_v62  ;;  %v3672_v7 = vcombine.low %v939_v59, %v943_v60  ;;  %v955_v11 = vld [vmem:[#allocation8 + $0x5c0] sm:$0xff]  ;;  %v980_v44 = vld [vmem:[#allocation8 + $0x688] sm:$0xff] }
 0x235   :  { %v4447_v21 = vpack.c.bf16 %v763_v14, %v759_v12  ;;  %v4449_v22 = vpack.c.bf16 %v765_v15, %v761_v13  ;;  %v3674_v8 = vcombine.low %v940_v61, %v944_v62  ;;  %v3681_v9 = vcombine.high %v947_v3, %v951_v4  ;;  %v959_v12 = vld [vmem:[#allocation8 + $0x5e0] sm:$0xff]  ;;  %v956_v13 = vld [vmem:[#allocation8 + $0x5c8] sm:$0xff] }
 0x236   :  { %v4451_v26 = vpack.c.bf16 %v764_v18, %v760_v16  ;;  %v4453_v29 = vpack.c.bf16 %v766_v19, %v762_v17  ;;  %v3683_v10 = vcombine.high %v948_v5, %v952_v6  ;;  %v960_v14 = vld [vmem:[#allocation8 + $0x5e8] sm:$0xff]  ;;  %v3680_v15 = vcombine.low %v947_v3, %v951_v4  ;;  %v963_v19 = vld [vmem:[#allocation8 + $0x600] sm:$0xff] }
 0x237   :  { %v3682_v16 = vcombine.low %v948_v5, %v952_v6  ;;  %v3689_v17 = vcombine.high %v955_v11, %v959_v12  ;;  %v3691_v18 = vcombine.high %v956_v13, %v960_v14  ;;  %v3688_v25 = vcombine.low %v955_v11, %v959_v12  ;;  %v983_v43 = vld [vmem:[#allocation8 + $0x6a0] sm:$0xff]  ;;  %v996_v62 = vld [vmem:[#allocation8 + $0x708] sm:$0xff] }
 0x238   :  { %2381 = vmatprep.mubr.bf16.mxu1 %v4451_v26  ;;  %2467 = vmatprep.mubr.bf16.mxu0 %v4451_v26  ;;  %v3690_v31 = vcombine.low %v956_v13, %v960_v14  ;;  %v995_v60 = vld [vmem:[#allocation8 + $0x700] sm:$0xff]  ;;  %v1004_v6 = vld [vmem:[#allocation8 + $0x748] sm:$0xff] }
 0x239   :  { %2382 = vmatmul.mubr.bf16.vlgmr.msra.gmra.mrb[4].mxu1 %v4447_v21  ;;  %2468 = vmatmul.mubr.bf16.vlgmr.msra.gmra.mrb[8].mxu0 %v4447_v21  ;;  %v999_v61 = vld [vmem:[#allocation8 + $0x720] sm:$0xff]  ;;  %v1012_v14 = vld [vmem:[#allocation8 + $0x788] sm:$0xff] }
 0x23a   :  { %2393 = vmatpush1.bf16.msra.mxu1 %v3632_v50  ;;  %2479 = vmatpush1.bf16.msra.mxu0 %v3634_v51  ;;  %v935_v50 = vld [vmem:[#allocation8 + $0x520] sm:$0xff]  ;;  %v932_v51 = vld [vmem:[#allocation8 + $0x508] sm:$0xff] }
 0x23b   :  { %2424 = vmatprep.mubr.bf16.mxu1 %v4453_v29  ;;  %2510 = vmatprep.mubr.bf16.mxu0 %v4453_v29  ;;  %v3665_v57 = vcombine.high %v931_v49, %v935_v50  ;;  %v3667_v58 = vcombine.high %v932_v51, %v936_v52  ;;  %v3664_v63 = vcombine.low %v931_v49, %v935_v50  ;;  %v987_v50 = vld [vmem:[#allocation8 + $0x6c0] sm:$0xff] }
 0x23c   :  { %2394 = vmatprep.subr.bf16.mxu1 %v3641_v32  ;;  %2480 = vmatprep.subr.bf16.mxu0 %v3643_v33  ;;  %v3666_v0 = vcombine.low %v932_v51, %v936_v52  ;;  %v3697_v32 = vcombine.high %v963_v19, %v967_v20  ;;  %v3699_v33 = vcombine.high %v964_v23, %v968_v24  ;;  %v991_v51 = vld [vmem:[#allocation8 + $0x6e0] sm:$0xff]  ;;  %v988_v52 = vld [vmem:[#allocation8 + $0x6c8] sm:$0xff] }
 0x23d   :  { %v1003_v4 = vld [vmem:[#allocation8 + $0x740] sm:$0xff] }
 0x23e   :  { %2395 = vmatpush1.bf16.msra.mxu1 %v3640_v37  ;;  %2481 = vmatpush1.bf16.msra.mxu0 %v3642_v38  ;;  %v976_v37 = vld [vmem:[#allocation8 + $0x668] sm:$0xff]  ;;  %v3696_v38 = vcombine.low %v963_v19, %v967_v20  ;;  %v1007_v5 = vld [vmem:[#allocation8 + $0x760] sm:$0xff] }
 0x23f   :  { %2396 = vmatprep.subr.bf16.mxu1 %v3649_v39  ;;  %2482 = vmatprep.subr.bf16.mxu0 %v3651_v40  ;;  %v3698_v39 = vcombine.low %v964_v23, %v968_v24  ;;  %v3705_v40 = vcombine.high %v971_v34, %v975_v35  ;;  %v3707_v41 = vcombine.high %v972_v36, %v976_v37  ;;  %v1011_v12 = vld [vmem:[#allocation8 + $0x780] sm:$0xff]  ;;  %v1020_v24 = vld [vmem:[#allocation8 + $0x7c8] sm:$0xff] }
 0x240   :  { %v1015_v13 = vld [vmem:[#allocation8 + $0x7a0] sm:$0xff] }
 0x241   :  { %v1019_v20 = vld [vmem:[#allocation8 + $0x7c0] sm:$0xff] }
 0x242   :  { %2397 = vmatpush1.bf16.msra.mxu1 %v3648_v45  ;;  %2483 = vmatpush1.bf16.msra.mxu0 %v3650_v46  ;;  %v984_v45 = vld [vmem:[#allocation8 + $0x6a8] sm:$0xff]  ;;  %v3704_v46 = vcombine.low %v971_v34, %v975_v35  ;;  %v1023_v23 = vld [vmem:[#allocation8 + $0x7e0] sm:$0xff]  ;;  %v773_v35 = vld [vmem:[#allocation8 + $0x10] sm:$0xff] }
 0x243   :  { %2398 = vmatprep.subr.bf16.mxu1 %v3657_v47  ;;  %2484 = vmatprep.subr.bf16.mxu0 %v3659_v48  ;;  %v3706_v47 = vcombine.low %v972_v36, %v976_v37  ;;  %v3713_v48 = vcombine.high %v979_v42, %v983_v43  ;;  %v3715_v49 = vcombine.high %v980_v44, %v984_v45  ;;  %v777_v36 = vld [vmem:[#allocation8 + $0x30] sm:$0xff]  ;;  %v774_v37 = vld [vmem:[#allocation8 + $0x18] sm:$0xff] }
 0x246   :  { %2399 = vmatpush1.bf16.msra.mxu1 %v3656_v54  ;;  %2485 = vmatpush1.bf16.msra.mxu0 %v3658_v56  ;;  %v992_v54 = vld [vmem:[#allocation8 + $0x6e8] sm:$0xff]  ;;  %v3712_v56 = vcombine.low %v979_v42, %v983_v43  ;;  %v781_v43 = vld [vmem:[#allocation8 + $0x50] sm:$0xff] }
 0x247   :  { %2400 = vmatprep.subr.bf16.mxu1 %v3665_v57  ;;  %2486 = vmatprep.subr.bf16.mxu0 %v3667_v58  ;;  %v3714_v57 = vcombine.low %v980_v44, %v984_v45  ;;  %v3721_v58 = vcombine.high %v987_v50, %v991_v51  ;;  %v3723_v59 = vcombine.high %v988_v52, %v992_v54  ;;  %v785_v44 = vld [vmem:[#allocation8 + $0x70] sm:$0xff]  ;;  %v782_v45 = vld [vmem:[#allocation8 + $0x58] sm:$0xff] }
 0x24a   :  { %2401 = vmatpush1.bf16.msra.mxu1 %v3664_v63  ;;  %2487 = vmatpush1.bf16.msra.mxu0 %v3666_v0  ;;  %v1000_v63 = vld [vmem:[#allocation8 + $0x728] sm:$0xff]  ;;  %v3720_v0 = vcombine.low %v987_v50, %v991_v51  ;;  %v789_v51 = vld [vmem:[#allocation8 + $0x90] sm:$0xff] }
 0x24b   :  { %2402 = vmatprep.subr.bf16.mxu1 %v3673_v1  ;;  %2488 = vmatprep.subr.bf16.mxu0 %v3675_v2  ;;  %v3722_v1 = vcombine.low %v988_v52, %v992_v54  ;;  %v3729_v2 = vcombine.high %v995_v60, %v999_v61  ;;  %v3731_v3 = vcombine.high %v996_v62, %v1000_v63  ;;  %v793_v52 = vld [vmem:[#allocation8 + $0xb0] sm:$0xff]  ;;  %v790_v54 = vld [vmem:[#allocation8 + $0x98] sm:$0xff] }
 0x24e   :  { %2403 = vmatpush1.bf16.msra.mxu1 %v3672_v7  ;;  %2489 = vmatpush1.bf16.msra.mxu0 %v3674_v8  ;;  %v1008_v7 = vld [vmem:[#allocation8 + $0x768] sm:$0xff]  ;;  %v3728_v8 = vcombine.low %v995_v60, %v999_v61  ;;  %v797_v61 = vld [vmem:[#allocation8 + $0xd0] sm:$0xff] }
 0x24f   :  { %2404 = vmatprep.subr.bf16.mxu1 %v3681_v9  ;;  %2490 = vmatprep.subr.bf16.mxu0 %v3683_v10  ;;  %v3730_v9 = vcombine.low %v996_v62, %v1000_v63  ;;  %v3737_v10 = vcombine.high %v1003_v4, %v1007_v5  ;;  %v3739_v11 = vcombine.high %v1004_v6, %v1008_v7  ;;  %v801_v62 = vld [vmem:[#allocation8 + $0xf0] sm:$0xff]  ;;  %v798_v63 = vld [vmem:[#allocation8 + $0xd8] sm:$0xff] }
 0x252   :  { %2405 = vmatpush1.bf16.msra.mxu1 %v3680_v15  ;;  %2491 = vmatpush1.bf16.msra.mxu0 %v3682_v16  ;;  %v1016_v15 = vld [vmem:[#allocation8 + $0x7a8] sm:$0xff]  ;;  %v3736_v16 = vcombine.low %v1003_v4, %v1007_v5  ;;  %v805_v5 = vld [vmem:[#allocation8 + $0x110] sm:$0xff] }
 0x253   :  { %2406 = vmatprep.subr.bf16.mxu1 %v3689_v17  ;;  %2492 = vmatprep.subr.bf16.mxu0 %v3691_v18  ;;  %v3738_v17 = vcombine.low %v1004_v6, %v1008_v7  ;;  %v3745_v18 = vcombine.high %v1011_v12, %v1015_v13  ;;  %v3747_v19 = vcombine.high %v1012_v14, %v1016_v15  ;;  %v809_v6 = vld [vmem:[#allocation8 + $0x130] sm:$0xff]  ;;  %v810_v7 = vld [vmem:[#allocation8 + $0x138] sm:$0xff] }
 0x256   :  { %2407 = vmatpush1.bf16.msra.mxu1 %v3688_v25  ;;  %2493 = vmatpush1.bf16.msra.mxu0 %v3690_v31  ;;  %v1024_v25 = vld [vmem:[#allocation8 + $0x7e8] sm:$0xff]  ;;  %v3744_v31 = vcombine.low %v1011_v12, %v1015_v13  ;;  %v813_v12 = vld [vmem:[#allocation8 + $0x150] sm:$0xff] }
 0x257   :  { %2408 = vmatprep.subr.bf16.mxu1 %v3697_v32  ;;  %2494 = vmatprep.subr.bf16.mxu0 %v3699_v33  ;;  %v3746_v32 = vcombine.low %v1012_v14, %v1016_v15  ;;  %v3753_v33 = vcombine.high %v1019_v20, %v1023_v23  ;;  %v3755_v34 = vcombine.high %v1020_v24, %v1024_v25  ;;  %v817_v13 = vld [vmem:[#allocation8 + $0x170] sm:$0xff]  ;;  %v814_v14 = vld [vmem:[#allocation8 + $0x158] sm:$0xff] }
 0x258   :  { %v818_v15 = vld [vmem:[#allocation8 + $0x178] sm:$0xff] }
 0x25a   :  { %2409 = vmatpush1.bf16.msra.mxu1 %v3696_v38  ;;  %2495 = vmatpush1.bf16.msra.mxu0 %v3698_v39  ;;  %v778_v38 = vld [vmem:[#allocation8 + $0x38] sm:$0xff]  ;;  %v3752_v39 = vcombine.low %v1019_v20, %v1023_v23  ;;  %v821_v20 = vld [vmem:[#allocation8 + $0x190] sm:$0xff] }
 0x25b   :  { %2410 = vmatprep.subr.bf16.mxu1 %v3705_v40  ;;  %2496 = vmatprep.subr.bf16.mxu0 %v3707_v41  ;;  %v3754_v40 = vcombine.low %v1020_v24, %v1024_v25  ;;  %v3509_v41 = vcombine.high %v773_v35, %v777_v36  ;;  %v3511_v42 = vcombine.high %v774_v37, %v778_v38  ;;  %v825_v23 = vld [vmem:[#allocation8 + $0x1b0] sm:$0xff]  ;;  %v822_v24 = vld [vmem:[#allocation8 + $0x198] sm:$0xff] }
 0x25c   :  { %v826_v25 = vld [vmem:[#allocation8 + $0x1b8] sm:$0xff] }
 0x25e   :  { %2411 = vmatpush1.bf16.msra.mxu1 %v3704_v46  ;;  %2497 = vmatpush1.bf16.msra.mxu0 %v3706_v47  ;;  %v786_v46 = vld [vmem:[#allocation8 + $0x78] sm:$0xff]  ;;  %v3508_v47 = vcombine.low %v773_v35, %v777_v36  ;;  %v829_v35 = vld [vmem:[#allocation8 + $0x1d0] sm:$0xff] }
 0x25f   :  { %2412 = vmatprep.subr.bf16.mxu1 %v3713_v48  ;;  %2498 = vmatprep.subr.bf16.mxu0 %v3715_v49  ;;  %v3510_v48 = vcombine.low %v774_v37, %v778_v38  ;;  %v3517_v49 = vcombine.high %v781_v43, %v785_v44  ;;  %v3519_v50 = vcombine.high %v782_v45, %v786_v46  ;;  %v833_v36 = vld [vmem:[#allocation8 + $0x1f0] sm:$0xff]  ;;  %v830_v37 = vld [vmem:[#allocation8 + $0x1d8] sm:$0xff] }
 0x260   :  { %v834_v38 = vld [vmem:[#allocation8 + $0x1f8] sm:$0xff] }
 0x262   :  { %2413 = vmatpush1.bf16.msra.mxu1 %v3712_v56  ;;  %2499 = vmatpush1.bf16.msra.mxu0 %v3714_v57  ;;  %v794_v56 = vld [vmem:[#allocation8 + $0xb8] sm:$0xff]  ;;  %v3516_v57 = vcombine.low %v781_v43, %v785_v44  ;;  %v837_v43 = vld [vmem:[#allocation8 + $0x210] sm:$0xff] }
 0x263   :  { %2414 = vmatprep.subr.bf16.mxu1 %v3721_v58  ;;  %2500 = vmatprep.subr.bf16.mxu0 %v3723_v59  ;;  %v3518_v58 = vcombine.low %v782_v45, %v786_v46  ;;  %v3525_v59 = vcombine.high %v789_v51, %v793_v52  ;;  %v3527_v60 = vcombine.high %v790_v54, %v794_v56  ;;  %v841_v44 = vld [vmem:[#allocation8 + $0x230] sm:$0xff]  ;;  %v838_v45 = vld [vmem:[#allocation8 + $0x218] sm:$0xff] }
 0x264   :  { %v842_v46 = vld [vmem:[#allocation8 + $0x238] sm:$0xff] }
 0x266   :  { %2415 = vmatpush1.bf16.msra.mxu1 %v3720_v0  ;;  %2501 = vmatpush1.bf16.msra.mxu0 %v3722_v1  ;;  %v802_v0 = vld [vmem:[#allocation8 + $0xf8] sm:$0xff]  ;;  %v3524_v1 = vcombine.low %v789_v51, %v793_v52  ;;  %v845_v51 = vld [vmem:[#allocation8 + $0x250] sm:$0xff] }
 0x267   :  { %2416 = vmatprep.subr.bf16.mxu1 %v3729_v2  ;;  %2502 = vmatprep.subr.bf16.mxu0 %v3731_v3  ;;  %v3526_v2 = vcombine.low %v790_v54, %v794_v56  ;;  %v3533_v3 = vcombine.high %v797_v61, %v801_v62  ;;  %v3535_v4 = vcombine.high %v798_v63, %v802_v0  ;;  %v849_v52 = vld [vmem:[#allocation8 + $0x270] sm:$0xff]  ;;  %v846_v54 = vld [vmem:[#allocation8 + $0x258] sm:$0xff] }
 0x268   :  { %v850_v56 = vld [vmem:[#allocation8 + $0x278] sm:$0xff] }
 0x26a   :  { %2417 = vmatpush1.bf16.msra.mxu1 %v3728_v8  ;;  %2503 = vmatpush1.bf16.msra.mxu0 %v3730_v9  ;;  %v3532_v8 = vcombine.low %v797_v61, %v801_v62  ;;  %v3534_v9 = vcombine.low %v798_v63, %v802_v0  ;;  %v853_v61 = vld [vmem:[#allocation8 + $0x290] sm:$0xff]  ;;  %v854_v63 = vld [vmem:[#allocation8 + $0x298] sm:$0xff] }
 0x26b   :  { %2418 = vmatprep.subr.bf16.mxu1 %v3737_v10  ;;  %2504 = vmatprep.subr.bf16.mxu0 %v3739_v11  ;;  %v3541_v10 = vcombine.high %v805_v5, %v809_v6  ;;  %v857_v62 = vld [vmem:[#allocation8 + $0x2b0] sm:$0xff]  ;;  %v858_v0 = vld [vmem:[#allocation8 + $0x2b8] sm:$0xff] }
 0x26e   :  { %2419 = vmatpush1.bf16.msra.mxu1 %v3736_v16  ;;  %2505 = vmatpush1.bf16.msra.mxu0 %v3738_v17  ;;  %v3540_v16 = vcombine.low %v805_v5, %v809_v6  ;;  %v861_v5 = vld [vmem:[#allocation8 + $0x2d0] sm:$0xff] }
 0x26f   :  { %2420 = vmatprep.subr.bf16.mxu1 %v3745_v18  ;;  %2506 = vmatprep.subr.bf16.mxu0 %v3747_v19  ;;  %v3549_v18 = vcombine.high %v813_v12, %v817_v13  ;;  %v3551_v19 = vcombine.high %v814_v14, %v818_v15  ;;  %v865_v6 = vld [vmem:[#allocation8 + $0x2f0] sm:$0xff] }
 0x272   :  { %2421 = vmatpush1.bf16.msra.mxu1 %v3744_v31  ;;  %2507 = vmatpush1.bf16.msra.mxu0 %v3746_v32  ;;  %v3548_v31 = vcombine.low %v813_v12, %v817_v13  ;;  %v3550_v32 = vcombine.low %v814_v14, %v818_v15  ;;  %v869_v12 = vld [vmem:[#allocation8 + $0x310] sm:$0xff]  ;;  %v870_v14 = vld [vmem:[#allocation8 + $0x318] sm:$0xff] }
 0x273   :  { %2422 = vmatprep.subr.bf16.mxu1 %v3753_v33  ;;  %2508 = vmatprep.subr.bf16.mxu0 %v3755_v34  ;;  %v3557_v33 = vcombine.high %v821_v20, %v825_v23  ;;  %v3559_v34 = vcombine.high %v822_v24, %v826_v25  ;;  %v873_v13 = vld [vmem:[#allocation8 + $0x330] sm:$0xff]  ;;  %v874_v15 = vld [vmem:[#allocation8 + $0x338] sm:$0xff] }
 0x276   :  { %2423 = vmatpush1.bf16.msra.mxu1 %v3752_v39  ;;  %2509 = vmatpush1.bf16.msra.mxu0 %v3754_v40  ;;  %v3556_v39 = vcombine.low %v821_v20, %v825_v23  ;;  %v3558_v40 = vcombine.low %v822_v24, %v826_v25  ;;  %v877_v20 = vld [vmem:[#allocation8 + $0x350] sm:$0xff]  ;;  %v878_v24 = vld [vmem:[#allocation8 + $0x358] sm:$0xff] }
 0x277   :  { %2521 = vmatprep.subr.bf16.mxu1 %v3509_v41  ;;  %2607 = vmatprep.subr.bf16.mxu0 %v3511_v42  ;;  %v3565_v41 = vcombine.high %v829_v35, %v833_v36  ;;  %v3567_v42 = vcombine.high %v830_v37, %v834_v38  ;;  %v881_v23 = vld [vmem:[#allocation8 + $0x370] sm:$0xff]  ;;  %v882_v25 = vld [vmem:[#allocation8 + $0x378] sm:$0xff] }
 0x279   :  { %2425 = vmatmul.mubr.bf16.vlgmr.msra.gmra.mrb[4].mxu1 %v4449_v22  ;;  %2511 = vmatmul.mubr.bf16.vlgmr.msra.gmra.mrb[8].mxu0 %v4449_v22 }
 0x27a   :  { %2522 = vmatpush1.bf16.msra.mxu1 %v3508_v47  ;;  %2553 = vmatprep.mubr.bf16.mxu1 %v4451_v26  ;;  %v3564_v47 = vcombine.low %v829_v35, %v833_v36  ;;  %v885_v35 = vld [vmem:[#allocation8 + $0x390] sm:$0xff] }
 0x27b   :  { %2608 = vmatpush1.bf16.msra.mxu0 %v3510_v48  ;;  %2639 = vmatprep.mubr.bf16.mxu0 %v4451_v26  ;;  %v806_v26 = vld [vmem:[#allocation8 + $0x118] sm:$0xff]  ;;  %v3566_v48 = vcombine.low %v830_v37, %v834_v38  ;;  %v889_v36 = vld [vmem:[#allocation8 + $0x3b0] sm:$0xff] }
 0x27c   :  { %2523 = vmatprep.subr.bf16.mxu1 %v3517_v49  ;;  %2609 = vmatprep.subr.bf16.mxu0 %v3519_v50  ;;  %v3543_v11 = vcombine.high %v806_v26, %v810_v7  ;;  %v3542_v17 = vcombine.low %v806_v26, %v810_v7  ;;  %v3573_v49 = vcombine.high %v837_v43, %v841_v44  ;;  %v862_v26 = vld [vmem:[#allocation8 + $0x2d8] sm:$0xff] }
 0x27d   :  { %v3575_v50 = vcombine.high %v838_v45, %v842_v46  ;;  %v866_v7 = vld [vmem:[#allocation8 + $0x2f8] sm:$0xff] }
 0x27e   :  { %2524 = vmatpush1.bf16.msra.mxu1 %v3516_v57  ;;  %v3572_v57 = vcombine.low %v837_v43, %v841_v44  ;;  %v886_v37 = vld [vmem:[#allocation8 + $0x398] sm:$0xff]  ;;  %v893_v43 = vld [vmem:[#allocation8 + $0x3d0] sm:$0xff] }
 0x27f   :  { %2610 = vmatpush1.bf16.msra.mxu0 %v3518_v58  ;;  %2525 = vmatprep.subr.bf16.mxu1 %v3525_v59  ;;  %v3574_v58 = vcombine.low %v838_v45, %v842_v46  ;;  %v3581_v59 = vcombine.high %v845_v51, %v849_v52  ;;  %v890_v38 = vld [vmem:[#allocation8 + $0x3b8] sm:$0xff]  ;;  %v897_v44 = vld [vmem:[#allocation8 + $0x3f0] sm:$0xff] }
 0x280   :  { %2611 = vmatprep.subr.bf16.mxu0 %v3527_v60  ;;  %v3583_v60 = vcombine.high %v846_v54, %v850_v56  ;;  %v894_v45 = vld [vmem:[#allocation8 + $0x3d8] sm:$0xff] }
 0x281   :  { %v898_v46 = vld [vmem:[#allocation8 + $0x3f8] sm:$0xff] }
 0x282   :  { %2526 = vmatpush1.bf16.msra.mxu1 %v3524_v1  ;;  %v3580_v1 = vcombine.low %v845_v51, %v849_v52  ;;  %v901_v51 = vld [vmem:[#allocation8 + $0x410] sm:$0xff] }
 0x283   :  { %2612 = vmatpush1.bf16.msra.mxu0 %v3526_v2  ;;  %2527 = vmatprep.subr.bf16.mxu1 %v3533_v3  ;;  %v3582_v2 = vcombine.low %v846_v54, %v850_v56  ;;  %v3589_v3 = vcombine.high %v853_v61, %v857_v62  ;;  %v905_v52 = vld [vmem:[#allocation8 + $0x430] sm:$0xff]  ;;  %v902_v54 = vld [vmem:[#allocation8 + $0x418] sm:$0xff] }
 0x284   :  { %2613 = vmatprep.subr.bf16.mxu0 %v3535_v4  ;;  %v3591_v4 = vcombine.high %v854_v63, %v858_v0  ;;  %v906_v56 = vld [vmem:[#allocation8 + $0x438] sm:$0xff] }
 0x286   :  { %2528 = vmatpush1.bf16.msra.mxu1 %v3532_v8  ;;  %v3588_v8 = vcombine.low %v853_v61, %v857_v62  ;;  %v909_v61 = vld [vmem:[#allocation8 + $0x450] sm:$0xff] }
 0x287   :  { %2614 = vmatpush1.bf16.msra.mxu0 %v3534_v9  ;;  %2529 = vmatprep.subr.bf16.mxu1 %v3541_v10  ;;  %v3590_v9 = vcombine.low %v854_v63, %v858_v0  ;;  %v3597_v10 = vcombine.high %v861_v5, %v865_v6  ;;  %v913_v62 = vld [vmem:[#allocation8 + $0x470] sm:$0xff]  ;;  %v3636_v63 = vcombine.low %v901_v51, %v905_v52  ;;  %v910_v0 = vld [vmem:[#allocation8 + $0x458] sm:$0xff] }
 0x288   :  { %2615 = vmatprep.subr.bf16.mxu0 %v3543_v11  ;;  %v3599_v11 = vcombine.high %v862_v26, %v866_v7 }
 0x28a   :  { %2530 = vmatpush1.bf16.msra.mxu1 %v3540_v16  ;;  %v3596_v16 = vcombine.low %v861_v5, %v865_v6  ;;  %v921_v5 = vld [vmem:[#allocation8 + $0x4b0] sm:$0xff] }
 0x28b   :  { %2616 = vmatpush1.bf16.msra.mxu0 %v3542_v17  ;;  %2531 = vmatprep.subr.bf16.mxu1 %v3549_v18  ;;  %v3598_v17 = vcombine.low %v862_v26, %v866_v7  ;;  %v3605_v18 = vcombine.high %v869_v12, %v873_v13  ;;  %v918_v26 = vld [vmem:[#allocation8 + $0x498] sm:$0xff] }
 0x28c   :  { %2617 = vmatprep.subr.bf16.mxu0 %v3551_v19  ;;  %v3607_v19 = vcombine.high %v870_v14, %v874_v15  ;;  %v922_v7 = vld [vmem:[#allocation8 + $0x4b8] sm:$0xff] }
 0x28e   :  { %2532 = vmatpush1.bf16.msra.mxu1 %v3548_v31  ;;  %v3604_v31 = vcombine.low %v869_v12, %v873_v13  ;;  %v925_v12 = vld [vmem:[#allocation8 + $0x4d0] sm:$0xff] }
 0x28f   :  { %2618 = vmatpush1.bf16.msra.mxu0 %v3550_v32  ;;  %2533 = vmatprep.subr.bf16.mxu1 %v3557_v33  ;;  %v3606_v32 = vcombine.low %v870_v14, %v874_v15  ;;  %v3613_v33 = vcombine.high %v877_v20, %v881_v23  ;;  %v929_v13 = vld [vmem:[#allocation8 + $0x4f0] sm:$0xff]  ;;  %v926_v14 = vld [vmem:[#allocation8 + $0x4d8] sm:$0xff] }
 0x290   :  { %2619 = vmatprep.subr.bf16.mxu0 %v3559_v34  ;;  %v3615_v34 = vcombine.high %v878_v24, %v882_v25  ;;  %v930_v15 = vld [vmem:[#allocation8 + $0x4f8] sm:$0xff] }
 0x292   :  { %2534 = vmatpush1.bf16.msra.mxu1 %v3556_v39  ;;  %v3612_v39 = vcombine.low %v877_v20, %v881_v23  ;;  %v937_v20 = vld [vmem:[#allocation8 + $0x530] sm:$0xff]  ;;  %v934_v23 = vld [vmem:[#allocation8 + $0x518] sm:$0xff] }
 0x293   :  { %2620 = vmatpush1.bf16.msra.mxu0 %v3558_v40  ;;  %2535 = vmatprep.subr.bf16.mxu1 %v3565_v41  ;;  %v3614_v40 = vcombine.low %v878_v24, %v882_v25  ;;  %v3621_v41 = vcombine.high %v885_v35, %v889_v36  ;;  %v938_v24 = vld [vmem:[#allocation8 + $0x538] sm:$0xff]  ;;  %v3662_v25 = vcombine.low %v926_v14, %v930_v15 }
 0x294   :  { %2621 = vmatprep.subr.bf16.mxu0 %v3567_v42  ;;  %v3623_v42 = vcombine.high %v886_v37, %v890_v38 }
 0x296   :  { %2536 = vmatpush1.bf16.msra.mxu1 %v3564_v47  ;;  %v3620_v47 = vcombine.low %v885_v35, %v889_v36  ;;  %v942_v35 = vld [vmem:[#allocation8 + $0x558] sm:$0xff] }
 0x297   :  { %2622 = vmatpush1.bf16.msra.mxu0 %v3566_v48  ;;  %2537 = vmatprep.subr.bf16.mxu1 %v3573_v49  ;;  %v3622_v48 = vcombine.low %v886_v37, %v890_v38  ;;  %v3629_v49 = vcombine.high %v893_v43, %v897_v44  ;;  %v946_v36 = vld [vmem:[#allocation8 + $0x578] sm:$0xff]  ;;  %v3670_v38 = vcombine.low %v934_v23, %v938_v24 }
 0x298   :  { %2623 = vmatprep.subr.bf16.mxu0 %v3575_v50  ;;  %v3631_v50 = vcombine.high %v894_v45, %v898_v46 }
 0x29a   :  { %2538 = vmatpush1.bf16.msra.mxu1 %v3572_v57  ;;  %v3628_v57 = vcombine.low %v893_v43, %v897_v44  ;;  %v950_v43 = vld [vmem:[#allocation8 + $0x598] sm:$0xff] }
 0x29b   :  { %2624 = vmatpush1.bf16.msra.mxu0 %v3574_v58  ;;  %2539 = vmatprep.subr.bf16.mxu1 %v3581_v59  ;;  %v3630_v58 = vcombine.low %v894_v45, %v898_v46  ;;  %v3637_v59 = vcombine.high %v901_v51, %v905_v52  ;;  %v954_v44 = vld [vmem:[#allocation8 + $0x5b8] sm:$0xff]  ;;  %v3678_v46 = vcombine.low %v942_v35, %v946_v36 }
 0x29c   :  { %2625 = vmatprep.subr.bf16.mxu0 %v3583_v60  ;;  %v3639_v60 = vcombine.high %v902_v54, %v906_v56  ;;  %v958_v51 = vld [vmem:[#allocation8 + $0x5d8] sm:$0xff] }
 0x29d   :  { %v962_v52 = vld [vmem:[#allocation8 + $0x5f8] sm:$0xff] }
 0x29e   :  { %2540 = vmatpush1.bf16.msra.mxu1 %v3580_v1  ;;  %v914_v1 = vld [vmem:[#allocation8 + $0x478] sm:$0xff] }
 0x29f   :  { %2626 = vmatpush1.bf16.msra.mxu0 %v3582_v2  ;;  %2541 = vmatprep.subr.bf16.mxu1 %v3589_v3  ;;  %v3638_v2 = vcombine.low %v902_v54, %v906_v56  ;;  %v3645_v3 = vcombine.high %v909_v61, %v913_v62  ;;  %v3647_v6 = vcombine.high %v910_v0, %v914_v1 }
 0x2a0   :  { %2627 = vmatprep.subr.bf16.mxu0 %v3591_v4  ;;  %v917_v4 = vld [vmem:[#allocation8 + $0x490] sm:$0xff]  ;;  %v3686_v56 = vcombine.low %v950_v43, %v954_v44 }
 0x2a2   :  { %2542 = vmatpush1.bf16.msra.mxu1 %v3588_v8  ;;  %v3644_v8 = vcombine.low %v909_v61, %v913_v62  ;;  %v966_v61 = vld [vmem:[#allocation8 + $0x618] sm:$0xff] }
 0x2a3   :  { %2628 = vmatpush1.bf16.msra.mxu0 %v3590_v9  ;;  %2543 = vmatprep.subr.bf16.mxu1 %v3597_v10  ;;  %v3646_v9 = vcombine.low %v910_v0, %v914_v1  ;;  %v3653_v10 = vcombine.high %v917_v4, %v921_v5  ;;  %v970_v62 = vld [vmem:[#allocation8 + $0x638] sm:$0xff]  ;;  %v3694_v0 = vcombine.low %v958_v51, %v962_v52 }
 0x2a4   :  { %2629 = vmatprep.subr.bf16.mxu0 %v3599_v11  ;;  %v3655_v11 = vcombine.high %v918_v26, %v922_v7 }
 0x2a6   :  { %2544 = vmatpush1.bf16.msra.mxu1 %v3596_v16  ;;  %v3652_v16 = vcombine.low %v917_v4, %v921_v5  ;;  %v977_v4 = vld [vmem:[#allocation8 + $0x670] sm:$0xff]  ;;  %v974_v5 = vld [vmem:[#allocation8 + $0x658] sm:$0xff] }
 0x2a7   :  { %2630 = vmatpush1.bf16.msra.mxu0 %v3598_v17  ;;  %2545 = vmatprep.subr.bf16.mxu1 %v3605_v18  ;;  %v3661_v17 = vcombine.high %v925_v12, %v929_v13  ;;  %v3663_v18 = vcombine.high %v926_v14, %v930_v15 }
 0x2a8   :  { %2631 = vmatprep.subr.bf16.mxu0 %v3607_v19  ;;  %v933_v19 = vld [vmem:[#allocation8 + $0x510] sm:$0xff] }
 0x2a9   :  { %v3668_v37 = vcombine.low %v933_v19, %v937_v20 }
 0x2aa   :  { %2546 = vmatpush1.bf16.msra.mxu1 %v3604_v31  ;;  %v3669_v31 = vcombine.high %v933_v19, %v937_v20  ;;  %v990_v19 = vld [vmem:[#allocation8 + $0x6d8] sm:$0xff] }
 0x2ab   :  { %2632 = vmatpush1.bf16.msra.mxu0 %v3606_v32  ;;  %2547 = vmatprep.subr.bf16.mxu1 %v3613_v33  ;;  %v3671_v32 = vcombine.high %v934_v23, %v938_v24  ;;  %v941_v33 = vld [vmem:[#allocation8 + $0x550] sm:$0xff]  ;;  %v994_v20 = vld [vmem:[#allocation8 + $0x6f8] sm:$0xff] }
 0x2ac   :  { %2633 = vmatprep.subr.bf16.mxu0 %v3615_v34  ;;  %v945_v34 = vld [vmem:[#allocation8 + $0x570] sm:$0xff] }
 0x2ad   :  { %v3676_v45 = vcombine.low %v941_v33, %v945_v34 }
 0x2ae   :  { %2548 = vmatpush1.bf16.msra.mxu1 %v3612_v39  ;;  %v3677_v39 = vcombine.high %v941_v33, %v945_v34  ;;  %v998_v33 = vld [vmem:[#allocation8 + $0x718] sm:$0xff] }
 0x2af   :  { %2634 = vmatpush1.bf16.msra.mxu0 %v3614_v40  ;;  %2549 = vmatprep.subr.bf16.mxu1 %v3621_v41  ;;  %v3679_v40 = vcombine.high %v942_v35, %v946_v36  ;;  %v949_v41 = vld [vmem:[#allocation8 + $0x590] sm:$0xff]  ;;  %v1002_v34 = vld [vmem:[#allocation8 + $0x738] sm:$0xff]  ;;  %v3726_v36 = vcombine.low %v990_v19, %v994_v20 }
 0x2b0   :  { %2635 = vmatprep.subr.bf16.mxu0 %v3623_v42  ;;  %v953_v42 = vld [vmem:[#allocation8 + $0x5b0] sm:$0xff] }
 0x2b1   :  { %v3684_v54 = vcombine.low %v949_v41, %v953_v42 }
 0x2b2   :  { %2550 = vmatpush1.bf16.msra.mxu1 %v3620_v47  ;;  %v3685_v47 = vcombine.high %v949_v41, %v953_v42  ;;  %v1006_v41 = vld [vmem:[#allocation8 + $0x758] sm:$0xff] }
 0x2b3   :  { %2636 = vmatpush1.bf16.msra.mxu0 %v3622_v48  ;;  %2551 = vmatprep.subr.bf16.mxu1 %v3629_v49  ;;  %v3687_v48 = vcombine.high %v950_v43, %v954_v44  ;;  %v957_v49 = vld [vmem:[#allocation8 + $0x5d0] sm:$0xff]  ;;  %v1010_v42 = vld [vmem:[#allocation8 + $0x778] sm:$0xff]  ;;  %v3734_v44 = vcombine.low %v998_v33, %v1002_v34 }
 0x2b4   :  { %2637 = vmatprep.subr.bf16.mxu0 %v3631_v50  ;;  %v961_v50 = vld [vmem:[#allocation8 + $0x5f0] sm:$0xff] }
 0x2b6   :  { %2552 = vmatpush1.bf16.msra.mxu1 %v3628_v57  ;;  %v3693_v57 = vcombine.high %v957_v49, %v961_v50 }
 0x2b7   :  { %2638 = vmatpush1.bf16.msra.mxu0 %v3630_v58  ;;  %2564 = vmatprep.subr.bf16.mxu1 %v3637_v59  ;;  %v3695_v58 = vcombine.high %v958_v51, %v962_v52  ;;  %v965_v59 = vld [vmem:[#allocation8 + $0x610] sm:$0xff]  ;;  %v3742_v52 = vcombine.low %v1006_v41, %v1010_v42 }
 0x2b8   :  { %2650 = vmatprep.subr.bf16.mxu0 %v3639_v60  ;;  %v969_v60 = vld [vmem:[#allocation8 + $0x630] sm:$0xff] }
 0x2b9   :  { %2554 = vmatmul.mubr.bf16.vlgmr.msra.gmra.mrb[8].mxu1 %v4447_v21  ;;  %v3701_v1 = vcombine.high %v965_v59, %v969_v60 }
 0x2ba   :  { %2640 = vmatmul.mubr.bf16.vlgmr.msra.gmra.mrb[12].mxu0 %v4447_v21  ;;  %2565 = vmatpush1.bf16.msra.mxu1 %v3636_v63  ;;  %v3654_v21 = vcombine.low %v918_v26, %v922_v7  ;;  %v3692_v63 = vcombine.low %v957_v49, %v961_v50  ;;  %v3700_v26 = vcombine.low %v965_v59, %v969_v60  ;;  %v1014_v49 = vld [vmem:[#allocation8 + $0x798] sm:$0xff] }
 0x2bb   :  { %2596 = vmatprep.mubr.bf16.mxu1 %v4453_v29  ;;  %2651 = vmatpush1.bf16.msra.mxu0 %v3638_v2  ;;  %v3703_v2 = vcombine.high %v966_v61, %v970_v62  ;;  %v3702_v7 = vcombine.low %v966_v61, %v970_v62  ;;  %v1018_v50 = vld [vmem:[#allocation8 + $0x7b8] sm:$0xff] }
 0x2bc   :  { %2682 = vmatprep.mubr.bf16.mxu0 %v4453_v29  ;;  %2566 = vmatprep.subr.bf16.mxu1 %v3645_v3  ;;  %v3660_v29 = vcombine.low %v925_v12, %v929_v13  ;;  %v973_v3 = vld [vmem:[#allocation8 + $0x650] sm:$0xff]  ;;  %v982_v12 = vld [vmem:[#allocation8 + $0x698] sm:$0xff]  ;;  %v3750_v62 = vcombine.low %v1014_v49, %v1018_v50 }
 0x2bd   :  { %2652 = vmatprep.subr.bf16.mxu0 %v3647_v6  ;;  %v978_v6 = vld [vmem:[#allocation8 + $0x678] sm:$0xff]  ;;  %v3708_v14 = vcombine.low %v973_v3, %v977_v4 }
 0x2be   :  { %2567 = vmatpush1.bf16.msra.mxu1 %v3644_v8  ;;  %v3709_v8 = vcombine.high %v973_v3, %v977_v4  ;;  %v986_v13 = vld [vmem:[#allocation8 + $0x6b8] sm:$0xff]  ;;  %v3710_v15 = vcombine.low %v974_v5, %v978_v6  ;;  %v4081_v3 = vld [vmem:[#allocation10 + $0x40] sm:$0xff]  }
 0x2bf   :  { %2653 = vmatpush1.bf16.msra.mxu0 %v3646_v9  ;;  %2568 = vmatprep.subr.bf16.mxu1 %v3653_v10  ;;  %v3711_v9 = vcombine.high %v974_v5, %v978_v6  ;;  %v981_v10 = vld [vmem:[#allocation8 + $0x690] sm:$0xff]  ;;  %v3718_v24 = vcombine.low %v982_v12, %v986_v13  ;;  %v1022_v59 = vld [vmem:[#allocation8 + $0x7d8] sm:$0xff]  ;;  %v4082_v4 = vld [vmem:[#allocation10 + $0xc0] sm:$0xff]  }
 0x2c0   :  { %2654 = vmatprep.subr.bf16.mxu0 %v3655_v11  ;;  %v985_v11 = vld [vmem:[#allocation8 + $0x6b0] sm:$0xff]  ;;  %v1026_v60 = vld [vmem:[#allocation8 + $0x7f8] sm:$0xff]  ;;  %v4083_v5 = vld [vmem:[#allocation10] sm:$0xff]  }
 0x2c1   :  { %v3716_v23 = vcombine.low %v981_v10, %v985_v11  ;;  %v4084_v6 = vld [vmem:[#allocation10 + $0x80] sm:$0xff]  }
 0x2c2   :  { %2569 = vmatpush1.bf16.msra.mxu1 %v3652_v16  ;;  %v3717_v16 = vcombine.high %v981_v10, %v985_v11  ;;  %v4089_v10 = vld [vmem:[#allocation10 + $0x50] sm:$0xff]  }
 0x2c3   :  { %2655 = vmatpush1.bf16.msra.mxu0 %v3654_v21  ;;  %2570 = vmatprep.subr.bf16.mxu1 %v3661_v17  ;;  %v3719_v21 = vcombine.high %v982_v12, %v986_v13  ;;  %v989_v17 = vld [vmem:[#allocation8 + $0x6d0] sm:$0xff] }
 0x2c4   :  { %2656 = vmatprep.subr.bf16.mxu0 %v3663_v18  ;;  %v993_v18 = vld [vmem:[#allocation8 + $0x6f0] sm:$0xff] }
 0x2c5   :  { %v3724_v35 = vcombine.low %v989_v17, %v993_v18  ;;  %v4090_v11 = vld [vmem:[#allocation10 + $0xd0] sm:$0xff]  }
 0x2c6   :  { %2571 = vmatpush1.bf16.msra.mxu1 %v3660_v29  ;;  %v3725_v29 = vcombine.high %v989_v17, %v993_v18  ;;  %v4091_v12 = vld [vmem:[#allocation10 + $0x10] sm:$0xff]   ;;  %v4098_v17 = vld [vmem:[#allocation10 + $0xe0] sm:$0xff]  }
 0x2c7   :  { %2657 = vmatpush1.bf16.msra.mxu0 %v3662_v25  ;;  %2572 = vmatprep.subr.bf16.mxu1 %v3669_v31  ;;  %v3727_v25 = vcombine.high %v990_v19, %v994_v20  ;;  %v997_v31 = vld [vmem:[#allocation8 + $0x710] sm:$0xff]  ;;  %v4099_v18 = vld [vmem:[#allocation10 + $0x20] sm:$0xff]   ;;  %v4101_v20 = vld [vmem:[#allocation10 + $0x68] sm:$0xff]  }
 0x2c8   :  { %2658 = vmatprep.subr.bf16.mxu0 %v3671_v32  ;;  %v1001_v32 = vld [vmem:[#allocation8 + $0x730] sm:$0xff]  ;;  %v4100_v19 = vld [vmem:[#allocation10 + $0xa0] sm:$0xff]  }
 0x2c9   :  { %v3732_v43 = vcombine.low %v997_v31, %v1001_v32  ;;  %v4092_v13 = vld [vmem:[#allocation10 + $0x90] sm:$0xff]  }
 0x2ca   :  { %2573 = vmatpush1.bf16.msra.mxu1 %v3668_v37  ;;  %v3733_v37 = vcombine.high %v997_v31, %v1001_v32  ;;  %v4106_v31 = vld [vmem:[#allocation10 + $0xf0] sm:$0xff]  }
 0x2cb   :  { %2659 = vmatpush1.bf16.msra.mxu0 %v3670_v38  ;;  %2574 = vmatprep.subr.bf16.mxu1 %v3677_v39  ;;  %v3735_v38 = vcombine.high %v998_v33, %v1002_v34  ;;  %v1005_v39 = vld [vmem:[#allocation8 + $0x750] sm:$0xff]  ;;  %v4109_v34 = vld [vmem:[#allocation10 + $0x78] sm:$0xff]  }
 0x2cc   :  { %2660 = vmatprep.subr.bf16.mxu0 %v3679_v40  ;;  %v1009_v40 = vld [vmem:[#allocation8 + $0x770] sm:$0xff] }
 0x2cd   :  { %v3740_v51 = vcombine.low %v1005_v39, %v1009_v40  ;;  %v4107_v32 = vld [vmem:[#allocation10 + $0x30] sm:$0xff]  }
 0x2ce   :  { %2575 = vmatpush1.bf16.msra.mxu1 %v3676_v45  ;;  %v3741_v45 = vcombine.high %v1005_v39, %v1009_v40  ;;  %v4108_v33 = vld [vmem:[#allocation10 + $0xb0] sm:$0xff]   ;;  %v4114_v39 = vld [vmem:[#allocation10 + $0x1c0] sm:$0xff]   ;;  %v4474_v40 = vld [vmem:[%s4518_s6] sm:$0xff] }
 0x2cf   :  { %2661 = vmatpush1.bf16.msra.mxu0 %v3678_v46  ;;  %2576 = vmatprep.subr.bf16.mxu1 %v3685_v47  ;;  %v3743_v46 = vcombine.high %v1006_v41, %v1010_v42  ;;  %v1013_v47 = vld [vmem:[#allocation8 + $0x790] sm:$0xff]  ;;  %v1032_v41 = vrot.slane %v4474_v40, %v4426_v28  ;;  %v1040_v42 = vrot.slane %v4474_v40, %v343_v53 }
 0x2d0   :  { %2662 = vmatprep.subr.bf16.mxu0 %v3687_v48  ;;  %v1017_v48 = vld [vmem:[#allocation8 + $0x7b0] sm:$0xff] }
 0x2d1   :  { %v3748_v61 = vcombine.low %v1013_v47, %v1017_v48 }
 0x2d2   :  { %2577 = vmatpush1.bf16.msra.mxu1 %v3684_v54  ;;  %v3749_v54 = vcombine.high %v1013_v47, %v1017_v48 }
 0x2d3   :  { %2663 = vmatpush1.bf16.msra.mxu0 %v3686_v56  ;;  %2578 = vmatprep.subr.bf16.mxu1 %v3693_v57  ;;  %v3751_v56 = vcombine.high %v1014_v49, %v1018_v50  ;;  %v1021_v57 = vld [vmem:[#allocation8 + $0x7d0] sm:$0xff] }
 0x2d4   :  { %2664 = vmatprep.subr.bf16.mxu0 %v3695_v58  ;;  %v1025_v58 = vld [vmem:[#allocation8 + $0x7f0] sm:$0xff] }
 0x2d6   :  { %2579 = vmatpush1.bf16.msra.mxu1 %v3692_v63  ;;  %v3757_v63 = vcombine.high %v1021_v57, %v1025_v58 }
 0x2d7   :  { %2665 = vmatpush1.bf16.msra.mxu0 %v3694_v0  ;;  %2580 = vmatprep.subr.bf16.mxu1 %v3701_v1  ;;  %v3759_v0 = vcombine.high %v1022_v59, %v1026_v60  ;;  %v3756_v1 = vcombine.low %v1021_v57, %v1025_v58 }
 0x2d8   :  { %2666 = vmatprep.subr.bf16.mxu0 %v3703_v2  ;;  %v3758_v2 = vcombine.low %v1022_v59, %v1026_v60 }
 0x2da   :  { %2581 = vmatpush1.bf16.msra.mxu1 %v3700_v26  ;;  %v4085_v26 = vld [vmem:[#allocation10 + $0x48] sm:$0xff]  }
 0x2db   :  { %2667 = vmatpush1.bf16.msra.mxu0 %v3702_v7  ;;  %2582 = vmatprep.subr.bf16.mxu1 %v3709_v8  ;;  %v4086_v7 = vld [vmem:[#allocation10 + $0xc8] sm:$0xff]  }
 0x2dc   :  { %2668 = vmatprep.subr.bf16.mxu0 %v3711_v9  ;;  %v4087_v8 = vld [vmem:[#allocation10 + $0x8] sm:$0xff]  }
 0x2dd   :  { %v4088_v9 = vld [vmem:[#allocation10 + $0x88] sm:$0xff]  }
 0x2de   :  { %2583 = vmatpush1.bf16.msra.mxu1 %v3708_v14  ;;  %v4093_v14 = vld [vmem:[#allocation10 + $0x58] sm:$0xff]  }
 0x2df   :  { %2669 = vmatpush1.bf16.msra.mxu0 %v3710_v15  ;;  %2584 = vmatprep.subr.bf16.mxu1 %v3717_v16  ;;  %v4094_v15 = vld [vmem:[#allocation10 + $0xd8] sm:$0xff]  }
 0x2e0   :  { %2670 = vmatprep.subr.bf16.mxu0 %v3719_v21  ;;  %v4095_v16 = vld [vmem:[#allocation10 + $0x18] sm:$0xff]   ;;  %v4097_v21 = vld [vmem:[#allocation10 + $0x60] sm:$0xff]  }
 0x2e2   :  { %2585 = vmatpush1.bf16.msra.mxu1 %v3716_v23  ;;  %v4102_v23 = vld [vmem:[#allocation10 + $0xe8] sm:$0xff]  }
 0x2e3   :  { %2671 = vmatpush1.bf16.msra.mxu0 %v3718_v24  ;;  %2586 = vmatprep.subr.bf16.mxu1 %v3725_v29  ;;  %v4103_v24 = vld [vmem:[#allocation10 + $0x28] sm:$0xff]  }
 0x2e4   :  { %2672 = vmatprep.subr.bf16.mxu0 %v3727_v25  ;;  %v4104_v29 = vld [vmem:[#allocation10 + $0xa8] sm:$0xff]   ;;  %v4105_v25 = vld [vmem:[#allocation10 + $0x70] sm:$0xff]  }
 0x2e6   :  { %2587 = vmatpush1.bf16.msra.mxu1 %v3724_v35  ;;  %v4110_v35 = vld [vmem:[#allocation10 + $0xf8] sm:$0xff]  }
 0x2e7   :  { %2673 = vmatpush1.bf16.msra.mxu0 %v3726_v36  ;;  %2588 = vmatprep.subr.bf16.mxu1 %v3733_v37  ;;  %v4111_v36 = vld [vmem:[#allocation10 + $0x38] sm:$0xff]  }
 0x2e8   :  { %2674 = vmatprep.subr.bf16.mxu0 %v3735_v38  ;;  %v4112_v37 = vld [vmem:[#allocation10 + $0xb8] sm:$0xff]   ;;  %v4113_v38 = vld [vmem:[#allocation10 + $0x140] sm:$0xff]  }
 0x2ea   :  { %2589 = vmatpush1.bf16.msra.mxu1 %v3732_v43  ;;  %v1036_v43 = vrot.slane %v4474_v40, %v4432_v30 }
 0x2eb   :  { %2675 = vmatpush1.bf16.msra.mxu0 %v3734_v44  ;;  %2590 = vmatprep.subr.bf16.mxu1 %v3741_v45  ;;  %v1044_v44 = vrot.slane %v4474_v40, %v347_v55 }
 0x2ec   :  { %2676 = vmatprep.subr.bf16.mxu0 %v3743_v46 }
 0x2ee   :  { %2591 = vmatpush1.bf16.msra.mxu1 %v3740_v51 }
 0x2ef   :  { %2677 = vmatpush1.bf16.msra.mxu0 %v3742_v52  ;;  %2592 = vmatprep.subr.bf16.mxu1 %v3749_v54 }
 0x2f0   :  { %2678 = vmatprep.subr.bf16.mxu0 %v3751_v56 }
 0x2f2   :  { %2593 = vmatpush1.bf16.msra.mxu1 %v3748_v61 }
 0x2f3   :  { %2679 = vmatpush1.bf16.msra.mxu0 %v3750_v62  ;;  %2594 = vmatprep.subr.bf16.mxu1 %v3757_v63 }
 0x2f4   :  { %2680 = vmatprep.subr.bf16.mxu0 %v3759_v0 }
 0x2f6   :  { %2595 = vmatpush1.bf16.msra.mxu1 %v3756_v1 }
 0x2f7   :  { %2681 = vmatpush1.bf16.msra.mxu0 %v3758_v2  ;;  %3825 = vmatprep.subr.bf16.mxu1 %v4081_v3 }
 0x2f8   :  { %3847 = vmatprep.subr.bf16.mxu0 %v4082_v4 }
 0x2f9   :  { %2597 = vmatmul.mubr.bf16.vlgmr.msra.gmra.mrb[8].mxu1 %v4449_v22 }
 0x2fa   :  { %2683 = vmatmul.mubr.bf16.vlgmr.msra.gmra.mrb[12].mxu0 %v4449_v22  ;;  %3826 = vmatpush3.bf16.msra.mxu1 %v4083_v5  ;;  %v4096_v22 = vld [vmem:[#allocation10 + $0x98] sm:$0xff]  }
 0x2fb   :  { %3848 = vmatpush3.bf16.msra.mxu0 %v4084_v6  ;;  %3827 = vmatprep.subr.bf16.mxu1 %v4085_v26  ;;  %v4115_v26 = vld [vmem:[#allocation10 + $0x100] sm:$0xff]  }
 0x2fc   :  { %3849 = vmatprep.subr.bf16.mxu0 %v4086_v7  ;;  %v4116_v7 = vld [vmem:[#allocation10 + $0x180] sm:$0xff]  }
 0x2fe   :  { %3828 = vmatpush3.bf16.msra.mxu1 %v4087_v8  ;;  %v4117_v8 = vld [vmem:[#allocation10 + $0x148] sm:$0xff]  }
 0x2ff   :  { %3850 = vmatpush3.bf16.msra.mxu0 %v4088_v9  ;;  %3829 = vmatprep.subr.bf16.mxu1 %v4089_v10  ;;  %v4118_v9 = vld [vmem:[#allocation10 + $0x1c8] sm:$0xff]  }
 0x300   :  { %3851 = vmatprep.subr.bf16.mxu0 %v4090_v11  ;;  %v4119_v10 = vld [vmem:[#allocation10 + $0x108] sm:$0xff]  }
 0x301   :  { %v4120_v11 = vld [vmem:[#allocation10 + $0x188] sm:$0xff]  }
 0x302   :  { %3830 = vmatpush3.bf16.msra.mxu1 %v4091_v12  ;;  %v4121_v12 = vld [vmem:[#allocation10 + $0x150] sm:$0xff]  }
 0x303   :  { %3852 = vmatpush3.bf16.msra.mxu0 %v4092_v13  ;;  %3831 = vmatprep.subr.bf16.mxu1 %v4093_v14  ;;  %v4122_v13 = vld [vmem:[#allocation10 + $0x1d0] sm:$0xff]  }
 0x304   :  { %3853 = vmatprep.subr.bf16.mxu0 %v4094_v15  ;;  %v4123_v14 = vld [vmem:[#allocation10 + $0x110] sm:$0xff]  }
 0x305   :  { %v4124_v15 = vld [vmem:[#allocation10 + $0x190] sm:$0xff]  }
 0x306   :  { %3832 = vmatpush3.bf16.msra.mxu1 %v4095_v16  ;;  %v4125_v16 = vld [vmem:[#allocation10 + $0x158] sm:$0xff]  }
 0x307   :  { %3854 = vmatpush3.bf16.msra.mxu0 %v4096_v22  ;;  %3833 = vmatprep.subr.bf16.mxu1 %v4097_v21  ;;  %v4126_v22 = vld [vmem:[#allocation10 + $0x1d8] sm:$0xff]  }
 0x308   :  { %3855 = vmatprep.subr.bf16.mxu0 %v4098_v17  ;;  %v4127_v21 = vld [vmem:[#allocation10 + $0x118] sm:$0xff]  }
 0x309   :  { %v4128_v17 = vld [vmem:[#allocation10 + $0x198] sm:$0xff]  }
 0x30a   :  { %3834 = vmatpush3.bf16.msra.mxu1 %v4099_v18  ;;  %v4129_v18 = vld [vmem:[#allocation10 + $0x160] sm:$0xff]  }
 0x30b   :  { %3856 = vmatpush3.bf16.msra.mxu0 %v4100_v19  ;;  %3835 = vmatprep.subr.bf16.mxu1 %v4101_v20  ;;  %v4130_v19 = vld [vmem:[#allocation10 + $0x1e0] sm:$0xff]  }
 0x30c   :  { %3857 = vmatprep.subr.bf16.mxu0 %v4102_v23  ;;  %v4131_v20 = vld [vmem:[#allocation10 + $0x120] sm:$0xff]  }
 0x30d   :  { %v4132_v23 = vld [vmem:[#allocation10 + $0x1a0] sm:$0xff]  }
 0x30e   :  { %3836 = vmatpush3.bf16.msra.mxu1 %v4103_v24  ;;  %v4133_v24 = vld [vmem:[#allocation10 + $0x168] sm:$0xff]  }
 0x30f   :  { %3858 = vmatpush3.bf16.msra.mxu0 %v4104_v29  ;;  %3837 = vmatprep.subr.bf16.mxu1 %v4105_v25  ;;  %v4134_v29 = vld [vmem:[#allocation10 + $0x1e8] sm:$0xff]  }
 0x310   :  { %3859 = vmatprep.subr.bf16.mxu0 %v4106_v31  ;;  %v4135_v25 = vld [vmem:[#allocation10 + $0x128] sm:$0xff]  }
 0x311   :  { %v4136_v31 = vld [vmem:[#allocation10 + $0x1a8] sm:$0xff]  }
 0x312   :  { %3838 = vmatpush3.bf16.msra.mxu1 %v4107_v32  ;;  %v4137_v32 = vld [vmem:[#allocation10 + $0x170] sm:$0xff]  }
 0x313   :  { %3860 = vmatpush3.bf16.msra.mxu0 %v4108_v33  ;;  %3839 = vmatprep.subr.bf16.mxu1 %v4109_v34  ;;  %v4138_v33 = vld [vmem:[#allocation10 + $0x1f0] sm:$0xff]  }
 0x314   :  { %3861 = vmatprep.subr.bf16.mxu0 %v4110_v35  ;;  %v4139_v34 = vld [vmem:[#allocation10 + $0x130] sm:$0xff]  }
 0x315   :  { %v4140_v35 = vld [vmem:[#allocation10 + $0x1b0] sm:$0xff]  }
 0x316   :  { %3840 = vmatpush3.bf16.msra.mxu1 %v4111_v36  ;;  %v4141_v36 = vld [vmem:[#allocation10 + $0x178] sm:$0xff]  }
 0x317   :  { %3862 = vmatpush3.bf16.msra.mxu0 %v4112_v37  ;;  %3869 = vmatprep.subr.bf16.mxu1 %v4113_v38  ;;  %v4142_v37 = vld [vmem:[#allocation10 + $0x1f8] sm:$0xff]  }
 0x318   :  { %3891 = vmatprep.subr.bf16.mxu0 %v4114_v39  ;;  %v4143_v38 = vld [vmem:[#allocation10 + $0x138] sm:$0xff]  }
 0x319   :  { %v4144_v39 = vld [vmem:[#allocation10 + $0x1b8] sm:$0xff]  }
 0x34c   :  { %v2426_v45 = vpop.f32.mrb[4].mxu1  ;;  %v2512_v46 = vpop.f32.mrb[8].mxu0 }
 0x34d   :  { %v3913_v47 = vadd.f32 %v2426_v45, %v1032_v41  ;;  %v3917_v48 = vadd.f32 %v2512_v46, %v1040_v42  ;;  %v2428_v49 = vpop.f32.mrb[5].mxu1  ;;  %v2514_v50 = vpop.f32.mrb[9].mxu0 }
 0x34e   :  { %v3914_v51 = vadd.f32 %v2428_v49, %v1036_v43  ;;  %v3918_v52 = vadd.f32 %v2514_v50, %v1044_v44  ;;  %v2430_v28 = vpop.f32.mrb[6].mxu1  ;;  %v2516_v54 = vpop.f32.mrb[10].mxu0 }
 0x34f   :  { %v3915_v56 = vadd.f32 %v2430_v28, %v1032_v41  ;;  %v3919_v57 = vadd.f32 %v2516_v54, %v1040_v42  ;;  %v2432_v53 = vpop.f32.mrb[7].mxu1  ;;  %v2518_v58 = vpop.f32.mrb[11].mxu0  ;;  %v2693_v60 = vmax.f32 %v3913_v47, 0.0  ;;  %v2695_v61 = vmax.f32 %v3917_v48, 0.0 }
 0x350   :  { %v3916_v59 = vadd.f32 %v2432_v53, %v1036_v43  ;;  %v3920_v30 = vadd.f32 %v2518_v58, %v1044_v44  ;;  %v2694_v63 = vmax.f32 %v3914_v51, 0.0  ;;  %v2696_v0 = vmax.f32 %v3918_v52, 0.0 }
 0x351   :  { %v2701_v62 = vmax.f32 %v3915_v56, 0.0  ;;  %v2703_v55 = vmax.f32 %v3919_v57, 0.0  ;;  %v1047_v41 = vsub.s32 4, %v4423_v27  ;;  %v1055_v42 = vsub.s32 6, %v4423_v27 }
 0x352   :  { %v2702_v1 = vmax.f32 %v3916_v59, 0.0  ;;  %v2704_v2 = vmax.f32 %v3920_v30, 0.0  ;;  %v1051_v43 = vsub.s32 5, %v4423_v27  ;;  %v1059_v44 = vsub.s32 7, %v4423_v27 }
 0x353   :  { %v2709_v3 = vpack.c.bf16 %v2701_v62, %v2693_v60  ;;  %v2711_v4 = vpack.c.bf16 %v2703_v55, %v2695_v61  ;;  %v1048_v45 = vrot.slane %v4474_v40, %v1047_v41  ;;  %v1056_v46 = vrot.slane %v4474_v40, %v1055_v42 }
 0x354   :  { %v2710_v5 = vpack.c.bf16 %v2702_v1, %v2694_v63  ;;  %v2712_v6 = vpack.c.bf16 %v2704_v2, %v2696_v0  ;;  %v1052_v47 = vrot.slane %v4474_v40, %v1051_v43  ;;  %v1060_v48 = vrot.slane %v4474_v40, %v1059_v44 }
 0x356   :  { %3268 = vmatprep.mubr.bf16.mxu1 %v2710_v5  ;;  %3309 = vmatprep.mubr.bf16.mxu0 %v2712_v6 }
 0x357   :  { %3269 = vmatmul.mubr.bf16.vlgmr.msra.gmra.mrb[12].mxu1 %v2709_v3  ;;  %3310 = vmatmul.mubr.bf16.vlgmr.msra.gmra.mrb[16].mxu0 %v2711_v4 }
 0x358   :  { %3870 = vmatpush3.bf16.msra.mxu1 %v4115_v26  ;;  %3892 = vmatpush3.bf16.msra.mxu0 %v4116_v7 }
 0x359   :  { %3871 = vmatprep.subr.bf16.mxu1 %v4117_v8  ;;  %3893 = vmatprep.subr.bf16.mxu0 %v4118_v9 }
 0x35c   :  { %3872 = vmatpush3.bf16.msra.mxu1 %v4119_v10  ;;  %3894 = vmatpush3.bf16.msra.mxu0 %v4120_v11  ;;  %v3760_v10 = vld [vmem:[%s4520_s8] ss:$0 sm:$0xff]  ;;  %s4303_s8 = smov [#allocation11]  }
 0x35d   :  { %3873 = vmatprep.subr.bf16.mxu1 %v4121_v12  ;;  %3895 = vmatprep.subr.bf16.mxu0 %v4122_v13  ;;  %s3409_s15 = sshll.u32 %s4303_s8, 4  ;;  %s3410_s15 = int_to_ptr.vmem [resolvable:$true] %s3409_s15 }
 0x35e   :  { %s4259_s17 = scalar_lea.vmem %s3410_s15, 256  ;;  %p4264_p13 = scmp.lt.s32.totalorder %s3410_s15, %s3410_s15 }
 0x35f   :  { %p4260_p12 = scmp.ne.s32.totalorder %s3410_s15, %s4259_s17  ;;  %p4265_p0 = scmp.lt.s32.totalorder %s4259_s17, %s4259_s17 }
 0x360   :  { %3874 = vmatpush3.bf16.msra.mxu1 %v4123_v14  ;;  %3896 = vmatpush3.bf16.msra.mxu0 %v4124_v15 }
 0x361   :  { %3875 = vmatprep.subr.bf16.mxu1 %v4125_v16  ;;  %3897 = vmatprep.subr.bf16.mxu0 %v4126_v22  ;;  %p4266_p1 = por %p4265_p0, %p4264_p13 }
 0x363   :  { %p4267_p2 = pnand %p4266_p1, %p4260_p12 }
 0x364   :  { %3876 = vmatpush3.bf16.msra.mxu1 %v4127_v21  ;;  %3898 = vmatpush3.bf16.msra.mxu0 %v4128_v17 }
 0x365   :  { %3877 = vmatprep.subr.bf16.mxu1 %v4129_v18  ;;  %3899 = vmatprep.subr.bf16.mxu0 %v4130_v19 }
 0x368   :  { %3878 = vmatpush3.bf16.msra.mxu1 %v4131_v20  ;;  %3900 = vmatpush3.bf16.msra.mxu0 %v4132_v23 }
 0x369   :  { %3879 = vmatprep.subr.bf16.mxu1 %v4133_v24  ;;  %3901 = vmatprep.subr.bf16.mxu0 %v4134_v29 }
 0x36c   :  { %3880 = vmatpush3.bf16.msra.mxu1 %v4135_v25  ;;  %3902 = vmatpush3.bf16.msra.mxu0 %v4136_v31 }
 0x36d   :  { %3881 = vmatprep.subr.bf16.mxu1 %v4137_v32  ;;  %3903 = vmatprep.subr.bf16.mxu0 %v4138_v33 }
 0x370   :  { %3882 = vmatpush3.bf16.msra.mxu1 %v4139_v34  ;;  %3904 = vmatpush3.bf16.msra.mxu0 %v4140_v35 }
 0x371   :  { %3883 = vmatprep.subr.bf16.mxu1 %v4141_v36  ;;  %3905 = vmatprep.subr.bf16.mxu0 %v4142_v37 }
 0x374   :  { %3884 = vmatpush3.bf16.msra.mxu1 %v4143_v38  ;;  %3906 = vmatpush3.bf16.msra.mxu0 %v4144_v39 }
 0x3cc   :  { %v2598_v49 = vpop.f32.mrb[8].mxu1 }
 0x3cd   :  { %v3921_v50 = vadd.f32 %v2598_v49, %v1048_v45  ;;  %v2684_v51 = vpop.f32.mrb[12].mxu0  ;;  %v2600_v52 = vpop.f32.mrb[9].mxu1 }
 0x3ce   :  { %v3925_v28 = vadd.f32 %v2684_v51, %v1056_v46  ;;  %v3922_v54 = vadd.f32 %v2600_v52, %v1052_v47  ;;  %v2686_v56 = vpop.f32.mrb[13].mxu0  ;;  %v2602_v57 = vpop.f32.mrb[10].mxu1 }
 0x3cf   :  { %v3926_v53 = vadd.f32 %v2686_v56, %v1060_v48  ;;  %v3923_v58 = vadd.f32 %v2602_v57, %v1048_v45  ;;  %v2688_v59 = vpop.f32.mrb[14].mxu0  ;;  %v2604_v27 = vpop.f32.mrb[11].mxu1  ;;  %v2697_v62 = vmax.f32 %v3921_v50, 0.0 }
 0x3d0   :  { %v3927_v30 = vadd.f32 %v2688_v59, %v1056_v46  ;;  %v3924_v60 = vadd.f32 %v2604_v27, %v1052_v47  ;;  %v2690_v61 = vpop.f32.mrb[15].mxu0  ;;  %v2699_v0 = vmax.f32 %v3925_v28, 0.0  ;;  %v2698_v40 = vmax.f32 %v3922_v54, 0.0 }
 0x3d1   :  { %v2705_v55 = vmax.f32 %v3923_v58, 0.0  ;;  %v3928_v63 = vadd.f32 %v2690_v61, %v1060_v48  ;;  %v2700_v3 = vmax.f32 %v3926_v53, 0.0 }
 0x3d2   :  { %v2707_v1 = vmax.f32 %v3927_v30, 0.0  ;;  %v2706_v2 = vmax.f32 %v3924_v60, 0.0 }
 0x3d3   :  { %v2713_v4 = vpack.c.bf16 %v2705_v55, %v2697_v62  ;;  %v2708_v5 = vmax.f32 %v3928_v63, 0.0 }
 0x3d4   :  { %v2715_v6 = vpack.c.bf16 %v2707_v1, %v2699_v0  ;;  %v2714_v26 = vpack.c.bf16 %v2706_v2, %v2698_v40 }
 0x3d5   :  { %v2716_v7 = vpack.c.bf16 %v2708_v5, %v2700_v3 }
 0x3d6   :  { %3350 = vmatprep.mubr.bf16.mxu1 %v2714_v26 }
 0x3d7   :  { %3391 = vmatprep.mubr.bf16.mxu0 %v2716_v7  ;;  %3351 = vmatmul.mubr.bf16.vlgmr.msra.gmra.mrb[16].mxu1 %v2713_v4 }
 0x3d8   :  { %3392 = vmatmul.mubr.bf16.vlgmr.msra.gmra.mrb[20].mxu0 %v2715_v6 }
 0x42a   :  { %v3841_v8 = vpop.f32.mrb[12].mxu1  ;;  %v3863_v9 = vpop.f32.mrb[16].mxu0 }
 0x42b   :  { %v3842_v11 = vpop.f32.mrb[13].mxu1  ;;  %v3864_v12 = vpop.f32.mrb[17].mxu0 }
 0x42c   :  { %v3843_v13 = vadd.f32 %v3842_v11, %v3841_v8  ;;  %v3865_v14 = vadd.f32 %v3864_v12, %v3863_v9  ;;  %v3844_v15 = vpop.f32.mrb[14].mxu1  ;;  %v3866_v16 = vpop.f32.mrb[18].mxu0 }
 0x42d   :  { %v3845_v22 = vpop.f32.mrb[15].mxu1  ;;  %v3867_v21 = vpop.f32.mrb[19].mxu0 }
 0x42e   :  { %v3271_v17 = vadd.f32 %v3843_v13, %v3760_v10  ;;  %v3846_v18 = vadd.f32 %v3845_v22, %v3844_v15  ;;  %v3868_v19 = vadd.f32 %v3867_v21, %v3866_v16 }
 0x430   :  { %v3312_v20 = vadd.f32 %v3865_v14, %v3271_v17  ;;  %v3274_v23 = vadd.f32 %v3846_v18, %v3760_v10 }
 0x432   :  { %v3315_v24 = vadd.f32 %v3868_v19, %v3274_v23 }
 0x4aa   :  { %v3885_v29 = vpop.f32.mrb[16].mxu1 }
 0x4ab   :  { %v3907_v25 = vpop.f32.mrb[20].mxu0  ;;  %v3886_v31 = vpop.f32.mrb[17].mxu1 }
 0x4ac   :  { %v3887_v32 = vadd.f32 %v3886_v31, %v3885_v29  ;;  %v3908_v33 = vpop.f32.mrb[21].mxu0  ;;  %v3888_v34 = vpop.f32.mrb[18].mxu1 }
 0x4ad   :  { %v3909_v35 = vadd.f32 %v3908_v33, %v3907_v25  ;;  %v3910_v36 = vpop.f32.mrb[22].mxu0  ;;  %v3889_v37 = vpop.f32.mrb[19].mxu1 }
 0x4ae   :  { %v3353_v38 = vadd.f32 %v3887_v32, %v3312_v20  ;;  %v3890_v39 = vadd.f32 %v3889_v37, %v3888_v34  ;;  %v3911_v41 = vpop.f32.mrb[23].mxu0 }
 0x4af   :  { %v3912_v42 = vadd.f32 %v3911_v41, %v3910_v36 }
 0x4b0   :  { %v3394_v43 = vadd.f32 %v3909_v35, %v3353_v38  ;;  %v3356_v44 = vadd.f32 %v3890_v39, %v3315_v24 }
 0x4b2   :  { %4145 = vtanh.f32 %v3394_v43  ;;  %v3397_v45 = vadd.f32 %v3912_v42, %v3356_v44 }
 0x4b4   :  { %4147 = vtanh.f32 %v3397_v45 }
 0x4bc   :  { %v4146_v46 = vpop.eup %4145 }
 0x4bd   :  { %3402 = vst [vmem:[#allocation11] sm:$0xff] %v4146_v46 }
 0x4be   :  { %v4148_v47 = vpop.eup %4147 }
 0x4bf   :  { %3403 = vst [vmem:[#allocation11 + $0x8] sm:$0xff] %v4148_v47 }
 0x4c0   :  { %4270 = shalt.err (!%p4267_p2)
}
 0x4c1   :  { %s4271_s16 = scalar_lea.hbm %s4521_s9, 256 }
 0x4c2   :  { %p4272_p3 = scmp.ne.s32.totalorder %s4521_s9, %s4271_s16  ;;  %p4275_p4 = scmp.lt.u32.totalorder %s4271_s16, %s4521_s9 }
 0x4c4   :  { %p4277_p5 = pnand %p4275_p4, %p4272_p3 }
 0x4c6   :  { %4280 = shalt.err (!%p4277_p5)
}
 0x4c7   :  { %3415 = dma.vmem_to_hbm [thread:$0]  %s3410_s15, 256, %s4521_s9, [#allocation4], %s4290_s19, %s4290_s19, %s4291_s20  }
 0x4c8   :  { %4287 = dma.done.wait [#allocation4], 256  }
 0x4c9   :  { %4288 = vsyncadd [#allocation4], 4294967040 }
 0x4ca   :  { %3419 = vsyncpa [#allocation3], 1 }
 0x4cb   :  { %3420 = vsyncpa [#allocation6], 1 }
 0x4cc   :  { %3421 = vsyncpa [#allocation9], 1 }
 0x4cd   :  { %3422 = vsyncpa [#allocation4], 1 }

</bundles_post_ra>
